<compile_context>
chip_gen: v7x
topology: tpu7x:2x2x1
jax: 0.10.0
libtpu: 0.0.40
codegen_flags: <defaults>
</compile_context>

<pallas_src>
import functools

import jax
import jax.numpy as jnp
from jax import lax
from jax.experimental import pallas as pl
from jax.experimental.pallas import tpu as pltpu

MAX_SENTENCE_LENGTH = 192
BERT_HIDDEN = 768          # bert-base-cased hidden_size
VOCAB = 128                # surrogate vocab for the synthetic embedding table
HIDDEN_DIM = 32            # nn.LSTM(hidden_dim)
N_CLASSES = 3              # n_classes
OUT_PAD = 128              # lane-dense padded width for the final Linear


# ----------------------------------------------------------------------------
# Kernel 1: batched surrogate BERT pooler + fused LSTM input projection.
#   counts(TN,V)   = masked one-hot contraction over the sequence
#   mean(TN,768)   = (counts / len) @ emb                      (MXU)
#   pooled(TN,768) = tanh(mean @ w_pool + b_pool)              (MXU + EUP)
#   gates_x(TN,4H) = pooled @ w_ih + (b_ih + b_hh)             (MXU, hoisted
#                                                               out of the
#                                                               LSTM recurrence)
# ----------------------------------------------------------------------------
def _pooler_kernel(vocab, ids_ref, mask_ref, emb_ref, wp_ref, bp_ref,
                   wih_ref, bl_ref, out_ref):
    n_rows, seq_len = ids_ref.shape
    ids = ids_ref[...]                                    # (TN, L) int32
    mask = mask_ref[...]                                  # (TN, L) f32

    # Whole-tile masked token-count matrix (TN, V).
    iota_v = lax.broadcasted_iota(jnp.int32, (n_rows, seq_len, vocab), 2)
    onehot = ids[:, :, None] == iota_v                    # (TN, L, V) bool
    counts = jnp.sum(jnp.where(onehot, mask[:, :, None], 0.0), axis=1)  # (TN,V)

    denom = jnp.maximum(jnp.sum(mask, axis=1, keepdims=True), 1.0)      # (TN,1)
    counts = counts * pl.reciprocal(denom, approx=True)   # EUP reciprocal

    # Batched MXU chain (bf16 weights, f32 accumulation).
    mean = jnp.dot(counts.astype(jnp.bfloat16), emb_ref[...],
                   preferred_element_type=jnp.float32)                  # (TN,768)
    pooled = jnp.tanh(
        jnp.dot(mean.astype(jnp.bfloat16), wp_ref[...],
                preferred_element_type=jnp.float32) + bp_ref[...])      # (TN,768)
    out_ref[...] = (
        jnp.dot(pooled.astype(jnp.bfloat16), wih_ref[...],
                preferred_element_type=jnp.float32) + bl_ref[...])      # (TN,4H)


# ----------------------------------------------------------------------------
# Kernel 2: unidirectional LSTM recurrence (PyTorch gate order i,f,g,o) over
# precomputed gate inputs gates_x (S, B, 4H), blocked T_BLK timesteps per grid
# step, followed by the final Linear on the last hidden state.
# h/c live in VMEM scratch and persist across grid steps (reduction axis).
# ----------------------------------------------------------------------------
def _lstm_kernel(hidden, t_blk, gx_ref, whh_ref, wout_ref, bout_ref,
                 out_ref, h_scr, c_scr):
    blk = pl.program_id(0)

    @pl.when(blk == 0)
    def _():
        h_scr[...] = jnp.zeros_like(h_scr)
        c_scr[...] = jnp.zeros_like(c_scr)

    bsz = h_scr.shape[0]
    whh = whh_ref[...]                                    # (H, 4H) f32
    # Gate-id lane mask, hoisted out of the timestep loop
    # (g-gate occupies lanes [2H, 3H) of the 4H = 128-lane gate vector).
    lane = lax.broadcasted_iota(jnp.int32, (bsz, 4 * hidden), 1)
    is_g = (lane // hidden) == 2

    def step(i, carry):
        h, c = carry
        gates = gx_ref[i] + jnp.dot(h, whh,
                                    preferred_element_type=jnp.float32)  # (B,4H)
        # tanh(x) == 2*sigmoid(2x) - 1 -> single full-width EUP transcendental.
        scaled = jnp.where(is_g, gates + gates, gates)
        sg = jax.nn.sigmoid(scaled)
        act = jnp.where(is_g, sg + sg - 1.0, sg)          # (B, 4H)
        i_g = act[:, 0 * hidden:1 * hidden]
        f_g = act[:, 1 * hidden:2 * hidden]
        g_g = act[:, 2 * hidden:3 * hidden]
        o_g = act[:, 3 * hidden:4 * hidden]
        c_new = f_g * c + i_g * g_g
        h_new = o_g * jnp.tanh(c_new)
        return h_new, c_new

    h_f, c_f = lax.fori_loop(0, t_blk, step, (h_scr[...], c_scr[...]),
                             unroll=True)
    h_scr[...] = h_f
    c_scr[...] = c_f

    @pl.when(blk == pl.num_programs(0) - 1)
    def _():
        # Linear(hidden_dim, n_classes) on the LAST timestep's hidden state,
        # written 128-lane padded (lane-dense store); sliced in the wrapper.
        out_ref[...] = (jnp.dot(h_f, wout_ref[...],
                                preferred_element_type=jnp.float32)
                        + bout_ref[...])


# ----------------------------------------------------------------------------
# Tiling helpers.
# ----------------------------------------------------------------------------
def _row_tile(n):
    """Pooler row tile: whole array when small, 8-aligned tile (<=64) else.

    Capped at 64 rows so the (TN, 192, 128) one-hot intermediates stay well
    under the scoped-VMEM limit for any batch size.
    """
    if n <= 64:
        return n
    for t in (64, 32, 16, 8):
        if n % t == 0:
            return t
    return n


def _seq_block(s):
    """Timesteps per LSTM grid step (largest divisor of S up to 32)."""
    for t in (32, 16, 8, 4, 2, 1):
        if t <= s and s % t == 0:
            return t
    return 1


# ----------------------------------------------------------------------------
# Wrapper (glue in plain JAX: reshapes / padding / param plumbing).
# ----------------------------------------------------------------------------
def rnn_classifier_forward(params, input_ids, attention_mask):
    batch_size = input_ids.shape[0]
    ids = input_ids.reshape(-1, MAX_SENTENCE_LENGTH).astype(jnp.int32)
    mask = attention_mask.reshape(-1, MAX_SENTENCE_LENGTH).astype(jnp.float32)
    n_rows = ids.shape[0]
    seq_len = n_rows // batch_size

    # Pad rows to a multiple of 8 so the pooler tile always satisfies the
    # (8,128) sublane rule; padded rows have mask==0 and are sliced off below.
    pad = (-n_rows) % 8
    if pad:
        ids = jnp.pad(ids, ((0, pad), (0, 0)))
        mask = jnp.pad(mask, ((0, pad), (0, 0)))
    n_pad = n_rows + pad

    tn = _row_tile(n_pad)
    gates_x = pl.pallas_call(
        functools.partial(_pooler_kernel, VOCAB),
        grid=(n_pad // tn,),
        in_specs=[
            pl.BlockSpec((tn, MAX_SENTENCE_LENGTH), lambda r: (r, 0)),
            pl.BlockSpec((tn, MAX_SENTENCE_LENGTH), lambda r: (r, 0)),
            pl.BlockSpec((VOCAB, BERT_HIDDEN), lambda r: (0, 0)),
            pl.BlockSpec((BERT_HIDDEN, BERT_HIDDEN), lambda r: (0, 0)),
            pl.BlockSpec((1, BERT_HIDDEN), lambda r: (0, 0)),
            pl.BlockSpec((BERT_HIDDEN, 4 * HIDDEN_DIM), lambda r: (0, 0)),
            pl.BlockSpec((1, 4 * HIDDEN_DIM), lambda r: (0, 0)),
        ],
        out_specs=pl.BlockSpec((tn, 4 * HIDDEN_DIM), lambda r: (r, 0)),
        out_shape=jax.ShapeDtypeStruct((n_pad, 4 * HIDDEN_DIM), jnp.float32),
        compiler_params=pltpu.CompilerParams(
            dimension_semantics=("parallel",),
            vmem_limit_bytes=32 * 1024 * 1024),
    )(ids, mask, params["emb"], params["w_pool"], params["b_pool"],
      params["w_ih"], params["b_lstm"])
    gates_x = gates_x[:n_rows]

    # nn.Dropout(p=0.3): identity at inference time.
    # Tiny (N, 4H) reorder to seq-major; the expensive (N, 768) pooled
    # transpose is gone because x @ W_ih is fused into the pooler kernel.
    gx_sm = gates_x.reshape(batch_size, seq_len, 4 * HIDDEN_DIM)
    gx_sm = jnp.transpose(gx_sm, (1, 0, 2))               # (S, B, 4H)

    t_blk = _seq_block(seq_len)
    out_full = pl.pallas_call(
        functools.partial(_lstm_kernel, HIDDEN_DIM, t_blk),
        grid=(seq_len // t_blk,),
        in_specs=[
            pl.BlockSpec((t_blk, batch_size, 4 * HIDDEN_DIM),
                         lambda t: (t, 0, 0)),
            pl.BlockSpec((HIDDEN_DIM, 4 * HIDDEN_DIM), lambda t: (0, 0)),
            pl.BlockSpec((HIDDEN_DIM, OUT_PAD), lambda t: (0, 0)),
            pl.BlockSpec((1, OUT_PAD), lambda t: (0, 0)),
        ],
        out_specs=pl.BlockSpec((batch_size, OUT_PAD), lambda t: (0, 0)),
        out_shape=jax.ShapeDtypeStruct((batch_size, OUT_PAD), jnp.float32),
        scratch_shapes=[
            pltpu.VMEM((batch_size, HIDDEN_DIM), jnp.float32),   # h
            pltpu.VMEM((batch_size, HIDDEN_DIM), jnp.float32),   # c
        ],
        compiler_params=pltpu.CompilerParams(
            dimension_semantics=("arbitrary",)),
    )(gx_sm, params["w_hh"], params["w_out_p"], params["b_out_p"])

    return out_full[:, :N_CLASSES]


def init_params(key):
    ks = jax.random.split(key, 8)
    scale = 0.02
    # PyTorch LSTM stores (4H, in) / (4H, H); we pre-transpose for x @ W.
    w_ih = scale * jax.random.normal(ks[0], (BERT_HIDDEN, 4 * HIDDEN_DIM),
                                     jnp.float32)
    w_hh = scale * jax.random.normal(ks[1], (HIDDEN_DIM, 4 * HIDDEN_DIM),
                                     jnp.float32)
    b_ih = scale * jax.random.normal(ks[2], (4 * HIDDEN_DIM,), jnp.float32)
    b_hh = scale * jax.random.normal(ks[3], (4 * HIDDEN_DIM,), jnp.float32)
    w_out = scale * jax.random.normal(ks[6], (HIDDEN_DIM, N_CLASSES),
                                      jnp.float32)
    b_out = scale * jax.random.normal(ks[7], (1, N_CLASSES), jnp.float32)
    # 128-lane padded final Linear (lane-dense output store).
    w_out_p = jnp.zeros((HIDDEN_DIM, OUT_PAD),
                        jnp.float32).at[:, :N_CLASSES].set(w_out)
    b_out_p = jnp.zeros((1, OUT_PAD), jnp.float32).at[:, :N_CLASSES].set(b_out)
    return {
        # Big weights in bf16 (f32 accumulation inside the kernels).
        "emb": (scale * jax.random.normal(ks[4], (VOCAB, BERT_HIDDEN),
                                          jnp.float32)).astype(jnp.bfloat16),
        "w_pool": (scale * jax.random.normal(ks[5], (BERT_HIDDEN, BERT_HIDDEN),
                                             jnp.float32)).astype(jnp.bfloat16),
        "b_pool": jnp.zeros((1, BERT_HIDDEN), jnp.float32),
        "w_ih": w_ih.astype(jnp.bfloat16),
        "w_hh": w_hh,                                   # recurrent path: f32
        "b_lstm": (b_ih + b_hh).reshape(1, 4 * HIDDEN_DIM),
        "w_out_p": w_out_p,
        "b_out_p": b_out_p,
    }


if __name__ == "__main__":
    key = jax.random.PRNGKey(0)
    k_par, k_ids, k_len = jax.random.split(key, 3)

    params = init_params(k_par)

    batch, seq_chunks = 2, 2
    input_ids = jax.random.randint(
        k_ids, (batch, seq_chunks, MAX_SENTENCE_LENGTH), 0, VOCAB, jnp.int32)
    # deterministic attention mask with varying valid lengths
    lengths = jax.random.randint(
        k_len, (batch, seq_chunks, 1), 32, MAX_SENTENCE_LENGTH + 1, jnp.int32)
    pos = jnp.arange(MAX_SENTENCE_LENGTH, dtype=jnp.int32)[None, None, :]
    attention_mask = (pos < lengths).astype(jnp.int32)

    out = rnn_classifier_forward(params, input_ids, attention_mask)
    out = jax.block_until_ready(out)
    assert out.shape == (batch, N_CLASSES)
    print("KERNEL_OK")
</pallas_src>

<mosaic_0001>
module attributes {stable_mosaic.version = 11 : i64} {
  func.func @_pooler_kernel(%arg0: i32, %arg1: memref<8x192xi32, #tpu.memory_space<vmem>>, %arg2: memref<8x192xf32, #tpu.memory_space<vmem>>, %arg3: memref<128x768xbf16, #tpu.memory_space<vmem>>, %arg4: memref<768x768xbf16, #tpu.memory_space<vmem>>, %arg5: memref<1x768xf32, #tpu.memory_space<vmem>>, %arg6: memref<768x128xbf16, #tpu.memory_space<vmem>>, %arg7: memref<1x128xf32, #tpu.memory_space<vmem>>, %arg8: memref<8x128xf32, #tpu.memory_space<vmem>>) attributes {dimension_semantics = [#tpu.dimension_semantics<parallel>], iteration_bounds = array<i64: 1>, scalar_prefetch = 0 : i64, scratch_operands = 0 : i64, tpu.core_type = #tpu.core_type<tc>, window_params = [{transform_indices = @transform_0, window_bounds = array<i64: 8, 192>}, {transform_indices = @transform_1, window_bounds = array<i64: 8, 192>}, {pipeline_mode = #tpu.pipeline_mode<synchronous>, transform_indices = @transform_2, window_bounds = array<i64: 128, 768>}, {pipeline_mode = #tpu.pipeline_mode<synchronous>, transform_indices = @transform_3, window_bounds = array<i64: 768, 768>}, {pipeline_mode = #tpu.pipeline_mode<synchronous>, transform_indices = @transform_4, window_bounds = array<i64: 1, 768>}, {pipeline_mode = #tpu.pipeline_mode<synchronous>, transform_indices = @transform_5, window_bounds = array<i64: 768, 128>}, {pipeline_mode = #tpu.pipeline_mode<synchronous>, transform_indices = @transform_6, window_bounds = array<i64: 1, 128>}, {transform_indices = @transform_7, window_bounds = array<i64: 8, 128>}]} {
    %c0 = arith.constant 0 : index
    %c0_0 = arith.constant 0 : index
    %0 = vector.load %arg1[%c0, %c0_0] : memref<8x192xi32, #tpu.memory_space<vmem>>, vector<8x192xi32>
    %c0_1 = arith.constant 0 : index
    %c0_2 = arith.constant 0 : index
    %1 = vector.load %arg2[%c0_1, %c0_2] : memref<8x192xf32, #tpu.memory_space<vmem>>, vector<8x192xf32>
    %2 = tpu.iota {dimensions = array<i32: 2>} : vector<8x192x128xi32>
    %3 = vector.shape_cast %0 : vector<8x192xi32> to vector<8x192x1xi32>
    %4 = vector.broadcast %3 : vector<8x192x1xi32> to vector<8x192x128xi32>
    %5 = arith.cmpi eq, %4, %2 : vector<8x192x128xi32>
    %6 = vector.shape_cast %1 : vector<8x192xf32> to vector<8x192x1xf32>
    %cst = arith.constant 0.000000e+00 : f32
    %7 = vector.shape_cast %6 : vector<8x192x1xf32> to vector<8x192x1xf32>
    %8 = vector.broadcast %7 : vector<8x192x1xf32> to vector<8x192x128xf32>
    %9 = vector.broadcast %cst : f32 to vector<8x192x128xf32>
    %10 = arith.select %5, %8, %9 : vector<8x192x128xi1>, vector<8x192x128xf32>
    %cst_3 = arith.constant dense<0.000000e+00> : vector<8x128xf32>
    %11 = vector.multi_reduction <add>, %10, %cst_3 [1] : vector<8x192x128xf32> to vector<8x128xf32>
    %cst_4 = arith.constant dense<0.000000e+00> : vector<8xf32>
    %12 = vector.multi_reduction <add>, %1, %cst_4 [1] : vector<8x192xf32> to vector<8xf32>
    %13 = vector.shape_cast %12 : vector<8xf32> to vector<8x1xf32>
    %cst_5 = arith.constant 1.000000e+00 : f32
    %14 = vector.broadcast %cst_5 : f32 to vector<8x1xf32>
    %15 = arith.maximumf %13, %14 : vector<8x1xf32>
    %16 = tpu.reciprocal %15 {approx = true} : vector<8x1xf32> -> vector<8x1xf32>
    %17 = vector.broadcast %16 : vector<8x1xf32> to vector<8x128xf32>
    %18 = arith.mulf %11, %17 : vector<8x128xf32>
    %19 = arith.truncf %18 : vector<8x128xf32> to vector<8x128xbf16>
    %c0_6 = arith.constant 0 : index
    %c0_7 = arith.constant 0 : index
    %20 = vector.load %arg3[%c0_6, %c0_7] : memref<128x768xbf16, #tpu.memory_space<vmem>>, vector<128x768xbf16>
    %cst_8 = arith.constant dense<0.000000e+00> : vector<8x768xf32>
    %21 = tpu.matmul %19, %20, %cst_8 {dimension_numbers = #tpu.dot_dimension_numbers<[1], [0], [0], [1], [0, 0, 1, 1], [], []>} : vector<8x128xbf16>, vector<128x768xbf16>, vector<8x768xf32> -> vector<8x768xf32>
    %22 = arith.truncf %21 : vector<8x768xf32> to vector<8x768xbf16>
    %c0_9 = arith.constant 0 : index
    %c0_10 = arith.constant 0 : index
    %23 = vector.load %arg4[%c0_9, %c0_10] : memref<768x768xbf16, #tpu.memory_space<vmem>>, vector<768x768xbf16>
    %cst_11 = arith.constant dense<0.000000e+00> : vector<8x768xf32>
    %24 = tpu.matmul %22, %23, %cst_11 {dimension_numbers = #tpu.dot_dimension_numbers<[1], [0], [0], [1], [0, 0, 1, 1], [], []>} : vector<8x768xbf16>, vector<768x768xbf16>, vector<8x768xf32> -> vector<8x768xf32>
    %c0_12 = arith.constant 0 : index
    %c0_13 = arith.constant 0 : index
    %25 = vector.load %arg5[%c0_12, %c0_13] : memref<1x768xf32, #tpu.memory_space<vmem>>, vector<1x768xf32>
    %26 = vector.broadcast %25 : vector<1x768xf32> to vector<8x768xf32>
    %27 = arith.addf %24, %26 : vector<8x768xf32>
    %28 = math.tanh %27 : vector<8x768xf32>
    %29 = arith.truncf %28 : vector<8x768xf32> to vector<8x768xbf16>
    %c0_14 = arith.constant 0 : index
    %c0_15 = arith.constant 0 : index
    %30 = vector.load %arg6[%c0_14, %c0_15] : memref<768x128xbf16, #tpu.memory_space<vmem>>, vector<768x128xbf16>
    %cst_16 = arith.constant dense<0.000000e+00> : vector<8x128xf32>
    %31 = tpu.matmul %29, %30, %cst_16 {dimension_numbers = #tpu.dot_dimension_numbers<[1], [0], [0], [1], [0, 0, 1, 1], [], []>} : vector<8x768xbf16>, vector<768x128xbf16>, vector<8x128xf32> -> vector<8x128xf32>
    %c0_17 = arith.constant 0 : index
    %c0_18 = arith.constant 0 : index
    %32 = vector.load %arg7[%c0_17, %c0_18] : memref<1x128xf32, #tpu.memory_space<vmem>>, vector<1x128xf32>
    %33 = vector.broadcast %32 : vector<1x128xf32> to vector<8x128xf32>
    %34 = arith.addf %31, %33 : vector<8x128xf32>
    %c0_19 = arith.constant 0 : index
    %c0_20 = arith.constant 0 : index
    %35 = vector.load %arg8[%c0_19, %c0_20] : memref<8x128xf32, #tpu.memory_space<vmem>>, vector<8x128xf32>
    tpu.vector_store %arg8[%c0_19, %c0_20], %34 {strides = array<i32>} : memref<8x128xf32, #tpu.memory_space<vmem>>, vector<8x128xf32>,
    return
  }
  func.func @transform_0(%arg0: i32) -> (i32, i32) {
    %c0_i32 = arith.constant 0 : i32
    %c0_i32_0 = arith.constant 0 : i32
    return %arg0, %c0_i32 : i32, i32
  }
  func.func @transform_1(%arg0: i32) -> (i32, i32) {
    %c0_i32 = arith.constant 0 : i32
    %c0_i32_0 = arith.constant 0 : i32
    return %arg0, %c0_i32 : i32, i32
  }
  func.func @transform_2(%arg0: i32) -> (i32, i32) {
    %c0_i32 = arith.constant 0 : i32
    %c0_i32_0 = arith.constant 0 : i32
    %c0_i32_1 = arith.constant 0 : i32
    return %c0_i32, %c0_i32_0 : i32, i32
  }
  func.func @transform_3(%arg0: i32) -> (i32, i32) {
    %c0_i32 = arith.constant 0 : i32
    %c0_i32_0 = arith.constant 0 : i32
    %c0_i32_1 = arith.constant 0 : i32
    return %c0_i32, %c0_i32_0 : i32, i32
  }
  func.func @transform_4(%arg0: i32) -> (i32, i32) {
    %c0_i32 = arith.constant 0 : i32
    %c0_i32_0 = arith.constant 0 : i32
    %c0_i32_1 = arith.constant 0 : i32
    return %c0_i32, %c0_i32_0 : i32, i32
  }
  func.func @transform_5(%arg0: i32) -> (i32, i32) {
    %c0_i32 = arith.constant 0 : i32
    %c0_i32_0 = arith.constant 0 : i32
    %c0_i32_1 = arith.constant 0 : i32
    return %c0_i32, %c0_i32_0 : i32, i32
  }
  func.func @transform_6(%arg0: i32) -> (i32, i32) {
    %c0_i32 = arith.constant 0 : i32
    %c0_i32_0 = arith.constant 0 : i32
    %c0_i32_1 = arith.constant 0 : i32
    return %c0_i32, %c0_i32_0 : i32, i32
  }
  func.func @transform_7(%arg0: i32) -> (i32, i32) {
    %c0_i32 = arith.constant 0 : i32
    %c0_i32_0 = arith.constant 0 : i32
    return %arg0, %c0_i32 : i32, i32
  }
}

</mosaic_0001>

<bundles_post_ra>
// kernel: tpu_custom_call.1
= control target key start
LH: loop header
LB: loop body
LE: loop exit
PB: predicated region body
PF: predicated region fallthrough
CT: control target
= control target key end

     0   :  { %12 = vsyncpa [#allocation3], 0  ;;  %s8805_s0 = inlined_call_operand.hbm [shape: s32[8,192], index: 0, kind: input, shape index: {}]   ;;  %s8806_s1 = inlined_call_operand.hbm [shape: f32[8,192], index: 1, kind: input, shape index: {}]   ;;  %s8807_s2 = inlined_call_operand.hbm [shape: bf16[128,768], index: 2, kind: input, shape index: {}]   ;;  %s8808_s3 = inlined_call_operand.hbm [shape: bf16[768,768], index: 3, kind: input, shape index: {}]   ;;  %s8809_s4 = inlined_call_operand.hbm [shape: f32[1,768], index: 4, kind: input, shape index: {}]   ;;  %s8810_s5 = inlined_call_operand.hbm [shape: bf16[768,128], index: 5, kind: input, shape index: {}]   ;;  %s8811_s6 = inlined_call_operand.hbm [shape: f32[1,128], index: 6, kind: input, shape index: {}]   ;;  %s8812_s7 = inlined_call_operand.hbm [shape: f32[8,128], index: 7, kind: output, shape index: {}]  }
   0x1   :  { %13 = vsyncpa [#allocation6], 0 }
   0x2   :  { %14 = vsyncpa [#allocation9], 0 }
   0x3   :  { %15 = vsyncpa [#allocation12], 0 }
   0x4   :  { %16 = vsyncpa [#allocation4], 0  ;;  %s6782_s24 = smov [#allocation5]   ;;  %s6596_s28 = scalar_lea.hbm %s8806_s1, 256 }
   0x5   :  { %s33_s25 = sshll.u32 %s6782_s24, 4  ;;  %p6597_p0 = scmp.ne.s32.totalorder %s8806_s1, %s6596_s28  ;;  %s34_s25 = int_to_ptr.vmem [resolvable:$true] %s33_s25 }
   0x6   :  { %p6600_p1 = scmp.lt.u32.totalorder %s6596_s28, %s8806_s1 }
   0x8   :  { %p6602_p2 = pnand %p6600_p1, %p6597_p0 }
   0xa   :  { %6605 = shalt.err (!%p6602_p2)
}
   0xb   :  { %s6606_s10 = scalar_lea.vmem %s34_s25, 256  ;;  %p6611_p4 = scmp.lt.s32.totalorder %s34_s25, %s34_s25 }
   0xc   :  { %p6607_p3 = scmp.ne.s32.totalorder %s34_s25, %s6606_s10  ;;  %p6612_p5 = scmp.lt.s32.totalorder %s6606_s10, %s6606_s10 }
   0xe   :  { %p6613_p6 = por %p6612_p5, %p6611_p4 }
  0x10   :  { %p6614_p7 = pnand %p6613_p6, %p6607_p3 }
  0x12   :  { %6617 = shalt.err (!%p6614_p7)
}
  0x13   :  { %36 = dma.hbm_to_vmem [thread:$0]  %s8806_s1, 256, %s34_s25, [#allocation6]  }
  0x14   :  { %s6783_s13 = smov [#allocation8]   ;;  %s6784_s15 = smov [#allocation11]  }
  0x15   :  { %s54_s14 = sshll.u32 %s6783_s13, 4  ;;  %s76_s16 = sshll.u32 %s6784_s15, 4  ;;  %s55_s14 = int_to_ptr.vmem [resolvable:$true] %s54_s14  ;;  %s77_s16 = int_to_ptr.vmem [resolvable:$true] %s76_s16 }
  0x16   :  { %s6618_s19 = scalar_lea.hbm %s8808_s3, 36864 }
  0x17   :  { %p6619_p8 = scmp.ne.s32.totalorder %s8808_s3, %s6618_s19  ;;  %p6622_p9 = scmp.lt.u32.totalorder %s6618_s19, %s8808_s3 }
  0x19   :  { %p6624_p10 = pnand %p6622_p9, %p6619_p8 }
  0x1b   :  { %6627 = shalt.err (!%p6624_p10)
}
  0x1c   :  { %s6628_s1 = scalar_lea.vmem %s55_s14, 36864  ;;  %p6633_p12 = scmp.lt.s32.totalorder %s55_s14, %s55_s14 }
  0x1d   :  { %p6629_p11 = scmp.ne.s32.totalorder %s55_s14, %s6628_s1  ;;  %p6634_p13 = scmp.lt.s32.totalorder %s6628_s1, %s6628_s1 }
  0x1f   :  { %p6635_p0 = por %p6634_p13, %p6633_p12 }
  0x21   :  { %p6636_p1 = pnand %p6635_p0, %p6629_p11 }
  0x23   :  { %6639 = shalt.err (!%p6636_p1)
}
  0x24   :  { %s6785_s24 = smov 384   ;;  %s6786_s25 = smov 24  }
  0x25   :  { %60 = dma.hbm_to_vmem [thread:$0]  %s8808_s3, 36864, %s55_s14, [#allocation9], %s6785_s24, %s6785_s24, %s6786_s25  }
  0x26   :  { %s6640_s30 = scalar_lea.hbm %s8810_s5, 6144 }
  0x27   :  { %p6641_p2 = scmp.ne.s32.totalorder %s8810_s5, %s6640_s30  ;;  %p6644_p3 = scmp.lt.u32.totalorder %s6640_s30, %s8810_s5 }
  0x29   :  { %p6646_p4 = pnand %p6644_p3, %p6641_p2 }
  0x2b   :  { %6649 = shalt.err (!%p6646_p4)
}
  0x2c   :  { %s6650_s12 = scalar_lea.vmem %s77_s16, 6144  ;;  %p6655_p6 = scmp.lt.s32.totalorder %s77_s16, %s77_s16 }
  0x2d   :  { %p6651_p5 = scmp.ne.s32.totalorder %s77_s16, %s6650_s12  ;;  %p6656_p7 = scmp.lt.s32.totalorder %s6650_s12, %s6650_s12 }
  0x2f   :  { %p6657_p8 = por %p6656_p7, %p6655_p6 }
  0x31   :  { %p6658_p9 = pnand %p6657_p8, %p6651_p5 }
  0x33   :  { %6661 = shalt.err (!%p6658_p9)
}
  0x34   :  { %s6787_s3 = smov 64   ;;  %s6788_s13 = smov 4  }
  0x35   :  { %82 = dma.hbm_to_vmem [thread:$0]  %s8810_s5, 6144, %s77_s16, [#allocation12], %s6787_s3, %s6787_s3, %s6788_s13  }
  0x36   :  { %s6789_s17 = smov [#allocation2]   ;;  %s6790_s19 = smov [#allocation7]  }
  0x37   :  { %s23_s18 = sshll.u32 %s6789_s17, 4  ;;  %s42_s20 = sshll.u32 %s6790_s19, 4  ;;  %s24_s18 = int_to_ptr.vmem [resolvable:$true] %s23_s18  ;;  %s43_s20 = int_to_ptr.vmem [resolvable:$true] %s42_s20 }
  0x38   :  { %s6662_s23 = scalar_lea.hbm %s8805_s0, 256 }
  0x39   :  { %p6663_p10 = scmp.ne.s32.totalorder %s8805_s0, %s6662_s23  ;;  %p6666_p11 = scmp.lt.u32.totalorder %s6662_s23, %s8805_s0 }
  0x3b   :  { %p6668_p12 = pnand %p6666_p11, %p6663_p10 }
  0x3d   :  { %6671 = shalt.err (!%p6668_p12)
}
  0x3e   :  { %s6672_s5 = scalar_lea.vmem %s24_s18, 256  ;;  %p6677_p0 = scmp.lt.s32.totalorder %s24_s18, %s24_s18 }
  0x3f   :  { %p6673_p13 = scmp.ne.s32.totalorder %s24_s18, %s6672_s5  ;;  %p6678_p1 = scmp.lt.s32.totalorder %s6672_s5, %s6672_s5 }
  0x41   :  { %p6679_p2 = por %p6678_p1, %p6677_p0 }
  0x43   :  { %p6680_p3 = pnand %p6679_p2, %p6673_p13 }
  0x45   :  { %6683 = shalt.err (!%p6680_p3)
}
  0x46   :  { %26 = dma.hbm_to_vmem [thread:$0]  %s8805_s0, 256, %s24_s18, [#allocation3]  }
  0x47   :  { %s6684_s9 = scalar_lea.hbm %s8807_s2, 6144 }
  0x48   :  { %p6685_p4 = scmp.ne.s32.totalorder %s8807_s2, %s6684_s9  ;;  %p6688_p5 = scmp.lt.u32.totalorder %s6684_s9, %s8807_s2 }
  0x4a   :  { %p6690_p6 = pnand %p6688_p5, %p6685_p4 }
  0x4c   :  { %6693 = shalt.err (!%p6690_p6)
}
  0x4d   :  { %s6694_s13 = scalar_lea.vmem %s43_s20, 6144  ;;  %p6699_p8 = scmp.lt.s32.totalorder %s43_s20, %s43_s20 }
  0x4e   :  { %p6695_p7 = scmp.ne.s32.totalorder %s43_s20, %s6694_s13  ;;  %p6700_p9 = scmp.lt.s32.totalorder %s6694_s13, %s6694_s13 }
  0x50   :  { %p6701_p10 = por %p6700_p9, %p6699_p8 }
  0x52   :  { %p6702_p11 = pnand %p6701_p10, %p6695_p7 }
  0x54   :  { %6705 = shalt.err (!%p6702_p11)
}
  0x55   :  { %48 = dma.hbm_to_vmem [thread:$0]  %s8807_s2, 6144, %s43_s20, [#allocation6], %s6785_s24, %s6785_s24, %s6786_s25  }
  0x56   :  { %s6791_s15 = smov [#allocation10]   ;;  %s6792_s18 = smov [#allocation13]  }
  0x57   :  { %s67_s17 = sshll.u32 %s6791_s15, 4  ;;  %s89_s19 = sshll.u32 %s6792_s18, 4  ;;  %s68_s17 = int_to_ptr.vmem [resolvable:$true] %s67_s17  ;;  %s90_s19 = int_to_ptr.vmem [resolvable:$true] %s89_s19 }
  0x58   :  { %s6706_s23 = scalar_lea.hbm %s8809_s4, 96 }
  0x59   :  { %p6707_p12 = scmp.ne.s32.totalorder %s8809_s4, %s6706_s23  ;;  %p6710_p13 = scmp.lt.u32.totalorder %s6706_s23, %s8809_s4 }
  0x5b   :  { %p6712_p0 = pnand %p6710_p13, %p6707_p12 }
  0x5d   :  { %6715 = shalt.err (!%p6712_p0)
}
  0x5e   :  { %s6716_s2 = scalar_lea.vmem %s68_s17, 96  ;;  %p6721_p2 = scmp.lt.s32.totalorder %s68_s17, %s68_s17 }
  0x5f   :  { %p6717_p1 = scmp.ne.s32.totalorder %s68_s17, %s6716_s2  ;;  %p6722_p3 = scmp.lt.s32.totalorder %s6716_s2, %s6716_s2 }
  0x61   :  { %p6723_p4 = por %p6722_p3, %p6721_p2 }
  0x63   :  { %p6724_p5 = pnand %p6723_p4, %p6717_p1 }
  0x65   :  { %6727 = shalt.err (!%p6724_p5)
}
  0x66   :  { %70 = dma.hbm_to_vmem [thread:$0]  %s8809_s4, 96, %s68_s17, [#allocation9]  }
  0x67   :  { %s6728_s16 = scalar_lea.hbm %s8811_s6, 16 }
  0x68   :  { %p6729_p6 = scmp.ne.s32.totalorder %s8811_s6, %s6728_s16  ;;  %p6732_p7 = scmp.lt.u32.totalorder %s6728_s16, %s8811_s6 }
  0x6a   :  { %p6734_p8 = pnand %p6732_p7, %p6729_p6 }
  0x6c   :  { %6737 = shalt.err (!%p6734_p8)
}
  0x6d   :  { %s6738_s10 = scalar_lea.vmem %s90_s19, 16  ;;  %s6742_s11 = scalar_lea.vmem %s90_s19, 32 }
  0x6e   :  { %p6739_p9 = scmp.ne.s32.totalorder %s90_s19, %s6738_s10  ;;  %p6743_p10 = scmp.lt.s32.totalorder %s90_s19, %s90_s19 }
  0x6f   :  { %p6744_p11 = scmp.lt.s32.totalorder %s6742_s11, %s6738_s10 }
  0x71   :  { %p6745_p12 = por %p6744_p11, %p6743_p10 }
  0x73   :  { %p6746_p13 = pnand %p6745_p12, %p6739_p9 }
  0x75   :  { %6749 = shalt.err (!%p6746_p13)
}
  0x76   :  { %92 = dma.hbm_to_vmem [thread:$0]  %s8811_s6, 16, %s90_s19, [#allocation12]  }
  0x77   :  { %6772 = dma.done.wait [#allocation3], 256  }
  0x78   :  { %6773 = vsyncadd [#allocation3], 4294967040 }
  0x79   :  { %6774 = dma.done.wait [#allocation6], 6400  }
  0x7a   :  { %6775 = vsyncadd [#allocation6], 4294960896 }
  0x7b   :  { %6776 = dma.done.wait [#allocation9], 36960  }
  0x7c   :  { %6777 = vsyncadd [#allocation9], 4294930336 }
  0x7d   :  { %6778 = dma.done.wait [#allocation12], 6160  }
  0x7e   :  { %6779 = vsyncadd [#allocation12], 4294961136  ;;  %v8813_v0 = vlaneseq  ;;  %v6930_v4 = vld [vmem:[#allocation2] sm:$0xff]  ;;  %v6940_v7 = vld [vmem:[#allocation5] sm:$0xff]  ;;  %vm2369_vm0 = vcmask 523264   ;;  %s6794_s6 = smov [#allocation14]  }
  0x7f   :  { %s5523_s3 = sshll.u32 %s6794_s6, 4  ;;  %s5524_s3 = int_to_ptr.vmem [resolvable:$true] %s5523_s3 }
  0x80   :  { %v122_v1 = vshrl.u32 %v8813_v0, 7  ;;  %s6750_s13 = scalar_lea.vmem %s5524_s3, 128  ;;  %p6755_p1 = scmp.lt.s32.totalorder %s5524_s3, %s5524_s3 }
  0x81   :  { %p6751_p0 = scmp.ne.s32.totalorder %s5524_s3, %s6750_s13  ;;  %p6756_p2 = scmp.lt.s32.totalorder %s6750_s13, %s6750_s13 }
  0x82   :  { %v6926_v2 = vsub.s32 2, %v122_v1  ;;  %v6928_v3 = vsub.s32 1, %v122_v1  ;;  %v6950_v9 = vsub.s32 0, %v122_v1  ;;  %v6958_v11 = vsub.s32 3, %v122_v1 }
  0x83   :  { %v6974_v14 = vsub.s32 4, %v122_v1  ;;  %v6998_v18 = vsub.s32 5, %v122_v1  ;;  %v7014_v21 = vsub.s32 6, %v122_v1  ;;  %v7036_v24 = vsub.s32 7, %v122_v1  ;;  %p6757_p3 = por %p6756_p2, %p6755_p1 }
  0x84   :  { %8837 = vst [vmem:[#allocation20_spill] sm:$0xff] %v6926_v2  ;;  %8838 = vst [vmem:[#allocation21_spill] sm:$0xff] %v6928_v3  ;;  %v6934_v5 = vrot.slane %v6930_v4, %v6926_v2  ;;  %v6938_v6 = vrot.slane %v6930_v4, %v6928_v3  ;;  %v6948_v8 = vrot.slane %v6940_v7, %v6928_v3 }
  0x85   :  { %8839 = vst [vmem:[#allocation22_spill] sm:$0xff] %v6950_v9  ;;  %v6956_v10 = vrot.slane %v6930_v4, %v6950_v9  ;;  %8840 = vst [vmem:[#allocation23_spill] sm:$0xff] %v6958_v11  ;;  %v6964_v12 = vrot.slane %v6930_v4, %v6958_v11  ;;  %v6970_v13 = vrot.slane %v6940_v7, %v6926_v2  ;;  %p6758_p4 = pnand %p6757_p3, %p6751_p0 }
  0x86   :  { %330 = vbcast.lane.b32.xlu1 %v6934_v5, 256  ;;  %228 = vbcast.lane.b32.xlu0 %v6938_v6, 256  ;;  %8841 = vst [vmem:[#allocation24_spill] sm:$0xff] %v6974_v14  ;;  %v6980_v15 = vrot.slane %v6930_v4, %v6974_v14  ;;  %v6986_v16 = vrot.slane %v6940_v7, %v6950_v9  ;;  %8842 = vst [vmem:[#allocation25_spill] sm:$0xff] %v6998_v18 }
  0x87   :  { %v6992_v17 = vrot.slane %v6940_v7, %v6958_v11  ;;  %v7004_v19 = vrot.slane %v6930_v4, %v6998_v18  ;;  %v7010_v20 = vrot.slane %v6940_v7, %v6974_v14  ;;  %v7020_v22 = vrot.slane %v6930_v4, %v7014_v21 }
  0x88   :  { %v7030_v23 = vrot.slane %v6940_v7, %v6998_v18  ;;  %v7042_v25 = vrot.slane %v6930_v4, %v7036_v24  ;;  %v7050_v26 = vrot.slane %v6940_v7, %v7014_v21  ;;  %v7062_v27 = vrot.slane %v6940_v7, %v7036_v24 }
  0x8a   :  { %334 = vbcast.lane.b32.xlu1 %v6934_v5, 264  ;;  %232 = vbcast.lane.b32.xlu0 %v6938_v6, 264 }
  0x8e   :  { %1240 = vbcast.lane.b32.xlu1 %v6948_v8, 264  ;;  %1236 = vbcast.lane.b32.xlu0 %v6948_v8, 256 }
  0x92   :  { %130 = vbcast.lane.b32.xlu1 %v6956_v10, 264  ;;  %126 = vbcast.lane.b32.xlu0 %v6956_v10, 256 }
  0x96   :  { %432 = vbcast.lane.b32.xlu1 %v6964_v12, 256  ;;  %236 = vbcast.lane.b32.xlu0 %v6938_v6, 272 }
  0x9a   :  { %1338 = vbcast.lane.b32.xlu1 %v6970_v13, 256  ;;  %436 = vbcast.lane.b32.xlu0 %v6964_v12, 264 }
  0x9e   :  { %338 = vbcast.lane.b32.xlu1 %v6934_v5, 272  ;;  %1342 = vbcast.lane.b32.xlu0 %v6970_v13, 264 }
  0xa2   :  { %538 = vbcast.lane.b32.xlu1 %v6980_v15, 264  ;;  %534 = vbcast.lane.b32.xlu0 %v6980_v15, 256 }
  0xa6   :  { %1138 = vbcast.lane.b32.xlu1 %v6986_v16, 264  ;;  %1134 = vbcast.lane.b32.xlu0 %v6986_v16, 256 }
  0xaa   :  { %1440 = vbcast.lane.b32.xlu1 %v6992_v17, 256  ;;  %1244 = vbcast.lane.b32.xlu0 %v6948_v8, 272 }
  0xae   :  { %134 = vbcast.lane.b32.xlu1 %v6956_v10, 272  ;;  %1444 = vbcast.lane.b32.xlu0 %v6992_v17, 264 }
  0xb2   :  { %440 = vbcast.lane.b32.xlu1 %v6964_v12, 272  ;;  %240 = vbcast.lane.b32.xlu0 %v6938_v6, 280 }
  0xb6   :  { %640 = vbcast.lane.b32.xlu1 %v7004_v19, 264  ;;  %636 = vbcast.lane.b32.xlu0 %v7004_v19, 256 }
  0xba   :  { %1542 = vbcast.lane.b32.xlu1 %v7010_v20, 256  ;;  %1346 = vbcast.lane.b32.xlu0 %v6970_v13, 272 }
  0xbe   :  { %342 = vbcast.lane.b32.xlu1 %v6934_v5, 280  ;;  %1546 = vbcast.lane.b32.xlu0 %v7010_v20, 264 }
  0xc2   :  { %738 = vbcast.lane.b32.xlu1 %v7020_v22, 256  ;;  %542 = vbcast.lane.b32.xlu0 %v6980_v15, 272 }
  0xc6   :  { %1142 = vbcast.lane.b32.xlu1 %v6986_v16, 272  ;;  %742 = vbcast.lane.b32.xlu0 %v7020_v22, 264 }
  0xca   :  { %1448 = vbcast.lane.b32.xlu1 %v6992_v17, 272  ;;  %1248 = vbcast.lane.b32.xlu0 %v6948_v8, 280 }
  0xce   :  { %1648 = vbcast.lane.b32.xlu1 %v7030_v23, 264  ;;  %1644 = vbcast.lane.b32.xlu0 %v7030_v23, 256 }
  0xd2   :  { %244 = vbcast.lane.b32.xlu1 %v6938_v6, 288  ;;  %138 = vbcast.lane.b32.xlu0 %v6956_v10, 280 }
  0xd6   :  { %644 = vbcast.lane.b32.xlu1 %v7004_v19, 272  ;;  %444 = vbcast.lane.b32.xlu0 %v6964_v12, 280 }
  0xda   :  { %844 = vbcast.lane.b32.xlu1 %v7042_v25, 264  ;;  %840 = vbcast.lane.b32.xlu0 %v7042_v25, 256 }
  0xde   :  { %1550 = vbcast.lane.b32.xlu1 %v7010_v20, 272  ;;  %1350 = vbcast.lane.b32.xlu0 %v6970_v13, 280 }
  0xe2   :  { %1750 = vbcast.lane.b32.xlu1 %v7050_v26, 264  ;;  %1746 = vbcast.lane.b32.xlu0 %v7050_v26, 256 }
  0xe6   :  { %546 = vbcast.lane.b32.xlu1 %v6980_v15, 280  ;;  %346 = vbcast.lane.b32.xlu0 %v6934_v5, 288 }
  0xea   :  { %1146 = vbcast.lane.b32.xlu1 %v6986_v16, 280  ;;  %746 = vbcast.lane.b32.xlu0 %v7020_v22, 272 }
  0xee   :  { %1452 = vbcast.lane.b32.xlu1 %v6992_v17, 280  ;;  %1252 = vbcast.lane.b32.xlu0 %v6948_v8, 288 }
  0xf2   :  { %1848 = vbcast.lane.b32.xlu1 %v7062_v27, 256  ;;  %1652 = vbcast.lane.b32.xlu0 %v7030_v23, 272 }
  0xf6   :  { %142 = vbcast.lane.b32.xlu1 %v6956_v10, 288  ;;  %1852 = vbcast.lane.b32.xlu0 %v7062_v27, 264 }
  0xf8   :  { %v7068_v28 = vpop.permute.xlu1 %330  ;;  %v7070_v29 = vpop.permute.xlu0 %228 }
  0xfa   :  { %448 = vbcast.lane.b32.xlu1 %v6964_v12, 288  ;;  %248 = vbcast.lane.b32.xlu0 %v6938_v6, 296 }
  0xfc   :  { %v7074_v30 = vpop.permute.xlu1 %334  ;;  %v7076_v31 = vpop.permute.xlu0 %232 }
  0xfe   :  { %848 = vbcast.lane.b32.xlu1 %v7042_v25, 272  ;;  %648 = vbcast.lane.b32.xlu0 %v7004_v19, 280 }
 0x100   :  { %v7080_v32 = vpop.permute.xlu1 %1240  ;;  %v7082_v33 = vpop.permute.xlu0 %1236 }
 0x102   :  { %1554 = vbcast.lane.b32.xlu1 %v7010_v20, 280  ;;  %1354 = vbcast.lane.b32.xlu0 %v6970_v13, 288 }
 0x104   :  { %v7086_v34 = vpop.permute.xlu1 %130  ;;  %v7088_v35 = vpop.permute.xlu0 %126 }
 0x106   :  { %350 = vbcast.lane.b32.xlu1 %v6934_v5, 296  ;;  %1754 = vbcast.lane.b32.xlu0 %v7050_v26, 272 }
 0x108   :  { %v7092_v36 = vpop.permute.xlu1 %432  ;;  %v7094_v37 = vpop.permute.xlu0 %236 }
 0x10a   :  { %750 = vbcast.lane.b32.xlu1 %v7020_v22, 280  ;;  %550 = vbcast.lane.b32.xlu0 %v6980_v15, 288 }
 0x10c   :  { %v7098_v38 = vpop.permute.xlu1 %1338  ;;  %v7100_v39 = vpop.permute.xlu0 %436 }
 0x10e   :  { %1256 = vbcast.lane.b32.xlu1 %v6948_v8, 296  ;;  %1150 = vbcast.lane.b32.xlu0 %v6986_v16, 288 }
 0x110   :  { %v7104_v40 = vpop.permute.xlu1 %338  ;;  %v7106_v41 = vpop.permute.xlu0 %1342 }
 0x112   :  { %1656 = vbcast.lane.b32.xlu1 %v7030_v23, 280  ;;  %1456 = vbcast.lane.b32.xlu0 %v6992_v17, 288 }
 0x114   :  { %v7110_v42 = vpop.permute.xlu1 %538  ;;  %v7112_v43 = vpop.permute.xlu0 %534 }
 0x116   :  { %146 = vbcast.lane.b32.xlu1 %v6956_v10, 296  ;;  %1856 = vbcast.lane.b32.xlu0 %v7062_v27, 272 }
 0x118   :  { %v7116_v44 = vpop.permute.xlu1 %1138  ;;  %v7118_v45 = vpop.permute.xlu0 %1134 }
 0x11a   :  { %452 = vbcast.lane.b32.xlu1 %v6964_v12, 296  ;;  %252 = vbcast.lane.b32.xlu0 %v6938_v6, 304 }
 0x11c   :  { %v7122_v46 = vpop.permute.xlu1 %1440  ;;  %v7124_v47 = vpop.permute.xlu0 %1244 }
 0x11e   :  { %852 = vbcast.lane.b32.xlu1 %v7042_v25, 280  ;;  %652 = vbcast.lane.b32.xlu0 %v7004_v19, 288 }
 0x120   :  { %v7128_v48 = vpop.permute.xlu1 %134  ;;  %v7130_v49 = vpop.permute.xlu0 %1444 }
 0x122   :  { %1558 = vbcast.lane.b32.xlu1 %v7010_v20, 288  ;;  %1358 = vbcast.lane.b32.xlu0 %v6970_v13, 296 }
 0x124   :  { %v7134_v50 = vpop.permute.xlu1 %440  ;;  %v7136_v51 = vpop.permute.xlu0 %240 }
 0x126   :  { %354 = vbcast.lane.b32.xlu1 %v6934_v5, 304  ;;  %1758 = vbcast.lane.b32.xlu0 %v7050_v26, 280 }
 0x128   :  { %v7140_v52 = vpop.permute.xlu1 %640  ;;  %v7142_v53 = vpop.permute.xlu0 %636 }
 0x12a   :  { %754 = vbcast.lane.b32.xlu1 %v7020_v22, 288  ;;  %554 = vbcast.lane.b32.xlu0 %v6980_v15, 296 }
 0x12c   :  { %v7146_v54 = vpop.permute.xlu1 %1542  ;;  %v7148_v55 = vpop.permute.xlu0 %1346 }
 0x12e   :  { %1260 = vbcast.lane.b32.xlu1 %v6948_v8, 304  ;;  %1154 = vbcast.lane.b32.xlu0 %v6986_v16, 296 }
 0x130   :  { %v7152_v56 = vpop.permute.xlu1 %342  ;;  %v7154_v57 = vpop.permute.xlu0 %1546 }
 0x131   :  { %8843 = vst [vmem:[#allocation26_spill] sm:$0xff] %v7152_v56 }
 0x132   :  { %1660 = vbcast.lane.b32.xlu1 %v7030_v23, 288  ;;  %1460 = vbcast.lane.b32.xlu0 %v6992_v17, 296 }
 0x134   :  { %v7158_v58 = vpop.permute.xlu1 %738  ;;  %v7160_v59 = vpop.permute.xlu0 %542 }
 0x135   :  { %8844 = vst [vmem:[#allocation27_spill] sm:$0xff] %v7158_v58  ;;  %8845 = vst [vmem:[#allocation28_spill] sm:$0xff] %v7160_v59 }
 0x136   :  { %150 = vbcast.lane.b32.xlu1 %v6956_v10, 304  ;;  %1860 = vbcast.lane.b32.xlu0 %v7062_v27, 280 }
 0x138   :  { %v7164_v60 = vpop.permute.xlu1 %1142  ;;  %v7166_v61 = vpop.permute.xlu0 %742 }
 0x139   :  { %8846 = vst [vmem:[#allocation29_spill] sm:$0xff] %v7166_v61 }
 0x13a   :  { %456 = vbcast.lane.b32.xlu1 %v6964_v12, 304  ;;  %256 = vbcast.lane.b32.xlu0 %v6938_v6, 312 }
 0x13c   :  { %v7170_v62 = vpop.permute.xlu1 %1448  ;;  %v7172_v63 = vpop.permute.xlu0 %1248 }
 0x13e   :  { %856 = vbcast.lane.b32.xlu1 %v7042_v25, 288  ;;  %656 = vbcast.lane.b32.xlu0 %v7004_v19, 296 }
 0x140   :  { %v7176_v1 = vpop.permute.xlu1 %1648  ;;  %v7178_v4 = vpop.permute.xlu0 %1644 }
 0x142   :  { %1562 = vbcast.lane.b32.xlu1 %v7010_v20, 296  ;;  %1362 = vbcast.lane.b32.xlu0 %v6970_v13, 304 }
 0x144   :  { %v7182_v7 = vpop.permute.xlu1 %244  ;;  %v7184_v0 = vpop.permute.xlu0 %138 }
 0x145   :  { %8847 = vst [vmem:[#allocation30_spill] sm:$0xff] %v7182_v7  ;;  %8848 = vst [vmem:[#allocation31_spill] sm:$0xff] %v7184_v0 }
 0x146   :  { %358 = vbcast.lane.b32.xlu1 %v6934_v5, 312  ;;  %1762 = vbcast.lane.b32.xlu0 %v7050_v26, 288 }
 0x148   :  { %v7188_v61 = vpop.permute.xlu1 %644  ;;  %v7190_v59 = vpop.permute.xlu0 %444 }
 0x149   :  { %8849 = vst [vmem:[#allocation32_spill] sm:$0xff] %v7188_v61  ;;  %8850 = vst [vmem:[#allocation33_spill] sm:$0xff] %v7190_v59 }
 0x14a   :  { %758 = vbcast.lane.b32.xlu1 %v7020_v22, 296  ;;  %558 = vbcast.lane.b32.xlu0 %v6980_v15, 304 }
 0x14c   :  { %v7194_v58 = vpop.permute.xlu1 %844  ;;  %v7196_v56 = vpop.permute.xlu0 %840 }
 0x14d   :  { %8851 = vst [vmem:[#allocation34_spill] sm:$0xff] %v7194_v58  ;;  %8852 = vst [vmem:[#allocation35_spill] sm:$0xff] %v7196_v56 }
 0x14e   :  { %1264 = vbcast.lane.b32.xlu1 %v6948_v8, 312  ;;  %1158 = vbcast.lane.b32.xlu0 %v6986_v16, 304 }
 0x150   :  { %v7200_v0 = vpop.permute.xlu1 %1550  ;;  %v7202_v7 = vpop.permute.xlu0 %1350 }
 0x151   :  { %8853 = vst [vmem:[#allocation36_spill] sm:$0xff] %v7200_v0  ;;  %8854 = vst [vmem:[#allocation37_spill] sm:$0xff] %v7202_v7 }
 0x152   :  { %1664 = vbcast.lane.b32.xlu1 %v7030_v23, 296  ;;  %1464 = vbcast.lane.b32.xlu0 %v6992_v17, 304 }
 0x154   :  { %v7206_v59 = vpop.permute.xlu1 %1750  ;;  %v7208_v61 = vpop.permute.xlu0 %1746 }
 0x155   :  { %8855 = vst [vmem:[#allocation38_spill] sm:$0xff] %v7206_v59  ;;  %8856 = vst [vmem:[#allocation39_spill] sm:$0xff] %v7208_v61 }
 0x156   :  { %154 = vbcast.lane.b32.xlu1 %v6956_v10, 312  ;;  %1864 = vbcast.lane.b32.xlu0 %v7062_v27, 288 }
 0x158   :  { %v7212_v56 = vpop.permute.xlu1 %546  ;;  %v7214_v58 = vpop.permute.xlu0 %346 }
 0x159   :  { %8857 = vst [vmem:[#allocation40_spill] sm:$0xff] %v7212_v56  ;;  %8858 = vst [vmem:[#allocation41_spill] sm:$0xff] %v7214_v58 }
 0x15a   :  { %460 = vbcast.lane.b32.xlu1 %v6964_v12, 312  ;;  %260 = vbcast.lane.b32.xlu0 %v6938_v6, 320 }
 0x15c   :  { %v7218_v7 = vpop.permute.xlu1 %1146  ;;  %v7220_v0 = vpop.permute.xlu0 %746 }
 0x15d   :  { %8859 = vst [vmem:[#allocation42_spill] sm:$0xff] %v7218_v7  ;;  %8860 = vst [vmem:[#allocation43_spill] sm:$0xff] %v7220_v0 }
 0x15e   :  { %860 = vbcast.lane.b32.xlu1 %v7042_v25, 296  ;;  %660 = vbcast.lane.b32.xlu0 %v7004_v19, 304 }
 0x160   :  { %v7224_v61 = vpop.permute.xlu1 %1452  ;;  %v7226_v59 = vpop.permute.xlu0 %1252 }
 0x161   :  { %8861 = vst [vmem:[#allocation44_spill] sm:$0xff] %v7224_v61  ;;  %8862 = vst [vmem:[#allocation45_spill] sm:$0xff] %v7226_v59 }
 0x162   :  { %1566 = vbcast.lane.b32.xlu1 %v7010_v20, 304  ;;  %1366 = vbcast.lane.b32.xlu0 %v6970_v13, 312 }
 0x164   :  { %v7230_v58 = vpop.permute.xlu1 %1848  ;;  %v7232_v56 = vpop.permute.xlu0 %1652 }
 0x165   :  { %8863 = vst [vmem:[#allocation46_spill] sm:$0xff] %v7230_v58  ;;  %8864 = vst [vmem:[#allocation47_spill] sm:$0xff] %v7232_v56 }
 0x166   :  { %362 = vbcast.lane.b32.xlu1 %v6934_v5, 320  ;;  %1766 = vbcast.lane.b32.xlu0 %v7050_v26, 296 }
 0x168   :  { %v7236_v0 = vpop.permute.xlu1 %142  ;;  %v7238_v7 = vpop.permute.xlu0 %1852 }
 0x169   :  { %8865 = vst [vmem:[#allocation48_spill] sm:$0xff] %v7236_v0  ;;  %8866 = vst [vmem:[#allocation49_spill] sm:$0xff] %v7238_v7 }
 0x16a   :  { %762 = vbcast.lane.b32.xlu1 %v7020_v22, 304  ;;  %562 = vbcast.lane.b32.xlu0 %v6980_v15, 312 }
 0x16c   :  { %v7242_v59 = vpop.permute.xlu1 %448  ;;  %v7244_v61 = vpop.permute.xlu0 %248 }
 0x16d   :  { %8867 = vst [vmem:[#allocation50_spill] sm:$0xff] %v7242_v59  ;;  %8868 = vst [vmem:[#allocation51_spill] sm:$0xff] %v7244_v61 }
 0x16e   :  { %1268 = vbcast.lane.b32.xlu1 %v6948_v8, 320  ;;  %1162 = vbcast.lane.b32.xlu0 %v6986_v16, 312 }
 0x170   :  { %v7248_v58 = vpop.permute.xlu1 %848  ;;  %v7250_v56 = vpop.permute.xlu0 %648 }
 0x171   :  { %8869 = vst [vmem:[#allocation52_spill] sm:$0xff] %v7248_v58  ;;  %8870 = vst [vmem:[#allocation53_spill] sm:$0xff] %v7250_v56 }
 0x172   :  { %1668 = vbcast.lane.b32.xlu1 %v7030_v23, 304  ;;  %1468 = vbcast.lane.b32.xlu0 %v6992_v17, 312 }
 0x174   :  { %v7254_v0 = vpop.permute.xlu1 %1554  ;;  %v7256_v7 = vpop.permute.xlu0 %1354 }
 0x175   :  { %8871 = vst [vmem:[#allocation54_spill] sm:$0xff] %v7254_v0  ;;  %8872 = vst [vmem:[#allocation55_spill] sm:$0xff] %v7256_v7 }
 0x176   :  { %158 = vbcast.lane.b32.xlu1 %v6956_v10, 320  ;;  %1868 = vbcast.lane.b32.xlu0 %v7062_v27, 296 }
 0x178   :  { %v7260_v59 = vpop.permute.xlu1 %350  ;;  %v7262_v61 = vpop.permute.xlu0 %1754 }
 0x179   :  { %8873 = vst [vmem:[#allocation56_spill] sm:$0xff] %v7260_v59  ;;  %8874 = vst [vmem:[#allocation57_spill] sm:$0xff] %v7262_v61 }
 0x17a   :  { %464 = vbcast.lane.b32.xlu1 %v6964_v12, 320  ;;  %264 = vbcast.lane.b32.xlu0 %v6938_v6, 328 }
 0x17c   :  { %v7266_v58 = vpop.permute.xlu1 %750  ;;  %v7268_v56 = vpop.permute.xlu0 %550 }
 0x17d   :  { %8875 = vst [vmem:[#allocation58_spill] sm:$0xff] %v7266_v58  ;;  %8876 = vst [vmem:[#allocation59_spill] sm:$0xff] %v7268_v56 }
 0x17e   :  { %864 = vbcast.lane.b32.xlu1 %v7042_v25, 304  ;;  %664 = vbcast.lane.b32.xlu0 %v7004_v19, 312 }
 0x180   :  { %v7272_v7 = vpop.permute.xlu1 %1256  ;;  %v7274_v0 = vpop.permute.xlu0 %1150 }
 0x181   :  { %8877 = vst [vmem:[#allocation60_spill] sm:$0xff] %v7272_v7  ;;  %8878 = vst [vmem:[#allocation61_spill] sm:$0xff] %v7274_v0 }
 0x182   :  { %1570 = vbcast.lane.b32.xlu1 %v7010_v20, 312  ;;  %1370 = vbcast.lane.b32.xlu0 %v6970_v13, 320 }
 0x184   :  { %v7278_v59 = vpop.permute.xlu1 %1656  ;;  %v7280_v61 = vpop.permute.xlu0 %1456 }
 0x185   :  { %8879 = vst [vmem:[#allocation62_spill] sm:$0xff] %v7278_v59  ;;  %8880 = vst [vmem:[#allocation63_spill] sm:$0xff] %v7280_v61 }
 0x186   :  { %366 = vbcast.lane.b32.xlu1 %v6934_v5, 328  ;;  %1770 = vbcast.lane.b32.xlu0 %v7050_v26, 304 }
 0x188   :  { %v7284_v56 = vpop.permute.xlu1 %146  ;;  %v7286_v58 = vpop.permute.xlu0 %1856 }
 0x189   :  { %8881 = vst [vmem:[#allocation64_spill] sm:$0xff] %v7284_v56  ;;  %8882 = vst [vmem:[#allocation65_spill] sm:$0xff] %v7286_v58 }
 0x18a   :  { %766 = vbcast.lane.b32.xlu1 %v7020_v22, 312  ;;  %566 = vbcast.lane.b32.xlu0 %v6980_v15, 320 }
 0x18c   :  { %v7290_v0 = vpop.permute.xlu1 %452  ;;  %v7292_v7 = vpop.permute.xlu0 %252 }
 0x18d   :  { %8883 = vst [vmem:[#allocation66_spill] sm:$0xff] %v7290_v0  ;;  %8884 = vst [vmem:[#allocation67_spill] sm:$0xff] %v7292_v7 }
 0x18e   :  { %1272 = vbcast.lane.b32.xlu1 %v6948_v8, 328  ;;  %1166 = vbcast.lane.b32.xlu0 %v6986_v16, 320 }
 0x190   :  { %v7296_v61 = vpop.permute.xlu1 %852  ;;  %v7298_v59 = vpop.permute.xlu0 %652 }
 0x191   :  { %8885 = vst [vmem:[#allocation68_spill] sm:$0xff] %v7296_v61  ;;  %8886 = vst [vmem:[#allocation69_spill] sm:$0xff] %v7298_v59 }
 0x192   :  { %1672 = vbcast.lane.b32.xlu1 %v7030_v23, 312  ;;  %1472 = vbcast.lane.b32.xlu0 %v6992_v17, 320 }
 0x194   :  { %v7302_v56 = vpop.permute.xlu1 %1558  ;;  %v7304_v58 = vpop.permute.xlu0 %1358 }
 0x195   :  { %8887 = vst [vmem:[#allocation70_spill] sm:$0xff] %v7302_v56  ;;  %8888 = vst [vmem:[#allocation71_spill] sm:$0xff] %v7304_v58 }
 0x196   :  { %162 = vbcast.lane.b32.xlu1 %v6956_v10, 328  ;;  %1872 = vbcast.lane.b32.xlu0 %v7062_v27, 304 }
 0x198   :  { %v7308_v0 = vpop.permute.xlu1 %354  ;;  %v7310_v7 = vpop.permute.xlu0 %1758 }
 0x199   :  { %8889 = vst [vmem:[#allocation72_spill] sm:$0xff] %v7308_v0  ;;  %8890 = vst [vmem:[#allocation73_spill] sm:$0xff] %v7310_v7 }
 0x19a   :  { %468 = vbcast.lane.b32.xlu1 %v6964_v12, 328  ;;  %268 = vbcast.lane.b32.xlu0 %v6938_v6, 336 }
 0x19c   :  { %v7314_v61 = vpop.permute.xlu1 %754  ;;  %v7316_v59 = vpop.permute.xlu0 %554 }
 0x19d   :  { %8891 = vst [vmem:[#allocation74_spill] sm:$0xff] %v7314_v61  ;;  %8892 = vst [vmem:[#allocation75_spill] sm:$0xff] %v7316_v59 }
 0x19e   :  { %868 = vbcast.lane.b32.xlu1 %v7042_v25, 312  ;;  %668 = vbcast.lane.b32.xlu0 %v7004_v19, 320 }
 0x1a0   :  { %v7320_v58 = vpop.permute.xlu1 %1260  ;;  %v7322_v56 = vpop.permute.xlu0 %1154 }
 0x1a1   :  { %8893 = vst [vmem:[#allocation76_spill] sm:$0xff] %v7320_v58  ;;  %8894 = vst [vmem:[#allocation77_spill] sm:$0xff] %v7322_v56 }
 0x1a2   :  { %1574 = vbcast.lane.b32.xlu1 %v7010_v20, 320  ;;  %1374 = vbcast.lane.b32.xlu0 %v6970_v13, 328 }
 0x1a4   :  { %v7326_v0 = vpop.permute.xlu1 %1660  ;;  %v7328_v7 = vpop.permute.xlu0 %1460 }
 0x1a5   :  { %8895 = vst [vmem:[#allocation78_spill] sm:$0xff] %v7326_v0  ;;  %8896 = vst [vmem:[#allocation79_spill] sm:$0xff] %v7328_v7 }
 0x1a6   :  { %370 = vbcast.lane.b32.xlu1 %v6934_v5, 336  ;;  %1774 = vbcast.lane.b32.xlu0 %v7050_v26, 312 }
 0x1a8   :  { %v7332_v59 = vpop.permute.xlu1 %150  ;;  %v7334_v61 = vpop.permute.xlu0 %1860 }
 0x1a9   :  { %8897 = vst [vmem:[#allocation80_spill] sm:$0xff] %v7332_v59  ;;  %8898 = vst [vmem:[#allocation81_spill] sm:$0xff] %v7334_v61 }
 0x1aa   :  { %770 = vbcast.lane.b32.xlu1 %v7020_v22, 320  ;;  %570 = vbcast.lane.b32.xlu0 %v6980_v15, 328 }
 0x1ac   :  { %v7338_v56 = vpop.permute.xlu1 %456  ;;  %v7340_v58 = vpop.permute.xlu0 %256 }
 0x1ad   :  { %8899 = vst [vmem:[#allocation82_spill] sm:$0xff] %v7338_v56  ;;  %8900 = vst [vmem:[#allocation83_spill] sm:$0xff] %v7340_v58 }
 0x1ae   :  { %1276 = vbcast.lane.b32.xlu1 %v6948_v8, 336  ;;  %1170 = vbcast.lane.b32.xlu0 %v6986_v16, 328 }
 0x1b0   :  { %v7344_v7 = vpop.permute.xlu1 %856  ;;  %v7346_v0 = vpop.permute.xlu0 %656 }
 0x1b1   :  { %8901 = vst [vmem:[#allocation84_spill] sm:$0xff] %v7344_v7  ;;  %8902 = vst [vmem:[#allocation85_spill] sm:$0xff] %v7346_v0 }
 0x1b2   :  { %1676 = vbcast.lane.b32.xlu1 %v7030_v23, 320  ;;  %1476 = vbcast.lane.b32.xlu0 %v6992_v17, 328 }
 0x1b4   :  { %v7350_v59 = vpop.permute.xlu1 %1562  ;;  %v7352_v61 = vpop.permute.xlu0 %1362 }
 0x1b5   :  { %8903 = vst [vmem:[#allocation86_spill] sm:$0xff] %v7350_v59  ;;  %8904 = vst [vmem:[#allocation87_spill] sm:$0xff] %v7352_v61 }
 0x1b6   :  { %166 = vbcast.lane.b32.xlu1 %v6956_v10, 336  ;;  %1876 = vbcast.lane.b32.xlu0 %v7062_v27, 312 }
 0x1b8   :  { %v7356_v56 = vpop.permute.xlu1 %358  ;;  %v7358_v58 = vpop.permute.xlu0 %1762 }
 0x1b9   :  { %8905 = vst [vmem:[#allocation88_spill] sm:$0xff] %v7356_v56  ;;  %8906 = vst [vmem:[#allocation89_spill] sm:$0xff] %v7358_v58 }
 0x1ba   :  { %472 = vbcast.lane.b32.xlu1 %v6964_v12, 336  ;;  %272 = vbcast.lane.b32.xlu0 %v6938_v6, 344 }
 0x1bc   :  { %v7362_v7 = vpop.permute.xlu1 %758  ;;  %v7364_v0 = vpop.permute.xlu0 %558 }
 0x1bd   :  { %8907 = vst [vmem:[#allocation90_spill] sm:$0xff] %v7362_v7  ;;  %8908 = vst [vmem:[#allocation91_spill] sm:$0xff] %v7364_v0 }
 0x1be   :  { %872 = vbcast.lane.b32.xlu1 %v7042_v25, 320  ;;  %672 = vbcast.lane.b32.xlu0 %v7004_v19, 328 }
 0x1c0   :  { %v7368_v61 = vpop.permute.xlu1 %1264  ;;  %v7370_v59 = vpop.permute.xlu0 %1158 }
 0x1c1   :  { %8909 = vst [vmem:[#allocation92_spill] sm:$0xff] %v7368_v61  ;;  %8910 = vst [vmem:[#allocation93_spill] sm:$0xff] %v7370_v59 }
 0x1c2   :  { %1578 = vbcast.lane.b32.xlu1 %v7010_v20, 328  ;;  %1378 = vbcast.lane.b32.xlu0 %v6970_v13, 336 }
 0x1c4   :  { %v7374_v56 = vpop.permute.xlu1 %1664  ;;  %v7376_v58 = vpop.permute.xlu0 %1464 }
 0x1c5   :  { %8911 = vst [vmem:[#allocation94_spill] sm:$0xff] %v7374_v56  ;;  %8912 = vst [vmem:[#allocation95_spill] sm:$0xff] %v7376_v58 }
 0x1c6   :  { %374 = vbcast.lane.b32.xlu1 %v6934_v5, 344  ;;  %1778 = vbcast.lane.b32.xlu0 %v7050_v26, 320 }
 0x1c8   :  { %v7380_v0 = vpop.permute.xlu1 %154  ;;  %v7382_v7 = vpop.permute.xlu0 %1864 }
 0x1c9   :  { %8913 = vst [vmem:[#allocation96_spill] sm:$0xff] %v7380_v0  ;;  %8914 = vst [vmem:[#allocation97_spill] sm:$0xff] %v7382_v7 }
 0x1ca   :  { %774 = vbcast.lane.b32.xlu1 %v7020_v22, 328  ;;  %574 = vbcast.lane.b32.xlu0 %v6980_v15, 336 }
 0x1cc   :  { %v7386_v59 = vpop.permute.xlu1 %460  ;;  %v7388_v61 = vpop.permute.xlu0 %260 }
 0x1cd   :  { %8915 = vst [vmem:[#allocation98_spill] sm:$0xff] %v7386_v59  ;;  %8916 = vst [vmem:[#allocation99_spill] sm:$0xff] %v7388_v61 }
 0x1ce   :  { %1280 = vbcast.lane.b32.xlu1 %v6948_v8, 344  ;;  %1174 = vbcast.lane.b32.xlu0 %v6986_v16, 336 }
 0x1d0   :  { %v7392_v58 = vpop.permute.xlu1 %860  ;;  %v7394_v56 = vpop.permute.xlu0 %660 }
 0x1d1   :  { %8917 = vst [vmem:[#allocation100_spill] sm:$0xff] %v7392_v58  ;;  %8918 = vst [vmem:[#allocation101_spill] sm:$0xff] %v7394_v56 }
 0x1d2   :  { %1680 = vbcast.lane.b32.xlu1 %v7030_v23, 328  ;;  %1480 = vbcast.lane.b32.xlu0 %v6992_v17, 336 }
 0x1d4   :  { %v7398_v0 = vpop.permute.xlu1 %1566  ;;  %v7400_v7 = vpop.permute.xlu0 %1366 }
 0x1d5   :  { %8919 = vst [vmem:[#allocation102_spill] sm:$0xff] %v7398_v0  ;;  %8920 = vst [vmem:[#allocation103_spill] sm:$0xff] %v7400_v7 }
 0x1d6   :  { %170 = vbcast.lane.b32.xlu1 %v6956_v10, 344  ;;  %1880 = vbcast.lane.b32.xlu0 %v7062_v27, 320 }
 0x1d8   :  { %v7404_v59 = vpop.permute.xlu1 %362  ;;  %v7406_v61 = vpop.permute.xlu0 %1766 }
 0x1d9   :  { %8921 = vst [vmem:[#allocation104_spill] sm:$0xff] %v7404_v59  ;;  %8922 = vst [vmem:[#allocation105_spill] sm:$0xff] %v7406_v61 }
 0x1da   :  { %476 = vbcast.lane.b32.xlu1 %v6964_v12, 344  ;;  %276 = vbcast.lane.b32.xlu0 %v6938_v6, 352 }
 0x1dc   :  { %v7410_v58 = vpop.permute.xlu1 %762  ;;  %v7412_v56 = vpop.permute.xlu0 %562 }
 0x1dd   :  { %8923 = vst [vmem:[#allocation106_spill] sm:$0xff] %v7410_v58  ;;  %8924 = vst [vmem:[#allocation107_spill] sm:$0xff] %v7412_v56 }
 0x1de   :  { %876 = vbcast.lane.b32.xlu1 %v7042_v25, 328  ;;  %676 = vbcast.lane.b32.xlu0 %v7004_v19, 336 }
 0x1e0   :  { %v7416_v7 = vpop.permute.xlu1 %1268  ;;  %v7418_v0 = vpop.permute.xlu0 %1162 }
 0x1e1   :  { %8925 = vst [vmem:[#allocation108_spill] sm:$0xff] %v7416_v7  ;;  %8926 = vst [vmem:[#allocation109_spill] sm:$0xff] %v7418_v0 }
 0x1e2   :  { %1582 = vbcast.lane.b32.xlu1 %v7010_v20, 336  ;;  %1382 = vbcast.lane.b32.xlu0 %v6970_v13, 344 }
 0x1e4   :  { %v7422_v59 = vpop.permute.xlu1 %1668  ;;  %v7424_v61 = vpop.permute.xlu0 %1468 }
 0x1e5   :  { %8927 = vst [vmem:[#allocation110_spill] sm:$0xff] %v7422_v59  ;;  %8928 = vst [vmem:[#allocation111_spill] sm:$0xff] %v7424_v61 }
 0x1e6   :  { %378 = vbcast.lane.b32.xlu1 %v6934_v5, 352  ;;  %1782 = vbcast.lane.b32.xlu0 %v7050_v26, 328 }
 0x1e8   :  { %v7428_v56 = vpop.permute.xlu1 %158  ;;  %v7430_v58 = vpop.permute.xlu0 %1868 }
 0x1e9   :  { %8929 = vst [vmem:[#allocation112_spill] sm:$0xff] %v7428_v56  ;;  %8930 = vst [vmem:[#allocation113_spill] sm:$0xff] %v7430_v58 }
 0x1ea   :  { %778 = vbcast.lane.b32.xlu1 %v7020_v22, 336  ;;  %578 = vbcast.lane.b32.xlu0 %v6980_v15, 344 }
 0x1ec   :  { %v7434_v0 = vpop.permute.xlu1 %464  ;;  %v7436_v7 = vpop.permute.xlu0 %264 }
 0x1ed   :  { %8931 = vst [vmem:[#allocation114_spill] sm:$0xff] %v7434_v0  ;;  %8932 = vst [vmem:[#allocation115_spill] sm:$0xff] %v7436_v7 }
 0x1ee   :  { %1284 = vbcast.lane.b32.xlu1 %v6948_v8, 352  ;;  %1178 = vbcast.lane.b32.xlu0 %v6986_v16, 344 }
 0x1f0   :  { %v7440_v61 = vpop.permute.xlu1 %864  ;;  %v7442_v59 = vpop.permute.xlu0 %664 }
 0x1f1   :  { %8933 = vst [vmem:[#allocation116_spill] sm:$0xff] %v7440_v61  ;;  %8934 = vst [vmem:[#allocation117_spill] sm:$0xff] %v7442_v59 }
 0x1f2   :  { %1684 = vbcast.lane.b32.xlu1 %v7030_v23, 336  ;;  %1484 = vbcast.lane.b32.xlu0 %v6992_v17, 344 }
 0x1f4   :  { %v7446_v56 = vpop.permute.xlu1 %1570  ;;  %v7448_v58 = vpop.permute.xlu0 %1370 }
 0x1f5   :  { %8935 = vst [vmem:[#allocation118_spill] sm:$0xff] %v7446_v56  ;;  %8936 = vst [vmem:[#allocation119_spill] sm:$0xff] %v7448_v58 }
 0x1f6   :  { %174 = vbcast.lane.b32.xlu1 %v6956_v10, 352  ;;  %1884 = vbcast.lane.b32.xlu0 %v7062_v27, 328 }
 0x1f8   :  { %v7452_v0 = vpop.permute.xlu1 %366  ;;  %v7454_v7 = vpop.permute.xlu0 %1770 }
 0x1f9   :  { %8937 = vst [vmem:[#allocation120_spill] sm:$0xff] %v7452_v0  ;;  %8938 = vst [vmem:[#allocation121_spill] sm:$0xff] %v7454_v7 }
 0x1fa   :  { %480 = vbcast.lane.b32.xlu1 %v6964_v12, 352  ;;  %280 = vbcast.lane.b32.xlu0 %v6938_v6, 360 }
 0x1fc   :  { %v7458_v61 = vpop.permute.xlu1 %766  ;;  %v7460_v59 = vpop.permute.xlu0 %566 }
 0x1fd   :  { %8939 = vst [vmem:[#allocation122_spill] sm:$0xff] %v7458_v61  ;;  %8940 = vst [vmem:[#allocation123_spill] sm:$0xff] %v7460_v59 }
 0x1fe   :  { %880 = vbcast.lane.b32.xlu1 %v7042_v25, 336  ;;  %680 = vbcast.lane.b32.xlu0 %v7004_v19, 344 }
 0x200   :  { %v7464_v58 = vpop.permute.xlu1 %1272  ;;  %v7466_v56 = vpop.permute.xlu0 %1166 }
 0x201   :  { %8941 = vst [vmem:[#allocation124_spill] sm:$0xff] %v7464_v58  ;;  %8942 = vst [vmem:[#allocation125_spill] sm:$0xff] %v7466_v56 }
 0x202   :  { %1586 = vbcast.lane.b32.xlu1 %v7010_v20, 344  ;;  %1386 = vbcast.lane.b32.xlu0 %v6970_v13, 352 }
 0x204   :  { %v7470_v0 = vpop.permute.xlu1 %1672  ;;  %v7472_v7 = vpop.permute.xlu0 %1472 }
 0x205   :  { %8943 = vst [vmem:[#allocation126_spill] sm:$0xff] %v7470_v0  ;;  %8944 = vst [vmem:[#allocation127_spill] sm:$0xff] %v7472_v7 }
 0x206   :  { %382 = vbcast.lane.b32.xlu1 %v6934_v5, 360  ;;  %1786 = vbcast.lane.b32.xlu0 %v7050_v26, 336 }
 0x208   :  { %v7476_v59 = vpop.permute.xlu1 %162  ;;  %v7478_v61 = vpop.permute.xlu0 %1872 }
 0x209   :  { %8945 = vst [vmem:[#allocation128_spill] sm:$0xff] %v7476_v59  ;;  %8946 = vst [vmem:[#allocation129_spill] sm:$0xff] %v7478_v61 }
 0x20a   :  { %782 = vbcast.lane.b32.xlu1 %v7020_v22, 344  ;;  %582 = vbcast.lane.b32.xlu0 %v6980_v15, 352 }
 0x20c   :  { %v7482_v56 = vpop.permute.xlu1 %468  ;;  %v7484_v58 = vpop.permute.xlu0 %268 }
 0x20d   :  { %8947 = vst [vmem:[#allocation130_spill] sm:$0xff] %v7482_v56  ;;  %8948 = vst [vmem:[#allocation131_spill] sm:$0xff] %v7484_v58 }
 0x20e   :  { %1288 = vbcast.lane.b32.xlu1 %v6948_v8, 360  ;;  %1182 = vbcast.lane.b32.xlu0 %v6986_v16, 352 }
 0x210   :  { %v7488_v7 = vpop.permute.xlu1 %868  ;;  %v7490_v0 = vpop.permute.xlu0 %668 }
 0x211   :  { %8949 = vst [vmem:[#allocation132_spill] sm:$0xff] %v7488_v7  ;;  %8950 = vst [vmem:[#allocation133_spill] sm:$0xff] %v7490_v0 }
 0x212   :  { %1688 = vbcast.lane.b32.xlu1 %v7030_v23, 344  ;;  %1488 = vbcast.lane.b32.xlu0 %v6992_v17, 352 }
 0x214   :  { %v7494_v59 = vpop.permute.xlu1 %1574  ;;  %v7496_v61 = vpop.permute.xlu0 %1374 }
 0x215   :  { %8951 = vst [vmem:[#allocation134_spill] sm:$0xff] %v7494_v59  ;;  %8952 = vst [vmem:[#allocation135_spill] sm:$0xff] %v7496_v61 }
 0x216   :  { %178 = vbcast.lane.b32.xlu1 %v6956_v10, 360  ;;  %1888 = vbcast.lane.b32.xlu0 %v7062_v27, 336 }
 0x218   :  { %v7500_v56 = vpop.permute.xlu1 %370  ;;  %v7502_v58 = vpop.permute.xlu0 %1774 }
 0x219   :  { %8953 = vst [vmem:[#allocation136_spill] sm:$0xff] %v7500_v56  ;;  %8954 = vst [vmem:[#allocation137_spill] sm:$0xff] %v7502_v58 }
 0x21a   :  { %484 = vbcast.lane.b32.xlu1 %v6964_v12, 360  ;;  %284 = vbcast.lane.b32.xlu0 %v6938_v6, 368 }
 0x21c   :  { %v7506_v7 = vpop.permute.xlu1 %770  ;;  %v7508_v0 = vpop.permute.xlu0 %570 }
 0x21d   :  { %8955 = vst [vmem:[#allocation138_spill] sm:$0xff] %v7506_v7  ;;  %8956 = vst [vmem:[#allocation139_spill] sm:$0xff] %v7508_v0 }
 0x21e   :  { %884 = vbcast.lane.b32.xlu1 %v7042_v25, 344  ;;  %684 = vbcast.lane.b32.xlu0 %v7004_v19, 352 }
 0x220   :  { %v7512_v61 = vpop.permute.xlu1 %1276  ;;  %v7514_v59 = vpop.permute.xlu0 %1170 }
 0x221   :  { %8957 = vst [vmem:[#allocation140_spill] sm:$0xff] %v7512_v61  ;;  %8958 = vst [vmem:[#allocation141_spill] sm:$0xff] %v7514_v59 }
 0x222   :  { %1590 = vbcast.lane.b32.xlu1 %v7010_v20, 352  ;;  %1390 = vbcast.lane.b32.xlu0 %v6970_v13, 360 }
 0x224   :  { %v7518_v56 = vpop.permute.xlu1 %1676  ;;  %v7520_v58 = vpop.permute.xlu0 %1476 }
 0x225   :  { %8959 = vst [vmem:[#allocation142_spill] sm:$0xff] %v7518_v56  ;;  %8960 = vst [vmem:[#allocation143_spill] sm:$0xff] %v7520_v58 }
 0x226   :  { %386 = vbcast.lane.b32.xlu1 %v6934_v5, 368  ;;  %1790 = vbcast.lane.b32.xlu0 %v7050_v26, 344 }
 0x228   :  { %v7524_v0 = vpop.permute.xlu1 %166  ;;  %v7526_v7 = vpop.permute.xlu0 %1876 }
 0x229   :  { %8961 = vst [vmem:[#allocation144_spill] sm:$0xff] %v7524_v0  ;;  %8962 = vst [vmem:[#allocation145_spill] sm:$0xff] %v7526_v7 }
 0x22a   :  { %786 = vbcast.lane.b32.xlu1 %v7020_v22, 352  ;;  %586 = vbcast.lane.b32.xlu0 %v6980_v15, 360 }
 0x22c   :  { %v7530_v59 = vpop.permute.xlu1 %472  ;;  %v7532_v61 = vpop.permute.xlu0 %272 }
 0x22d   :  { %8963 = vst [vmem:[#allocation146_spill] sm:$0xff] %v7530_v59  ;;  %8964 = vst [vmem:[#allocation147_spill] sm:$0xff] %v7532_v61 }
 0x22e   :  { %1292 = vbcast.lane.b32.xlu1 %v6948_v8, 368  ;;  %1186 = vbcast.lane.b32.xlu0 %v6986_v16, 360 }
 0x230   :  { %v7536_v58 = vpop.permute.xlu1 %872  ;;  %v7538_v56 = vpop.permute.xlu0 %672 }
 0x231   :  { %8965 = vst [vmem:[#allocation148_spill] sm:$0xff] %v7536_v58  ;;  %8966 = vst [vmem:[#allocation149_spill] sm:$0xff] %v7538_v56 }
 0x232   :  { %1692 = vbcast.lane.b32.xlu1 %v7030_v23, 352  ;;  %1492 = vbcast.lane.b32.xlu0 %v6992_v17, 360 }
 0x234   :  { %v7542_v0 = vpop.permute.xlu1 %1578  ;;  %v7544_v7 = vpop.permute.xlu0 %1378 }
 0x235   :  { %8967 = vst [vmem:[#allocation150_spill] sm:$0xff] %v7542_v0  ;;  %8968 = vst [vmem:[#allocation151_spill] sm:$0xff] %v7544_v7 }
 0x236   :  { %182 = vbcast.lane.b32.xlu1 %v6956_v10, 368  ;;  %1892 = vbcast.lane.b32.xlu0 %v7062_v27, 344 }
 0x238   :  { %v7548_v59 = vpop.permute.xlu1 %374  ;;  %v7550_v61 = vpop.permute.xlu0 %1778 }
 0x239   :  { %8969 = vst [vmem:[#allocation152_spill] sm:$0xff] %v7548_v59  ;;  %8970 = vst [vmem:[#allocation153_spill] sm:$0xff] %v7550_v61 }
 0x23a   :  { %488 = vbcast.lane.b32.xlu1 %v6964_v12, 368  ;;  %288 = vbcast.lane.b32.xlu0 %v6938_v6, 376 }
 0x23c   :  { %v7554_v58 = vpop.permute.xlu1 %774  ;;  %v7556_v56 = vpop.permute.xlu0 %574 }
 0x23d   :  { %8971 = vst [vmem:[#allocation154_spill] sm:$0xff] %v7554_v58  ;;  %8972 = vst [vmem:[#allocation155_spill] sm:$0xff] %v7556_v56 }
 0x23e   :  { %888 = vbcast.lane.b32.xlu1 %v7042_v25, 352  ;;  %688 = vbcast.lane.b32.xlu0 %v7004_v19, 360 }
 0x240   :  { %v7560_v7 = vpop.permute.xlu1 %1280  ;;  %v7562_v0 = vpop.permute.xlu0 %1174 }
 0x241   :  { %8973 = vst [vmem:[#allocation156_spill] sm:$0xff] %v7562_v0 }
 0x242   :  { %1594 = vbcast.lane.b32.xlu1 %v7010_v20, 360  ;;  %1394 = vbcast.lane.b32.xlu0 %v6970_v13, 368 }
 0x244   :  { %v7566_v59 = vpop.permute.xlu1 %1680  ;;  %v7568_v61 = vpop.permute.xlu0 %1480 }
 0x245   :  { %8974 = vst [vmem:[#allocation157_spill] sm:$0xff] %v7566_v59  ;;  %8975 = vst [vmem:[#allocation158_spill] sm:$0xff] %v7568_v61 }
 0x246   :  { %390 = vbcast.lane.b32.xlu1 %v6934_v5, 376  ;;  %1794 = vbcast.lane.b32.xlu0 %v7050_v26, 352 }
 0x248   :  { %v7572_v6 = vpop.permute.xlu1 %170  ;;  %v7574_v56 = vpop.permute.xlu0 %1880 }
 0x249   :  { %8976 = vst [vmem:[#allocation159_spill] sm:$0xff] %v7572_v6  ;;  %8977 = vst [vmem:[#allocation160_spill] sm:$0xff] %v7574_v56  ;;  %v7590_v6 = vld [vmem:[#allocation2 + $0x8] sm:$0xff] }
 0x24a   :  { %790 = vbcast.lane.b32.xlu1 %v7020_v22, 360  ;;  %590 = vbcast.lane.b32.xlu0 %v6980_v15, 368 }
 0x24c   :  { %v7578_v58 = vpop.permute.xlu1 %476  ;;  %v7580_v0 = vpop.permute.xlu0 %276 }
 0x24d   :  { %8978 = vst [vmem:[#allocation161_spill] sm:$0xff] %v7578_v58  ;;  %8979 = vst [vmem:[#allocation162_spill] sm:$0xff] %v7580_v0 }
 0x24e   :  { %1296 = vbcast.lane.b32.xlu1 %v6948_v8, 376  ;;  %1190 = vbcast.lane.b32.xlu0 %v6986_v16, 368  ;;  %v7600_v8 = vrot.slane %v7590_v6, %v6928_v3 }
 0x250   :  { %v7584_v61 = vpop.permute.xlu1 %876  ;;  %v7586_v5 = vpop.permute.xlu0 %676 }
 0x251   :  { %8980 = vst [vmem:[#allocation163_spill] sm:$0xff] %v7584_v61  ;;  %8981 = vst [vmem:[#allocation164_spill] sm:$0xff] %v7586_v5 }
 0x252   :  { %1696 = vbcast.lane.b32.xlu1 %v7030_v23, 360  ;;  %1496 = vbcast.lane.b32.xlu0 %v6992_v17, 368 }
 0x254   :  { %v7592_v56 = vpop.permute.xlu1 %1582  ;;  %v7594_v59 = vpop.permute.xlu0 %1382 }
 0x255   :  { %8982 = vst [vmem:[#allocation165_spill] sm:$0xff] %v7592_v56  ;;  %8983 = vst [vmem:[#allocation166_spill] sm:$0xff] %v7594_v59 }
 0x256   :  { %186 = vbcast.lane.b32.xlu1 %v6956_v10, 376  ;;  %1896 = vbcast.lane.b32.xlu0 %v7062_v27, 352 }
 0x258   :  { %v7602_v61 = vpop.permute.xlu1 %378  ;;  %v7604_v5 = vpop.permute.xlu0 %1782 }
 0x259   :  { %8984 = vst [vmem:[#allocation167_spill] sm:$0xff] %v7602_v61  ;;  %8985 = vst [vmem:[#allocation168_spill] sm:$0xff] %v7604_v5 }
 0x25a   :  { %492 = vbcast.lane.b32.xlu1 %v6964_v12, 376  ;;  %295 = vbcast.lane.b32.xlu0 %v7600_v8, 256  ;;  %v7622_v12 = vrot.slane %v7590_v6, %v6926_v2 }
 0x25c   :  { %v7608_v58 = vpop.permute.xlu1 %778  ;;  %v7610_v0 = vpop.permute.xlu0 %578  ;;  %8990 = vst [vmem:[#allocation173_spill] sm:$0xff] %v7622_v12 }
 0x25d   :  { %8986 = vst [vmem:[#allocation169_spill] sm:$0xff] %v7608_v58  ;;  %8987 = vst [vmem:[#allocation170_spill] sm:$0xff] %v7610_v0  ;;  %v7630_v0 = vld [vmem:[#allocation5 + $0x8] sm:$0xff] }
 0x25e   :  { %892 = vbcast.lane.b32.xlu1 %v7042_v25, 360  ;;  %692 = vbcast.lane.b32.xlu0 %v7004_v19, 368 }
 0x260   :  { %v7614_v10 = vpop.permute.xlu1 %1284  ;;  %v7616_v59 = vpop.permute.xlu0 %1178 }
 0x261   :  { %8988 = vst [vmem:[#allocation171_spill] sm:$0xff] %v7614_v10  ;;  %8989 = vst [vmem:[#allocation172_spill] sm:$0xff] %v7616_v59 }
 0x262   :  { %1598 = vbcast.lane.b32.xlu1 %v7010_v20, 368  ;;  %1398 = vbcast.lane.b32.xlu0 %v6970_v13, 376  ;;  %v7640_v13 = vrot.slane %v7630_v0, %v6928_v3  ;;  %v7659_v3 = vrot.slane %v7590_v6, %v6950_v9 }
 0x264   :  { %v7624_v61 = vpop.permute.xlu1 %1684  ;;  %v7626_v58 = vpop.permute.xlu0 %1484 }
 0x265   :  { %8991 = vst [vmem:[#allocation174_spill] sm:$0xff] %v7624_v61  ;;  %8992 = vst [vmem:[#allocation175_spill] sm:$0xff] %v7626_v58 }
 0x266   :  { %397 = vbcast.lane.b32.xlu1 %v7622_v12, 256  ;;  %1798 = vbcast.lane.b32.xlu0 %v7050_v26, 360 }
 0x268   :  { %v7632_v10 = vpop.permute.xlu1 %174  ;;  %v7634_v59 = vpop.permute.xlu0 %1884 }
 0x269   :  { %8993 = vst [vmem:[#allocation176_spill] sm:$0xff] %v7632_v10  ;;  %8994 = vst [vmem:[#allocation177_spill] sm:$0xff] %v7634_v59 }
 0x26a   :  { %794 = vbcast.lane.b32.xlu1 %v7020_v22, 368  ;;  %594 = vbcast.lane.b32.xlu0 %v6980_v15, 376 }
 0x26c   :  { %v7642_v61 = vpop.permute.xlu1 %480  ;;  %v7644_v58 = vpop.permute.xlu0 %280 }
 0x26d   :  { %8995 = vst [vmem:[#allocation178_spill] sm:$0xff] %v7642_v61  ;;  %8996 = vst [vmem:[#allocation179_spill] sm:$0xff] %v7644_v58 }
 0x26e   :  { %1303 = vbcast.lane.b32.xlu1 %v7640_v13, 256  ;;  %1194 = vbcast.lane.b32.xlu0 %v6986_v16, 376 }
 0x270   :  { %v7648_v5 = vpop.permute.xlu0 %680  ;;  %v7650_v10 = vpop.permute.xlu1 %880 }
 0x271   :  { %8997 = vst [vmem:[#allocation180_spill] sm:$0xff] %v7648_v5  ;;  %8998 = vst [vmem:[#allocation181_spill] sm:$0xff] %v7650_v10 }
 0x272   :  { %1700 = vbcast.lane.b32.xlu1 %v7030_v23, 368  ;;  %1500 = vbcast.lane.b32.xlu0 %v6992_v17, 376  ;;  %v7673_v17 = vrot.slane %v7590_v6, %v6958_v11 }
 0x274   :  { %v7654_v15 = vpop.permute.xlu0 %1386  ;;  %v7661_v61 = vpop.permute.xlu1 %1586 }
 0x275   :  { %8999 = vst [vmem:[#allocation182_spill] sm:$0xff] %v7654_v15  ;;  %9000 = vst [vmem:[#allocation183_spill] sm:$0xff] %v7661_v61 }
 0x276   :  { %1900 = vbcast.lane.b32.xlu0 %v7062_v27, 360 }
 0x278   :  { %v7663_v58 = vpop.permute.xlu0 %1786  ;;  %v7668_v5 = vpop.permute.xlu1 %382 }
 0x279   :  { %9001 = vst [vmem:[#allocation184_spill] sm:$0xff] %v7663_v58  ;;  %9003 = vst [vmem:[#allocation186_spill] sm:$0xff] %v7668_v5  ;;  %v7690_v5 = vrot.slane %v7630_v0, %v6926_v2 }
 0x27a   :  { %193 = vbcast.lane.b32.xlu0 %v7659_v3, 256 }
 0x27b   :  { %9009 = vst [vmem:[#allocation192_spill] sm:$0xff] %v7690_v5 }
 0x27c   :  { %v7666_v16 = vpop.permute.xlu0 %582  ;;  %v7678_v15 = vpop.permute.xlu1 %782 }
 0x27d   :  { %9002 = vst [vmem:[#allocation185_spill] sm:$0xff] %v7666_v16  ;;  %9005 = vst [vmem:[#allocation188_spill] sm:$0xff] %v7678_v15 }
 0x27e   :  { %299 = vbcast.lane.b32.xlu0 %v7600_v8, 264 }
 0x280   :  { %v7675_v10 = vpop.permute.xlu0 %1182  ;;  %v7685_v16 = vpop.permute.xlu1 %1288 }
 0x281   :  { %9004 = vst [vmem:[#allocation187_spill] sm:$0xff] %v7675_v10  ;;  %9008 = vst [vmem:[#allocation191_spill] sm:$0xff] %v7685_v16 }
 0x282   :  { %499 = vbcast.lane.b32.xlu0 %v7673_v17, 256 }
 0x284   :  { %v7680_v61 = vpop.permute.xlu0 %1488  ;;  %v7695_v15 = vpop.permute.xlu1 %1688 }
 0x285   :  { %9006 = vst [vmem:[#allocation189_spill] sm:$0xff] %v7680_v61  ;;  %9011 = vst [vmem:[#allocation194_spill] sm:$0xff] %v7695_v15  ;;  %v2370_v61 = vsel %vm2369_vm0, %v7630_v0, 0.0 }
 0x286   :  { %696 = vbcast.lane.b32.xlu0 %v7004_v19, 376 }
 0x288   :  { %v7683_v58 = vpop.permute.xlu0 %1888  ;;  %v7703_v56 = vpop.permute.xlu1 %178 }
 0x289   :  { %9007 = vst [vmem:[#allocation190_spill] sm:$0xff] %v7683_v58  ;;  %v6595_v58 = vld [vmem:[#allocation5] sm:$0xff]  ;;  %9013 = vst [vmem:[#allocation196_spill] sm:$0xff] %v7703_v56 }
 0x28a   :  { %896 = vbcast.lane.b32.xlu0 %v7042_v25, 368  ;;  %v2371_v10 = vadd.f32 %v6595_v58, %v2370_v61 }
 0x28c   :  { %v7692_v59 = vpop.permute.xlu0 %284 }
 0x28d   :  { %9010 = vst [vmem:[#allocation193_spill] sm:$0xff] %v7692_v59  ;;  %v7709_v59 = vpop.permute.xlu1 %484 }
 0x28e   :  { %1405 = vbcast.lane.b32.xlu0 %v7690_v5, 256  ;;  %9014 = vst [vmem:[#allocation197_spill] sm:$0xff] %v7709_v59 }
 0x290   :  { %v7698_v19 = vpop.permute.xlu0 %684 }
 0x291   :  { %9012 = vst [vmem:[#allocation195_spill] sm:$0xff] %v7698_v19  ;;  %v7720_v61 = vpop.permute.xlu1 %884 }
 0x292   :  { %1602 = vbcast.lane.b32.xlu0 %v7010_v20, 376  ;;  %v7716_v20 = vrot.slane %v7630_v0, %v6950_v9  ;;  %9017 = vst [vmem:[#allocation200_spill] sm:$0xff] %v7720_v61 }
 0x294   :  { %v7701_v16 = vpop.permute.xlu0 %1390 }
 0x295   :  { %v7734_v9 = vpop.permute.xlu1 %1590 }
 0x296   :  { %2372 = vadd.xlane.f32.xlu1 %v2371_v10  ;;  %1802 = vbcast.lane.b32.xlu0 %v7050_v26, 368  ;;  %v7725_v10 = vrot.slane %v7590_v6, %v6974_v14  ;;  %9019 = vst [vmem:[#allocation202_spill] sm:$0xff] %v7734_v9 }
 0x298   :  { %v7706_v2 = vpop.permute.xlu0 %1790 }
 0x299   :  { %v7743_v61 = vpop.permute.xlu1 %386 }
 0x29a   :  { %401 = vbcast.lane.b32.xlu0 %v7622_v12, 264 }
 0x29c   :  { %v7711_v15 = vpop.permute.xlu0 %586 }
 0x29d   :  { %9015 = vst [vmem:[#allocation198_spill] sm:$0xff] %v7711_v15 }
 0x29e   :  { %798 = vbcast.lane.b32.xlu0 %v7020_v22, 376  ;;  %v7732_v22 = vrot.slane %v7630_v0, %v6958_v11 }
 0x2a0   :  { %v7718_v58 = vpop.permute.xlu0 %1186 }
 0x2a1   :  { %9016 = vst [vmem:[#allocation199_spill] sm:$0xff] %v7718_v58 }
 0x2a2   :  { %1201 = vbcast.lane.b32.xlu0 %v7716_v20, 256 }
 0x2a4   :  { %v7727_v19 = vpop.permute.xlu0 %1492 }
 0x2a5   :  { %9018 = vst [vmem:[#allocation201_spill] sm:$0xff] %v7727_v19  ;;  %v7752_v19 = vrot.slane %v7590_v6, %v6998_v18 }
 0x2a6   :  { %1307 = vbcast.lane.b32.xlu0 %v7640_v13, 264 }
 0x2a7   :  { %601 = vbcast.lane.b32.xlu1 %v7725_v10, 256 }
 0x2a8   :  { %v7737_v15 = vpop.permute.xlu0 %1892 }
 0x2a9   :  { %9020 = vst [vmem:[#allocation203_spill] sm:$0xff] %v7737_v15  ;;  %v7754_v15 = vpop.permute.xlu1 %786 }
 0x2aa   :  { %1507 = vbcast.lane.b32.xlu0 %v7732_v22, 256  ;;  %9023 = vst [vmem:[#allocation206_spill] sm:$0xff] %v7754_v15 }
 0x2ab   :  { %1704 = vbcast.lane.b32.xlu1 %v7030_v23, 376 }
 0x2ac   :  { %v7741_v58 = vpop.permute.xlu0 %288 }
 0x2ad   :  { %9021 = vst [vmem:[#allocation204_spill] sm:$0xff] %v7741_v58  ;;  %v7763_v58 = vrot.slane %v7630_v0, %v6974_v14  ;;  %v7767_v59 = vpop.permute.xlu1 %1292 }
 0x2ae   :  { %1904 = vbcast.lane.b32.xlu0 %v7062_v27, 368  ;;  %9026 = vst [vmem:[#allocation209_spill] sm:$0xff] %v7767_v59 }
 0x2af   :  { %197 = vbcast.lane.b32.xlu1 %v7659_v3, 264  ;;  %9024 = vst [vmem:[#allocation207_spill] sm:$0xff] %v7763_v58 }
 0x2b0   :  { %v7747_v11 = vpop.permute.xlu0 %688 }
 0x2b1   :  { %9022 = vst [vmem:[#allocation205_spill] sm:$0xff] %v7747_v11  ;;  %v7774_v15 = vpop.permute.xlu1 %1692 }
 0x2b2   :  { %303 = vbcast.lane.b32.xlu0 %v7600_v8, 272  ;;  %9028 = vst [vmem:[#allocation211_spill] sm:$0xff] %v7774_v15 }
 0x2b3   :  { %503 = vbcast.lane.b32.xlu1 %v7673_v17, 264 }
 0x2b4   :  { %v7757_v23 = vpop.permute.xlu0 %1394 }
 0x2b6   :  { %703 = vbcast.lane.b32.xlu0 %v7752_v19, 256 }
 0x2b7   :  { %900 = vbcast.lane.b32.xlu1 %v7042_v25, 376  ;;  %v7779_v25 = vrot.slane %v7590_v6, %v7014_v21 }
 0x2b8   :  { %v7765_v11 = vpop.permute.xlu0 %1794 }
 0x2b9   :  { %9025 = vst [vmem:[#allocation208_spill] sm:$0xff] %v7765_v11  ;;  %v7787_v11 = vpop.permute.xlu1 %182 }
 0x2ba   :  { %1409 = vbcast.lane.b32.xlu0 %v7690_v5, 264  ;;  %9031 = vst [vmem:[#allocation214_spill] sm:$0xff] %v7787_v11 }
 0x2bb   :  { %1609 = vbcast.lane.b32.xlu1 %v7763_v58, 256 }
 0x2bc   :  { %v7771_v9 = vpop.permute.xlu0 %590 }
 0x2bd   :  { %9027 = vst [vmem:[#allocation210_spill] sm:$0xff] %v7771_v9  ;;  %v7798_v9 = vpop.permute.xlu1 %488 }
 0x2be   :  { %1806 = vbcast.lane.b32.xlu0 %v7050_v26, 376  ;;  %v7793_v26 = vrot.slane %v7630_v0, %v6998_v18  ;;  %9033 = vst [vmem:[#allocation216_spill] sm:$0xff] %v7798_v9  ;;  %v7813_v18 = vrot.slane %v7590_v6, %v7036_v24 }
 0x2bf   :  { %405 = vbcast.lane.b32.xlu1 %v7622_v12, 272 }
 0x2c0   :  { %v7781_v14 = vpop.permute.xlu0 %1190 }
 0x2c1   :  { %9029 = vst [vmem:[#allocation212_spill] sm:$0xff] %v7781_v14  ;;  %v7807_v11 = vpop.permute.xlu1 %888 }
 0x2c2   :  { %605 = vbcast.lane.b32.xlu0 %v7725_v10, 264  ;;  %9036 = vst [vmem:[#allocation219_spill] sm:$0xff] %v7807_v11 }
 0x2c3   :  { %805 = vbcast.lane.b32.xlu1 %v7779_v25, 256 }
 0x2c4   :  { %v7785_v59 = vpop.permute.xlu0 %1496 }
 0x2c5   :  { %9030 = vst [vmem:[#allocation213_spill] sm:$0xff] %v7785_v59 }
 0x2c6   :  { %1205 = vbcast.lane.b32.xlu0 %v7716_v20, 264 }
 0x2c7   :  { %1311 = vbcast.lane.b32.xlu1 %v7640_v13, 272 }
 0x2c8   :  { %v7795_v15 = vpop.permute.xlu0 %1896 }
 0x2c9   :  { %9032 = vst [vmem:[#allocation215_spill] sm:$0xff] %v7795_v15 }
 0x2ca   :  { %1511 = vbcast.lane.b32.xlu0 %v7732_v22, 264 }
 0x2cb   :  { %1711 = vbcast.lane.b32.xlu1 %v7793_v26, 256 }
 0x2cc   :  { %v7801_v14 = vpop.permute.xlu0 %295 }
 0x2cd   :  { %9034 = vst [vmem:[#allocation217_spill] sm:$0xff] %v7801_v14  ;;  %v7818_v14 = vpop.permute.xlu1 %1594 }
 0x2ce   :  { %1908 = vbcast.lane.b32.xlu0 %v7062_v27, 376  ;;  %9037 = vst [vmem:[#allocation220_spill] sm:$0xff] %v7818_v14 }
 0x2cf   :  { %201 = vbcast.lane.b32.xlu1 %v7659_v3, 272 }
 0x2d0   :  { %v7805_v59 = vpop.permute.xlu0 %692 }
 0x2d1   :  { %9035 = vst [vmem:[#allocation218_spill] sm:$0xff] %v7805_v59  ;;  %v7826_v59 = vrot.slane %v7630_v0, %v7014_v21  ;;  %v7831_v11 = vpop.permute.xlu1 %390 }
 0x2d2   :  { %307 = vbcast.lane.b32.xlu0 %v7600_v8, 280 }
 0x2d3   :  { %507 = vbcast.lane.b32.xlu1 %v7673_v17, 272 }
 0x2d4   :  { %v7815_v15 = vpop.permute.xlu0 %1398 }
 0x2d5   :  { %v7838_v14 = vpop.permute.xlu1 %790 }
 0x2d6   :  { %707 = vbcast.lane.b32.xlu0 %v7752_v19, 264  ;;  %9041 = vst [vmem:[#allocation224_spill] sm:$0xff] %v7838_v14 }
 0x2d7   :  { %907 = vbcast.lane.b32.xlu1 %v7813_v18, 256 }
 0x2d8   :  { %v7821_v27 = vpop.permute.xlu0 %1798 }
 0x2d9   :  { %9038 = vst [vmem:[#allocation221_spill] sm:$0xff] %v7821_v27  ;;  %v7847_v27 = vpop.permute.xlu1 %1296 }
 0x2da   :  { %1413 = vbcast.lane.b32.xlu0 %v7690_v5, 272  ;;  %9044 = vst [vmem:[#allocation227_spill] sm:$0xff] %v7847_v27 }
 0x2db   :  { %1613 = vbcast.lane.b32.xlu1 %v7763_v58, 264 }
 0x2dc   :  { %v7829_v6 = vpop.permute.xlu0 %594 }
 0x2dd   :  { %9039 = vst [vmem:[#allocation222_spill] sm:$0xff] %v7829_v6 }
 0x2de   :  { %1813 = vbcast.lane.b32.xlu0 %v7826_v59, 256 }
 0x2df   :  { %409 = vbcast.lane.b32.xlu1 %v7622_v12, 280 }
 0x2e0   :  { %v7835_v9 = vpop.permute.xlu0 %1194 }
 0x2e1   :  { %9040 = vst [vmem:[#allocation223_spill] sm:$0xff] %v7835_v9  ;;  %v7852_v9 = vrot.slane %v7630_v0, %v7036_v24  ;;  %v9048_v24 = vlaneseq }
 0x2e2   :  { %609 = vbcast.lane.b32.xlu0 %v7725_v10, 272 }
 0x2e3   :  { %809 = vbcast.lane.b32.xlu1 %v7779_v25, 264 }
 0x2e4   :  { %v7841_v21 = vpop.permute.xlu0 %1500 }
 0x2e5   :  { %9042 = vst [vmem:[#allocation225_spill] sm:$0xff] %v7841_v21  ;;  %v7858_v21 = vpop.permute.xlu1 %1696 }
 0x2e6   :  { %1209 = vbcast.lane.b32.xlu0 %v7716_v20, 272  ;;  %9045 = vst [vmem:[#allocation228_spill] sm:$0xff] %v7858_v21 }
 0x2e7   :  { %1315 = vbcast.lane.b32.xlu1 %v7640_v13, 280 }
 0x2e8   :  { %v7845_v6 = vpop.permute.xlu0 %1900 }
 0x2e9   :  { %9043 = vst [vmem:[#allocation226_spill] sm:$0xff] %v7845_v6  ;;  %v7867_v0 = vpop.permute.xlu1 %186  ;;  %v7871_v6 = vand.u32 127, %v9048_v24 }
 0x2ea   :  { %1515 = vbcast.lane.b32.xlu0 %v7732_v22, 272 }
 0x2eb   :  { %1715 = vbcast.lane.b32.xlu1 %v7793_v26, 264  ;;  %vm961_vm1 = vcmp.eq.s32.totalorder %v7070_v29, %v7871_v6  ;;  %vm962_vm2 = vcmp.eq.s32.totalorder %v7076_v31, %v7871_v6  ;;  %vm986_vm3 = vcmp.eq.s32.totalorder %v7074_v30, %v7871_v6  ;;  %vm938_vm4 = vcmp.eq.s32.totalorder %v7086_v34, %v7871_v6 }
 0x2ec   :  { %v7855_v14 = vpop.permute.xlu0 %193  ;;  %v1970_v24 = vsel %vm962_vm2, %v7080_v32, 0.0  ;;  %vm937_vm5 = vcmp.eq.s32.totalorder %v7088_v35, %v7871_v6  ;;  %vm963_vm6 = vcmp.eq.s32.totalorder %v7094_v37, %v7871_v6  ;;  %v1994_v29 = vsel %vm986_vm3, %v7106_v41, 0.0 }
 0x2ed   :  { %vm985_vm7 = vcmp.eq.s32.totalorder %v7068_v28, %v7871_v6  ;;  %v1946_v30 = vsel %vm938_vm4, %v7116_v44, 0.0  ;;  %v1945_v31 = vsel %vm937_vm5, %v7118_v45, 0.0  ;;  %v1971_v32 = vsel %vm963_vm6, %v7124_v47, 0.0 }
 0x2ee   :  { %1915 = vbcast.lane.b32.xlu0 %v7852_v9, 256  ;;  %vm1009_vm8 = vcmp.eq.s32.totalorder %v7092_v36, %v7871_v6  ;;  %v1993_v34 = vsel %vm985_vm7, %v7098_v38, 0.0  ;;  %vm1010_vm9 = vcmp.eq.s32.totalorder %v7100_v39, %v7871_v6  ;;  %vm987_vm10 = vcmp.eq.s32.totalorder %v7104_v40, %v7871_v6 }
 0x2ef   :  { %205 = vbcast.lane.b32.xlu1 %v7659_v3, 280  ;;  %v2195_v28 = vadd.f32 %v1994_v29, %v1993_v34  ;;  %vm1034_vm11 = vcmp.eq.s32.totalorder %v7110_v42, %v7871_v6  ;;  %vm1033_vm12 = vcmp.eq.s32.totalorder %v7112_v43, %v7871_v6  ;;  %v2137_v36 = vadd.f32 %v1946_v30, %v1945_v31  ;;  %v9059_v29 = vld [vmem:[#allocation36_spill] sm:$0xff]  ;;  %v9060_v31 = vld [vmem:[#allocation37_spill] sm:$0xff] }
 0x2f0   :  { %v7861_v56 = vpop.permute.xlu0 %299  ;;  %v2017_v37 = vsel %vm1009_vm8, %v7122_v46, 0.0  ;;  %vm939_vm13 = vcmp.eq.s32.totalorder %v7128_v48, %v7871_v6  ;;  %v2018_v40 = vsel %vm1010_vm9, %v7130_v49, 0.0  ;;  %vm1011_vm14 = vcmp.eq.s32.totalorder %v7134_v50, %v7871_v6  ;;  %v9061_v34 = vld [vmem:[#allocation32_spill] sm:$0xff] }
 0x2f1   :  { %9046 = vst [vmem:[#allocation229_spill] sm:$0xff] %v7861_v56  ;;  %v7881_v56 = vpop.permute.xlu1 %492  ;;  %vm964_vm15 = vcmp.eq.s32.totalorder %v7136_v51, %v7871_v6  ;;  %v1995_v41 = vsel %vm987_vm10, %v7148_v55, 0.0  ;;  %vm1058_vm0 = vcmp.eq.s32.totalorder %v7140_v52, %v7871_v6  ;;  %v2042_v42 = vsel %vm1034_vm11, %v7154_v57, 0.0  ;;  %v9054_v57 = vld [vmem:[#allocation27_spill] sm:$0xff] }
 0x2f2   :  { %311 = vbcast.lane.b32.xlu0 %v7600_v8, 288  ;;  %v1947_v44 = vsel %vm939_vm13, %v7164_v60, 0.0  ;;  %v2019_v45 = vsel %vm1011_vm14, %v7170_v62, 0.0  ;;  %v1972_v46 = vsel %vm964_vm15, %v7172_v63, 0.0  ;;  %v2066_v47 = vsel %vm1058_vm0, %v7176_v1, 0.0  ;;  %v9055_v60 = vld [vmem:[#allocation28_spill] sm:$0xff] }
 0x2f3   :  { %511 = vbcast.lane.b32.xlu1 %v7673_v17, 280  ;;  %v2224_v50 = vadd.f32 %v2018_v40, %v2017_v37  ;;  %v2041_v51 = vsel %vm1033_vm12, %v7146_v54, 0.0  ;;  %v2196_v52 = vadd.f32 %v2195_v28, %v1995_v41  ;;  %vm1081_vm3 = vcmp.eq.s32.totalorder %v9054_v57, %v7871_v6  ;;  %v9056_v62 = vld [vmem:[#allocation29_spill] sm:$0xff]  ;;  %v9065_v41 = vld [vmem:[#allocation34_spill] sm:$0xff] }
 0x2f4   :  { %v7865_v27 = vpop.permute.xlu0 %499  ;;  %v2253_v55 = vadd.f32 %v2042_v42, %v2041_v51  ;;  %vm1035_vm4 = vcmp.eq.s32.totalorder %v9055_v60, %v7871_v6  ;;  %vm1082_vm5 = vcmp.eq.s32.totalorder %v9056_v62, %v7871_v6  ;;  %v2138_v63 = vadd.f32 %v2137_v36, %v1947_v44  ;;  %v9062_v28 = vld [vmem:[#allocation33_spill] sm:$0xff]  ;;  %v9063_v36 = vld [vmem:[#allocation38_spill] sm:$0xff]  ;;  %v9070_v60 = vld [vmem:[#allocation47_spill] sm:$0xff] }
 0x2f5   :  { %9047 = vst [vmem:[#allocation230_spill] sm:$0xff] %v7865_v27  ;;  %v1969_v27 = vsel %vm961_vm1, %v7082_v33, 0.0  ;;  %v7920_v39 = vpop.permute.xlu1 %892  ;;  %vm1057_vm1 = vcmp.eq.s32.totalorder %v7142_v53, %v7871_v6  ;;  %v9053_v53 = vld [vmem:[#allocation26_spill] sm:$0xff]  ;;  %v2225_v1 = vadd.f32 %v2224_v50, %v2019_v45  ;;  %v2043_v30 = vsel %vm1035_vm4, %v9059_v29, 0.0  ;;  %v9067_v45 = vld [vmem:[#allocation44_spill] sm:$0xff]  ;;  %v9069_v50 = vld [vmem:[#allocation35_spill] sm:$0xff] }
 0x2f6   :  { %711 = vbcast.lane.b32.xlu0 %v7752_v19, 272  ;;  %v2166_v33 = vadd.f32 %v1970_v24, %v1969_v27  ;;  %9051 = vst [vmem:[#allocation233_spill] sm:$0xff] %v7920_v39  ;;  %v2065_v48 = vsel %vm1057_vm1, %v7178_v4, 0.0  ;;  %vm988_vm2 = vcmp.eq.s32.totalorder %v9053_v53, %v7871_v6  ;;  %v9057_v27 = vld [vmem:[#allocation30_spill] sm:$0xff]  ;;  %v9058_v24 = vld [vmem:[#allocation31_spill] sm:$0xff]  ;;  %vm1059_vm8 = vcmp.eq.s32.totalorder %v9061_v34, %v7871_v6  ;;  %v9073_v29 = vld [vmem:[#allocation49_spill] sm:$0xff] }
 0x2f7   :  { %911 = vbcast.lane.b32.xlu1 %v7813_v18, 264  ;;  %v2282_v54 = vadd.f32 %v2066_v47, %v2065_v48  ;;  %vm965_vm6 = vcmp.eq.s32.totalorder %v9057_v27, %v7871_v6  ;;  %vm940_vm7 = vcmp.eq.s32.totalorder %v9058_v24, %v7871_v6  ;;  %vm1012_vm9 = vcmp.eq.s32.totalorder %v9062_v28, %v7871_v6  ;;  %v9066_v42 = vld [vmem:[#allocation42_spill] sm:$0xff]  ;;  %v9068_v47 = vld [vmem:[#allocation45_spill] sm:$0xff]  ;;  %v9071_v27 = vld [vmem:[#allocation40_spill] sm:$0xff] }
 0x2f8   :  { %v7874_v21 = vpop.permute.xlu0 %696  ;;  %v2167_v38 = vadd.f32 %v2166_v33, %v1971_v32  ;;  %v1996_v32 = vsel %vm988_vm2, %v9060_v31, 0.0  ;;  %v2090_v37 = vsel %vm1082_vm5, %v9063_v36, 0.0  ;;  %vm1106_vm10 = vcmp.eq.s32.totalorder %v9065_v41, %v7871_v6  ;;  %v9072_v24 = vld [vmem:[#allocation41_spill] sm:$0xff]  ;;  %v9074_v36 = vld [vmem:[#allocation43_spill] sm:$0xff]  ;;  %v9077_v41 = vld [vmem:[#allocation54_spill] sm:$0xff] }
 0x2f9   :  { %9049 = vst [vmem:[#allocation231_spill] sm:$0xff] %v7874_v21  ;;  %v7955_v4 = vpop.permute.xlu1 %1598  ;;  %v1948_v44 = vsel %vm940_vm7, %v9066_v42, 0.0  ;;  %v1973_v48 = vsel %vm965_vm6, %v9068_v47, 0.0  ;;  %vm1105_vm11 = vcmp.eq.s32.totalorder %v9069_v50, %v7871_v6  ;;  %v2254_v51 = vadd.f32 %v2253_v55, %v2043_v30  ;;  %v9187_v39 = vld [vmem:[#allocation153_spill] sm:$0xff] }
 0x2fa   :  { %1417 = vbcast.lane.b32.xlu0 %v7690_v5, 280  ;;  %v2168_v43 = vadd.f32 %v2167_v38, %v1972_v46  ;;  %v9064_v38 = vld [vmem:[#allocation39_spill] sm:$0xff]  ;;  %v2020_v46 = vsel %vm1012_vm9, %v9067_v45, 0.0  ;;  %v2197_v53 = vadd.f32 %v2196_v52, %v1996_v32  ;;  %v2067_v62 = vsel %vm1059_vm8, %v9070_v60, 0.0  ;;  %v9075_v32 = vld [vmem:[#allocation46_spill] sm:$0xff]  ;;  %v9084_v60 = vld [vmem:[#allocation61_spill] sm:$0xff] }
 0x2fb   :  { %1617 = vbcast.lane.b32.xlu1 %v7763_v58, 272  ;;  %v2089_v40 = vsel %vm1081_vm3, %v9064_v38, 0.0  ;;  %vm1036_vm12 = vcmp.eq.s32.totalorder %v9071_v27, %v7871_v6  ;;  %vm989_vm13 = vcmp.eq.s32.totalorder %v9072_v24, %v7871_v6  ;;  %v2114_v31 = vsel %vm1106_vm10, %v9073_v29, 0.0  ;;  %v9085_v24 = vld [vmem:[#allocation52_spill] sm:$0xff] }
 0x2fc   :  { %v7888_v21 = vpop.permute.xlu0 %896  ;;  %v2311_v57 = vadd.f32 %v2090_v37, %v2089_v40  ;;  %v2139_v28 = vadd.f32 %v2138_v63, %v1948_v44  ;;  %vm1083_vm14 = vcmp.eq.s32.totalorder %v9074_v36, %v7871_v6  ;;  %v2226_v52 = vadd.f32 %v2225_v1, %v2020_v46  ;;  %v9076_v40 = vld [vmem:[#allocation48_spill] sm:$0xff]  ;;  %v9078_v63 = vld [vmem:[#allocation51_spill] sm:$0xff]  ;;  %v9080_v1 = vld [vmem:[#allocation57_spill] sm:$0xff] }
 0x2fd   :  { %9050 = vst [vmem:[#allocation232_spill] sm:$0xff] %v7888_v21  ;;  %v2169_v55 = vadd.f32 %v2168_v43, %v1973_v48  ;;  %v7994_v30 = vpop.permute.xlu1 %397  ;;  %v2113_v37 = vsel %vm1105_vm11, %v9075_v32, 0.0  ;;  %v2283_v38 = vadd.f32 %v2282_v54, %v2067_v62  ;;  %vm941_vm15 = vcmp.eq.s32.totalorder %v9076_v40, %v7871_v6  ;;  %v9079_v44 = vld [vmem:[#allocation55_spill] sm:$0xff]  ;;  %v9081_v46 = vld [vmem:[#allocation50_spill] sm:$0xff]  ;;  %v9082_v54 = vld [vmem:[#allocation53_spill] sm:$0xff] }
 0x2fe   :  { %1817 = vbcast.lane.b32.xlu0 %v7826_v59, 264  ;;  %v2044_v42 = vsel %vm1036_vm12, %v9077_v41, 0.0  ;;  %v2340_v45 = vadd.f32 %v2114_v31, %v2113_v37  ;;  %vm966_vm0 = vcmp.eq.s32.totalorder %v9078_v63, %v7871_v6  ;;  %v1997_v47 = vsel %vm989_vm13, %v9079_v44, 0.0  ;;  %v9083_v48 = vld [vmem:[#allocation60_spill] sm:$0xff]  ;;  %v9086_v31 = vld [vmem:[#allocation62_spill] sm:$0xff]  ;;  %v9087_v32 = vld [vmem:[#allocation63_spill] sm:$0xff] }
 0x2ff   :  { %413 = vbcast.lane.b32.xlu1 %v7622_v12, 288  ;;  %v2091_v43 = vsel %vm1083_vm14, %v9080_v1, 0.0  ;;  %vm1013_vm1 = vcmp.eq.s32.totalorder %v9081_v46, %v7871_v6  ;;  %vm1060_vm2 = vcmp.eq.s32.totalorder %v9082_v54, %v7871_v6  ;;  %v1974_v50 = vsel %vm966_vm0, %v9083_v48, 0.0  ;;  %v9088_v41 = vld [vmem:[#allocation56_spill] sm:$0xff]  ;;  %v9089_v44 = vld [vmem:[#allocation65_spill] sm:$0xff]  ;;  %v9090_v46 = vld [vmem:[#allocation58_spill] sm:$0xff] }
 0x300   :  { %v7915_v35 = vpop.permute.xlu0 %1405  ;;  %v1949_v62 = vsel %vm941_vm15, %v9084_v60, 0.0  ;;  %vm1107_vm3 = vcmp.eq.s32.totalorder %v9085_v24, %v7871_v6  ;;  %v2255_v29 = vadd.f32 %v2254_v51, %v2044_v42  ;;  %v2068_v36 = vsel %vm1060_vm2, %v9086_v31, 0.0  ;;  %v9091_v54 = vld [vmem:[#allocation59_spill] sm:$0xff] }
 0x301   :  { %v2021_v37 = vsel %vm1013_vm1, %v9087_v32, 0.0  ;;  %v2198_v40 = vadd.f32 %v2197_v53, %v1997_v47  ;;  %vm990_vm4 = vcmp.eq.s32.totalorder %v9088_v41, %v7871_v6  ;;  %v2312_v63 = vadd.f32 %v2311_v57, %v2091_v43  ;;  %v8026_v48 = vpop.permute.xlu1 %794  ;;  %v9092_v57 = vld [vmem:[#allocation64_spill] sm:$0xff]  ;;  %v9093_v43 = vld [vmem:[#allocation70_spill] sm:$0xff]  ;;  %v9094_v32 = vld [vmem:[#allocation67_spill] sm:$0xff] }
 0x302   :  { %613 = vbcast.lane.b32.xlu0 %v7725_v10, 280  ;;  %v2115_v1 = vsel %vm1107_vm3, %v9089_v44, 0.0  ;;  %vm1084_vm5 = vcmp.eq.s32.totalorder %v9090_v46, %v7871_v6  ;;  %vm1037_vm6 = vcmp.eq.s32.totalorder %v9091_v54, %v7871_v6  ;;  %v2170_v51 = vadd.f32 %v2169_v55, %v1974_v50  ;;  %v9095_v44 = vld [vmem:[#allocation71_spill] sm:$0xff]  ;;  %v9096_v55 = vld [vmem:[#allocation73_spill] sm:$0xff]  ;;  %v9102_v41 = vld [vmem:[#allocation78_spill] sm:$0xff] }
 0x303   :  { %813 = vbcast.lane.b32.xlu1 %v7779_v25, 272  ;;  %v2140_v42 = vadd.f32 %v2139_v28, %v1949_v62  ;;  %v2284_v53 = vadd.f32 %v2283_v38, %v2068_v36  ;;  %v2227_v47 = vadd.f32 %v2226_v52, %v2021_v37  ;;  %vm942_vm7 = vcmp.eq.s32.totalorder %v9092_v57, %v7871_v6  ;;  %v9097_v52 = vld [vmem:[#allocation66_spill] sm:$0xff]  ;;  %v9098_v38 = vld [vmem:[#allocation69_spill] sm:$0xff]  ;;  %v9099_v62 = vld [vmem:[#allocation76_spill] sm:$0xff] }
 0x304   :  { %v7940_v49 = vpop.permute.xlu0 %1602  ;;  %v2045_v60 = vsel %vm1037_vm6, %v9093_v43, 0.0  ;;  %v2341_v31 = vadd.f32 %v2340_v45, %v2115_v1  ;;  %vm967_vm8 = vcmp.eq.s32.totalorder %v9094_v32, %v7871_v6  ;;  %v1998_v28 = vsel %vm990_vm4, %v9095_v44, 0.0  ;;  %v9100_v37 = vld [vmem:[#allocation77_spill] sm:$0xff]  ;;  %v9101_v1 = vld [vmem:[#allocation68_spill] sm:$0xff]  ;;  %v9103_v57 = vld [vmem:[#allocation79_spill] sm:$0xff] }
 0x305   :  { %9052 = vst [vmem:[#allocation234_spill] sm:$0xff] %v7940_v49  ;;  %v2092_v50 = vsel %vm1084_vm5, %v9096_v55, 0.0  ;;  %vm1014_vm9 = vcmp.eq.s32.totalorder %v9097_v52, %v7871_v6  ;;  %vm1061_vm10 = vcmp.eq.s32.totalorder %v9098_v38, %v7871_v6  ;;  %v1975_v36 = vsel %vm967_vm8, %v9099_v62, 0.0  ;;  %v9104_v44 = vld [vmem:[#allocation72_spill] sm:$0xff]  ;;  %v9105_v52 = vld [vmem:[#allocation81_spill] sm:$0xff] }
 0x306   :  { %1213 = vbcast.lane.b32.xlu0 %v7716_v20, 280  ;;  %v1950_v45 = vsel %vm942_vm7, %v9100_v37, 0.0  ;;  %vm1108_vm11 = vcmp.eq.s32.totalorder %v9101_v1, %v7871_v6  ;;  %v2256_v46 = vadd.f32 %v2255_v29, %v2045_v60  ;;  %v2069_v54 = vsel %vm1061_vm10, %v9102_v41, 0.0  ;;  %v9107_v37 = vld [vmem:[#allocation74_spill] sm:$0xff]  ;;  %v9108_v29 = vld [vmem:[#allocation75_spill] sm:$0xff]  ;;  %v8062_v41 = vpop.permute.xlu1 %1303 }
 0x307   :  { %1319 = vbcast.lane.b32.xlu1 %v7640_v13, 288  ;;  %v2022_v43 = vsel %vm1014_vm9, %v9103_v57, 0.0  ;;  %v2199_v32 = vadd.f32 %v2198_v40, %v1998_v28  ;;  %vm991_vm12 = vcmp.eq.s32.totalorder %v9104_v44, %v7871_v6  ;;  %v2313_v55 = vadd.f32 %v2312_v63, %v2092_v50  ;;  %9109 = vst [vmem:[#allocation27_spill] sm:$0xff] %v8062_v41  ;;  %v9110_v28 = vld [vmem:[#allocation80_spill] sm:$0xff]  ;;  %v9111_v63 = vld [vmem:[#allocation86_spill] sm:$0xff] }
 0x308   :  { %v7964_v33 = vpop.permute.xlu0 %1802  ;;  %v2116_v38 = vsel %vm1108_vm11, %v9105_v52, 0.0  ;;  %vm1085_vm13 = vcmp.eq.s32.totalorder %v9107_v37, %v7871_v6  ;;  %vm1038_vm14 = vcmp.eq.s32.totalorder %v9108_v29, %v7871_v6  ;;  %v2171_v60 = vadd.f32 %v2170_v51, %v1975_v36  ;;  %v9113_v37 = vld [vmem:[#allocation87_spill] sm:$0xff]  ;;  %v9121_v29 = vld [vmem:[#allocation94_spill] sm:$0xff] }
 0x309   :  { %v2141_v1 = vadd.f32 %v2140_v42, %v1950_v45  ;;  %v2285_v57 = vadd.f32 %v2284_v53, %v2069_v54  ;;  %v2228_v40 = vadd.f32 %v2227_v47, %v2022_v43  ;;  %vm943_vm15 = vcmp.eq.s32.totalorder %v9110_v28, %v7871_v6  ;;  %v9114_v42 = vld [vmem:[#allocation89_spill] sm:$0xff]  ;;  %v9115_v53 = vld [vmem:[#allocation82_spill] sm:$0xff]  ;;  %v9117_v45 = vld [vmem:[#allocation92_spill] sm:$0xff] }
 0x30a   :  { %1519 = vbcast.lane.b32.xlu0 %v7732_v22, 280  ;;  %v2046_v50 = vsel %vm1038_vm14, %v9111_v63, 0.0  ;;  %v2342_v52 = vadd.f32 %v2341_v31, %v2116_v38  ;;  %v1999_v51 = vsel %vm991_vm12, %v9113_v37, 0.0  ;;  %v2093_v36 = vsel %vm1085_vm13, %v9114_v42, 0.0  ;;  %v9116_v47 = vld [vmem:[#allocation85_spill] sm:$0xff]  ;;  %v9122_v63 = vld [vmem:[#allocation95_spill] sm:$0xff] }
 0x30b   :  { %1719 = vbcast.lane.b32.xlu1 %v7793_v26, 272  ;;  %vm1015_vm1 = vcmp.eq.s32.totalorder %v9115_v53, %v7871_v6  ;;  %vm1062_vm2 = vcmp.eq.s32.totalorder %v9116_v47, %v7871_v6  ;;  %v9118_v54 = vld [vmem:[#allocation93_spill] sm:$0xff]  ;;  %v2257_v44 = vadd.f32 %v2256_v46, %v2046_v50  ;;  %v2200_v42 = vadd.f32 %v2199_v32, %v1999_v51  ;;  %v9123_v53 = vld [vmem:[#allocation88_spill] sm:$0xff] }
 0x30c   :  { %v7990_v34 = vpop.permute.xlu0 %401  ;;  %v1951_v43 = vsel %vm943_vm15, %v9118_v54, 0.0  ;;  %v2070_v28 = vsel %vm1062_vm2, %v9121_v29, 0.0  ;;  %v2023_v37 = vsel %vm1015_vm1, %v9122_v63, 0.0  ;;  %vm992_vm4 = vcmp.eq.s32.totalorder %v9123_v53, %v7871_v6  ;;  %v9124_v47 = vld [vmem:[#allocation97_spill] sm:$0xff]  ;;  %v9126_v54 = vld [vmem:[#allocation91_spill] sm:$0xff]  ;;  %v9139_v53 = vld [vmem:[#allocation110_spill] sm:$0xff] }
 0x30d   :  { %v2314_v41 = vadd.f32 %v2313_v55, %v2093_v36  ;;  %vm1039_vm6 = vcmp.eq.s32.totalorder %v9126_v54, %v7871_v6  ;;  %v2142_v50 = vadd.f32 %v2141_v1, %v1951_v43  ;;  %v2286_v32 = vadd.f32 %v2285_v57, %v2070_v28  ;;  %v9128_v55 = vld [vmem:[#allocation96_spill] sm:$0xff]  ;;  %v9129_v36 = vld [vmem:[#allocation102_spill] sm:$0xff]  ;;  %v9132_v54 = vld [vmem:[#allocation103_spill] sm:$0xff] }
 0x30e   :  { %1919 = vbcast.lane.b32.xlu0 %v7852_v9, 264  ;;  %v2229_v51 = vadd.f32 %v2228_v40, %v2023_v37  ;;  %vm944_vm7 = vcmp.eq.s32.totalorder %v9128_v55, %v7871_v6  ;;  %v2047_v29 = vsel %vm1039_vm6, %v9129_v36, 0.0  ;;  %v9133_v1 = vld [vmem:[#allocation105_spill] sm:$0xff]  ;;  %v9134_v57 = vld [vmem:[#allocation98_spill] sm:$0xff]  ;;  %v9136_v43 = vld [vmem:[#allocation108_spill] sm:$0xff] }
 0x30f   :  { %209 = vbcast.lane.b32.xlu1 %v7659_v3, 288  ;;  %vm1016_vm9 = vcmp.eq.s32.totalorder %v9134_v57, %v7871_v6  ;;  %v9135_v40 = vld [vmem:[#allocation101_spill] sm:$0xff]  ;;  %v2258_v55 = vadd.f32 %v2257_v44, %v2047_v29  ;;  %v9146_v44 = vld [vmem:[#allocation107_spill] sm:$0xff] }
 0x310   :  { %v8012_v27 = vpop.permute.xlu0 %798  ;;  %vm1063_vm10 = vcmp.eq.s32.totalorder %v9135_v40, %v7871_v6  ;;  %v9137_v37 = vld [vmem:[#allocation109_spill] sm:$0xff]  ;;  %v9142_v40 = vld [vmem:[#allocation104_spill] sm:$0xff]  ;;  %vm1040_vm14 = vcmp.eq.s32.totalorder %v9146_v44, %v7871_v6 }
 0x311   :  { %v2071_v36 = vsel %vm1063_vm10, %v9139_v53, 0.0  ;;  %vm993_vm12 = vcmp.eq.s32.totalorder %v9142_v40, %v7871_v6 }
 0x312   :  { %315 = vbcast.lane.b32.xlu0 %v7600_v8, 296 }
 0x313   :  { %515 = vbcast.lane.b32.xlu1 %v7673_v17, 288 }
 0x314   :  { %v8032_v24 = vpop.permute.xlu0 %1201 }
 0x316   :  { %715 = vbcast.lane.b32.xlu0 %v7752_v19, 280 }
 0x317   :  { %915 = vbcast.lane.b32.xlu1 %v7813_v18, 272 }
 0x318   :  { %v8056_v62 = vpop.permute.xlu0 %1307 }
 0x319   :  { %9106 = vst [vmem:[#allocation26_spill] sm:$0xff] %v8056_v62  ;;  %v9112_v62 = vld [vmem:[#allocation83_spill] sm:$0xff] }
 0x31a   :  { %1421 = vbcast.lane.b32.xlu0 %v7690_v5, 288  ;;  %vm968_vm0 = vcmp.eq.s32.totalorder %v9112_v62, %v7871_v6  ;;  %v9120_v62 = vld [vmem:[#allocation84_spill] sm:$0xff] }
 0x31b   :  { %1621 = vbcast.lane.b32.xlu1 %v7763_v58, 280  ;;  %v1976_v31 = vsel %vm968_vm0, %v9117_v45, 0.0  ;;  %vm1109_vm3 = vcmp.eq.s32.totalorder %v9120_v62, %v7871_v6  ;;  %v9125_v45 = vld [vmem:[#allocation90_spill] sm:$0xff]  ;;  %v8096_v62 = vpop.permute.xlu1 %1700 }
 0x31c   :  { %v8082_v38 = vpop.permute.xlu0 %1507  ;;  %v2117_v21 = vsel %vm1109_vm3, %v9124_v47, 0.0  ;;  %vm1086_vm5 = vcmp.eq.s32.totalorder %v9125_v45, %v7871_v6  ;;  %v2172_v46 = vadd.f32 %v2171_v60, %v1976_v31  ;;  %9127 = vst [vmem:[#allocation29_spill] sm:$0xff] %v8096_v62  ;;  %v9131_v45 = vld [vmem:[#allocation99_spill] sm:$0xff]  ;;  %v2000_v60 = vsel %vm992_vm4, %v9132_v54, 0.0 }
 0x31d   :  { %9119 = vst [vmem:[#allocation28_spill] sm:$0xff] %v8082_v38  ;;  %v2343_v47 = vadd.f32 %v2342_v52, %v2117_v21  ;;  %vm969_vm8 = vcmp.eq.s32.totalorder %v9131_v45, %v7871_v6  ;;  %v2094_v31 = vsel %vm1086_vm5, %v9133_v1, 0.0  ;;  %v1952_v21 = vsel %vm944_vm7, %v9137_v37, 0.0  ;;  %v9138_v52 = vld [vmem:[#allocation100_spill] sm:$0xff]  ;;  %v9140_v45 = vld [vmem:[#allocation111_spill] sm:$0xff]  ;;  %v9143_v37 = vld [vmem:[#allocation113_spill] sm:$0xff] }
 0x31e   :  { %1821 = vbcast.lane.b32.xlu0 %v7826_v59, 272  ;;  %v1977_v28 = vsel %vm969_vm8, %v9136_v43, 0.0  ;;  %vm1110_vm11 = vcmp.eq.s32.totalorder %v9138_v52, %v7871_v6  ;;  %v2024_v54 = vsel %vm1016_vm9, %v9140_v45, 0.0  ;;  %v2201_v57 = vadd.f32 %v2200_v42, %v2000_v60  ;;  %v9145_v52 = vld [vmem:[#allocation106_spill] sm:$0xff]  ;;  %v9147_v42 = vld [vmem:[#allocation112_spill] sm:$0xff] }
 0x31f   :  { %417 = vbcast.lane.b32.xlu1 %v7622_v12, 296  ;;  %v2315_v43 = vadd.f32 %v2314_v41, %v2094_v31  ;;  %v2118_v62 = vsel %vm1110_vm11, %v9143_v37, 0.0  ;;  %vm1087_vm13 = vcmp.eq.s32.totalorder %v9145_v52, %v7871_v6  ;;  %v2173_v29 = vadd.f32 %v2172_v46, %v1977_v28  ;;  %v9148_v60 = vld [vmem:[#allocation118_spill] sm:$0xff]  ;;  %v9149_v31 = vld [vmem:[#allocation115_spill] sm:$0xff] }
 0x320   :  { %v8102_v63 = vpop.permute.xlu0 %1904  ;;  %v2143_v53 = vadd.f32 %v2142_v50, %v1952_v21  ;;  %v2287_v45 = vadd.f32 %v2286_v32, %v2071_v36  ;;  %vm945_vm15 = vcmp.eq.s32.totalorder %v9147_v42, %v7871_v6  ;;  %v2048_v40 = vsel %vm1040_vm14, %v9148_v60, 0.0  ;;  %v9150_v37 = vld [vmem:[#allocation119_spill] sm:$0xff]  ;;  %v9153_v46 = vld [vmem:[#allocation114_spill] sm:$0xff]  ;;  %v9154_v50 = vld [vmem:[#allocation117_spill] sm:$0xff] }
 0x321   :  { %9130 = vst [vmem:[#allocation30_spill] sm:$0xff] %v8102_v63  ;;  %v2344_v41 = vadd.f32 %v2343_v47, %v2118_v62  ;;  %vm970_vm0 = vcmp.eq.s32.totalorder %v9149_v31, %v7871_v6  ;;  %v2001_v52 = vsel %vm993_vm12, %v9150_v37, 0.0  ;;  %vm1017_vm1 = vcmp.eq.s32.totalorder %v9153_v46, %v7871_v6  ;;  %v9155_v32 = vld [vmem:[#allocation124_spill] sm:$0xff]  ;;  %v9156_v62 = vld [vmem:[#allocation125_spill] sm:$0xff]  ;;  %v9159_v36 = vld [vmem:[#allocation126_spill] sm:$0xff] }
 0x322   :  { %617 = vbcast.lane.b32.xlu0 %v7725_v10, 288  ;;  %vm1064_vm2 = vcmp.eq.s32.totalorder %v9154_v50, %v7871_v6  ;;  %v1953_v47 = vsel %vm945_vm15, %v9156_v62, 0.0  ;;  %v9158_v21 = vld [vmem:[#allocation116_spill] sm:$0xff]  ;;  %v9160_v42 = vld [vmem:[#allocation127_spill] sm:$0xff]  ;;  %v2202_v31 = vadd.f32 %v2201_v57, %v2001_v52  ;;  %v9162_v50 = vld [vmem:[#allocation129_spill] sm:$0xff] }
 0x323   :  { %v8122_v1 = vpop.xlane.xlu1 %2372  ;;  %817 = vbcast.lane.b32.xlu1 %v7779_v25, 280  ;;  %vm1111_vm3 = vcmp.eq.s32.totalorder %v9158_v21, %v7871_v6  ;;  %v2025_v60 = vsel %vm1017_vm1, %v9160_v42, 0.0  ;;  %v9161_v37 = vld [vmem:[#allocation120_spill] sm:$0xff]  ;;  %v9164_v62 = vld [vmem:[#allocation123_spill] sm:$0xff] }
 0x324   :  { %9141 = vst [vmem:[#allocation31_spill] sm:$0xff] %v8122_v1  ;;  %v8128_v63 = vpop.permute.xlu0 %303  ;;  %v2230_v1 = vadd.f32 %v2229_v51, %v2024_v54  ;;  %v1978_v51 = vsel %vm970_vm0, %v9155_v32, 0.0  ;;  %v2072_v54 = vsel %vm1064_vm2, %v9159_v36, 0.0  ;;  %vm994_vm4 = vcmp.eq.s32.totalorder %v9161_v37, %v7871_v6  ;;  %v9163_v32 = vld [vmem:[#allocation122_spill] sm:$0xff] }
 0x325   :  { %9144 = vst [vmem:[#allocation36_spill] sm:$0xff] %v8128_v63  ;;  %v9151_v63 = vld [vmem:[#allocation121_spill] sm:$0xff]  ;;  %vm1088_vm5 = vcmp.eq.s32.totalorder %v9163_v32, %v7871_v6  ;;  %vm1041_vm6 = vcmp.eq.s32.totalorder %v9164_v62, %v7871_v6  ;;  %v2288_v57 = vadd.f32 %v2287_v45, %v2072_v54  ;;  %v9168_v32 = vld [vmem:[#allocation131_spill] sm:$0xff]  ;;  %v9176_v37 = vld [vmem:[#allocation142_spill] sm:$0xff] }
 0x326   :  { %1217 = vbcast.lane.b32.xlu0 %v7716_v20, 288  ;;  %v2095_v38 = vsel %vm1087_vm13, %v9151_v63, 0.0  ;;  %v2259_v63 = vadd.f32 %v2258_v55, %v2048_v40  ;;  %v2174_v55 = vadd.f32 %v2173_v29, %v1978_v51  ;;  %v2144_v40 = vadd.f32 %v2143_v53, %v1953_v47  ;;  %v9169_v62 = vld [vmem:[#allocation135_spill] sm:$0xff]  ;;  %v9170_v53 = vld [vmem:[#allocation137_spill] sm:$0xff]  ;;  %v9173_v47 = vld [vmem:[#allocation140_spill] sm:$0xff] }
 0x327   :  { %v8142_v44 = vpop.permute.xlu1 %601  ;;  %1323 = vbcast.lane.b32.xlu1 %v7640_v13, 296  ;;  %v2316_v46 = vadd.f32 %v2315_v43, %v2095_v38  ;;  %v2231_v52 = vadd.f32 %v2230_v1, %v2025_v60  ;;  %v9166_v38 = vld [vmem:[#allocation128_spill] sm:$0xff]  ;;  %v9167_v43 = vld [vmem:[#allocation134_spill] sm:$0xff]  ;;  %vm971_vm8 = vcmp.eq.s32.totalorder %v9168_v32, %v7871_v6  ;;  %v2002_v29 = vsel %vm994_vm4, %v9169_v62, 0.0  ;;  %v9172_v45 = vld [vmem:[#allocation133_spill] sm:$0xff] }
 0x328   :  { %9152 = vst [vmem:[#allocation37_spill] sm:$0xff] %v8142_v44  ;;  %v8151_v28 = vpop.permute.xlu0 %703  ;;  %v2119_v44 = vsel %vm1111_vm3, %v9162_v50, 0.0  ;;  %vm946_vm7 = vcmp.eq.s32.totalorder %v9166_v38, %v7871_v6  ;;  %v2049_v36 = vsel %vm1041_vm6, %v9167_v43, 0.0  ;;  %v2096_v51 = vsel %vm1088_vm5, %v9170_v53, 0.0  ;;  %v9171_v1 = vld [vmem:[#allocation130_spill] sm:$0xff]  ;;  %v9174_v60 = vld [vmem:[#allocation141_spill] sm:$0xff] }
 0x329   :  { %9157 = vst [vmem:[#allocation32_spill] sm:$0xff] %v8151_v28  ;;  %v2345_v50 = vadd.f32 %v2344_v41, %v2119_v44  ;;  %vm1018_vm9 = vcmp.eq.s32.totalorder %v9171_v1, %v7871_v6  ;;  %vm1065_vm10 = vcmp.eq.s32.totalorder %v9172_v45, %v7871_v6  ;;  %v1979_v54 = vsel %vm971_vm8, %v9173_v47, 0.0  ;;  %v9175_v44 = vld [vmem:[#allocation132_spill] sm:$0xff]  ;;  %v9177_v32 = vld [vmem:[#allocation143_spill] sm:$0xff] }
 0x32a   :  { %1523 = vbcast.lane.b32.xlu0 %v7732_v22, 288  ;;  %v1954_v41 = vsel %vm946_vm7, %v9174_v60, 0.0  ;;  %vm1112_vm11 = vcmp.eq.s32.totalorder %v9175_v44, %v7871_v6  ;;  %v2260_v38 = vadd.f32 %v2259_v63, %v2049_v36  ;;  %v2073_v43 = vsel %vm1065_vm10, %v9176_v37, 0.0  ;;  %v9179_v45 = vld [vmem:[#allocation136_spill] sm:$0xff]  ;;  %v9180_v60 = vld [vmem:[#allocation145_spill] sm:$0xff]  ;;  %v9181_v44 = vld [vmem:[#allocation138_spill] sm:$0xff] }
 0x32b   :  { %v8165_v21 = vpop.permute.xlu1 %1704  ;;  %1723 = vbcast.lane.b32.xlu1 %v7793_v26, 280  ;;  %v2026_v62 = vsel %vm1018_vm9, %v9177_v32, 0.0  ;;  %v2203_v1 = vadd.f32 %v2202_v31, %v2002_v29  ;;  %vm995_vm12 = vcmp.eq.s32.totalorder %v9179_v45, %v7871_v6  ;;  %v2317_v47 = vadd.f32 %v2316_v46, %v2096_v51  ;;  %v9182_v63 = vld [vmem:[#allocation139_spill] sm:$0xff]  ;;  %v9183_v31 = vld [vmem:[#allocation144_spill] sm:$0xff]  ;;  %v9184_v29 = vld [vmem:[#allocation150_spill] sm:$0xff] }
 0x32c   :  { %9165 = vst [vmem:[#allocation33_spill] sm:$0xff] %v8165_v21  ;;  %v8171_v42 = vpop.permute.xlu0 %1409  ;;  %v2120_v28 = vsel %vm1112_vm11, %v9180_v60, 0.0  ;;  %vm1089_vm13 = vcmp.eq.s32.totalorder %v9181_v44, %v7871_v6  ;;  %vm1042_vm14 = vcmp.eq.s32.totalorder %v9182_v63, %v7871_v6  ;;  %v2175_v36 = vadd.f32 %v2174_v55, %v1979_v54  ;;  %v9185_v51 = vld [vmem:[#allocation147_spill] sm:$0xff]  ;;  %v9188_v55 = vld [vmem:[#allocation146_spill] sm:$0xff]  ;;  %v9192_v54 = vld [vmem:[#allocation148_spill] sm:$0xff] }
 0x32d   :  { %v2145_v37 = vadd.f32 %v2144_v40, %v1954_v41  ;;  %v2289_v32 = vadd.f32 %v2288_v57, %v2073_v43  ;;  %v2232_v49 = vadd.f32 %v2231_v52, %v2026_v62  ;;  %vm947_vm15 = vcmp.eq.s32.totalorder %v9183_v31, %v7871_v6  ;;  %v9186_v60 = vld [vmem:[#allocation151_spill] sm:$0xff]  ;;  %v9189_v40 = vld [vmem:[#allocation149_spill] sm:$0xff]  ;;  %v9194_v62 = vld [vmem:[#allocation158_spill] sm:$0xff] }
 0x32e   :  { %1923 = vbcast.lane.b32.xlu0 %v7852_v9, 272  ;;  %v2050_v45 = vsel %vm1042_vm14, %v9184_v29, 0.0  ;;  %v2346_v46 = vadd.f32 %v2345_v50, %v2120_v28  ;;  %vm972_vm0 = vcmp.eq.s32.totalorder %v9185_v51, %v7871_v6  ;;  %v2003_v44 = vsel %vm995_vm12, %v9186_v60, 0.0  ;;  %v9190_v28 = vld [vmem:[#allocation156_spill] sm:$0xff]  ;;  %v9193_v41 = vld [vmem:[#allocation157_spill] sm:$0xff] }
 0x32f   :  { %v8191_v53 = vpop.permute.xlu1 %197  ;;  %213 = vbcast.lane.b32.xlu1 %v7659_v3, 296  ;;  %vm1019_vm1 = vcmp.eq.s32.totalorder %v9188_v55, %v7871_v6  ;;  %vm1066_vm2 = vcmp.eq.s32.totalorder %v9189_v40, %v7871_v6  ;;  %v1980_v57 = vsel %vm972_vm0, %v7560_v7, 0.0  ;;  %v1955_v52 = vsel %vm947_vm15, %v9190_v28, 0.0  ;;  %v9195_v51 = vld [vmem:[#allocation152_spill] sm:$0xff]  ;;  %v9197_v7 = vld [vmem:[#allocation154_spill] sm:$0xff]  ;;  %v9198_v28 = vld [vmem:[#allocation155_spill] sm:$0xff] }
 0x330   :  { %9178 = vst [vmem:[#allocation38_spill] sm:$0xff] %v8191_v53  ;;  %v8197_v21 = vpop.permute.xlu0 %1806  ;;  %v2097_v53 = vsel %vm1089_vm13, %v9187_v39, 0.0  ;;  %vm1113_vm3 = vcmp.eq.s32.totalorder %v9192_v54, %v7871_v6  ;;  %v2261_v39 = vadd.f32 %v2260_v38, %v2050_v45  ;;  %v2074_v43 = vsel %vm1066_vm2, %v9193_v41, 0.0  ;;  %v9196_v55 = vld [vmem:[#allocation160_spill] sm:$0xff] }
 0x331   :  { %v2027_v31 = vsel %vm1019_vm1, %v9194_v62, 0.0  ;;  %v2204_v29 = vadd.f32 %v2203_v1, %v2003_v44  ;;  %vm996_vm4 = vcmp.eq.s32.totalorder %v9195_v51, %v7871_v6  ;;  %v2318_v60 = vadd.f32 %v2317_v47, %v2097_v53  ;;  %v9200_v53 = vld [vmem:[#allocation159_spill] sm:$0xff]  ;;  %v9201_v47 = vld [vmem:[#allocation165_spill] sm:$0xff]  ;;  %v9210_v51 = vld [vmem:[#allocation174_spill] sm:$0xff] }
 0x332   :  { %319 = vbcast.lane.b32.xlu0 %v7600_v8, 304  ;;  %v2121_v40 = vsel %vm1113_vm3, %v9196_v55, 0.0  ;;  %vm1090_vm5 = vcmp.eq.s32.totalorder %v9197_v7, %v7871_v6  ;;  %vm1043_vm6 = vcmp.eq.s32.totalorder %v9198_v28, %v7871_v6  ;;  %v2176_v38 = vadd.f32 %v2175_v36, %v1980_v57  ;;  %v9202_v7 = vld [vmem:[#allocation162_spill] sm:$0xff] }
 0x333   :  { %v8211_v63 = vpop.permute.xlu1 %503  ;;  %519 = vbcast.lane.b32.xlu1 %v7673_v17, 296  ;;  %v2146_v45 = vadd.f32 %v2145_v37, %v1955_v52  ;;  %v2290_v1 = vadd.f32 %v2289_v32, %v2074_v43  ;;  %v2233_v44 = vadd.f32 %v2232_v49, %v2027_v31  ;;  %vm948_vm7 = vcmp.eq.s32.totalorder %v9200_v53, %v7871_v6  ;;  %v9203_v28 = vld [vmem:[#allocation166_spill] sm:$0xff]  ;;  %v9204_v37 = vld [vmem:[#allocation168_spill] sm:$0xff]  ;;  %v9205_v49 = vld [vmem:[#allocation161_spill] sm:$0xff] }
 0x334   :  { %v8220_v50 = vpop.permute.xlu0 %605  ;;  %v2051_v41 = vsel %vm1043_vm6, %v9201_v47, 0.0  ;;  %v2347_v55 = vadd.f32 %v2346_v46, %v2121_v40  ;;  %vm973_vm8 = vcmp.eq.s32.totalorder %v9202_v7, %v7871_v6  ;;  %v2004_v36 = vsel %vm996_vm4, %v9203_v28, 0.0  ;;  %v9206_v32 = vld [vmem:[#allocation164_spill] sm:$0xff]  ;;  %v9207_v52 = vld [vmem:[#allocation171_spill] sm:$0xff] }
 0x335   :  { %9191 = vst [vmem:[#allocation39_spill] sm:$0xff] %v8220_v50  ;;  %v2098_v57 = vsel %vm1090_vm5, %v9204_v37, 0.0  ;;  %vm1020_vm9 = vcmp.eq.s32.totalorder %v9205_v49, %v7871_v6  ;;  %vm1067_vm10 = vcmp.eq.s32.totalorder %v9206_v32, %v7871_v6  ;;  %v1981_v43 = vsel %vm973_vm8, %v9207_v52, 0.0  ;;  %v9208_v31 = vld [vmem:[#allocation172_spill] sm:$0xff]  ;;  %v9209_v40 = vld [vmem:[#allocation163_spill] sm:$0xff] }
 0x336   :  { %719 = vbcast.lane.b32.xlu0 %v7752_v19, 288  ;;  %v1956_v46 = vsel %vm948_vm7, %v9208_v31, 0.0  ;;  %vm1114_vm11 = vcmp.eq.s32.totalorder %v9209_v40, %v7871_v6  ;;  %v2262_v53 = vadd.f32 %v2261_v39, %v2051_v41  ;;  %v2075_v47 = vsel %vm1067_vm10, %v9210_v51, 0.0  ;;  %v9211_v7 = vld [vmem:[#allocation175_spill] sm:$0xff]  ;;  %v9213_v31 = vld [vmem:[#allocation177_spill] sm:$0xff]  ;;  %v9215_v39 = vld [vmem:[#allocation170_spill] sm:$0xff] }
 0x337   :  { %v8234_v54 = vpop.permute.xlu1 %900  ;;  %919 = vbcast.lane.b32.xlu1 %v7813_v18, 280  ;;  %v2028_v28 = vsel %vm1020_vm9, %v9211_v7, 0.0  ;;  %v2205_v49 = vadd.f32 %v2204_v29, %v2004_v36  ;;  %v9212_v32 = vld [vmem:[#allocation167_spill] sm:$0xff]  ;;  %v2319_v52 = vadd.f32 %v2318_v60, %v2098_v57  ;;  %v9214_v40 = vld [vmem:[#allocation169_spill] sm:$0xff]  ;;  %vm1044_vm14 = vcmp.eq.s32.totalorder %v9215_v39, %v7871_v6  ;;  %v9216_v29 = vld [vmem:[#allocation176_spill] sm:$0xff] }
 0x338   :  { %9199 = vst [vmem:[#allocation34_spill] sm:$0xff] %v8234_v54  ;;  %v8240_v62 = vpop.permute.xlu0 %1205  ;;  %vm997_vm12 = vcmp.eq.s32.totalorder %v9212_v32, %v7871_v6  ;;  %v2122_v54 = vsel %vm1114_vm11, %v9213_v31, 0.0  ;;  %vm1091_vm13 = vcmp.eq.s32.totalorder %v9214_v40, %v7871_v6  ;;  %v2177_v41 = vadd.f32 %v2176_v38, %v1981_v43  ;;  %v9217_v36 = vld [vmem:[#allocation183_spill] sm:$0xff]  ;;  %v9219_v31 = vld [vmem:[#allocation182_spill] sm:$0xff] }
 0x339   :  { %v2147_v51 = vadd.f32 %v2146_v45, %v1956_v46  ;;  %v8272_v7 = vadd.f32 %v2290_v1, %v2075_v47  ;;  %vm949_vm15 = vcmp.eq.s32.totalorder %v9216_v29, %v7871_v6  ;;  %v2052_v60 = vsel %vm1044_vm14, %v9217_v36, 0.0  ;;  %v9218_v32 = vld [vmem:[#allocation179_spill] sm:$0xff]  ;;  %v9221_v45 = vld [vmem:[#allocation178_spill] sm:$0xff]  ;;  %v9222_v1 = vld [vmem:[#allocation181_spill] sm:$0xff] }
 0x33a   :  { %1425 = vbcast.lane.b32.xlu0 %v7690_v5, 296  ;;  %v2348_v57 = vadd.f32 %v2347_v55, %v2122_v54  ;;  %vm974_vm0 = vcmp.eq.s32.totalorder %v9218_v32, %v7871_v6  ;;  %v2005_v40 = vsel %vm997_vm12, %v9219_v31, 0.0  ;;  %v9220_v5 = vld [vmem:[#allocation184_spill] sm:$0xff]  ;;  %vm1021_vm1 = vcmp.eq.s32.totalorder %v9221_v45, %v7871_v6  ;;  %v9224_v54 = vld [vmem:[#allocation191_spill] sm:$0xff]  ;;  %v9227_v45 = vld [vmem:[#allocation189_spill] sm:$0xff] }
 0x33b   :  { %v8260_v37 = vpop.permute.xlu1 %1609  ;;  %1625 = vbcast.lane.b32.xlu1 %v7763_v58, 288  ;;  %v2234_v58 = vadd.f32 %v2233_v44, %v2028_v28  ;;  %v2099_v39 = vsel %vm1091_vm13, %v9220_v5, 0.0  ;;  %vm1115_vm2 = vcmp.eq.s32.totalorder %v9222_v1, %v7871_v6  ;;  %v9223_v44 = vld [vmem:[#allocation186_spill] sm:$0xff]  ;;  %v1982_v55 = vsel %vm974_vm0, %v9224_v54, 0.0  ;;  %v9225_v46 = vld [vmem:[#allocation180_spill] sm:$0xff]  ;;  %v9226_v47 = vld [vmem:[#allocation187_spill] sm:$0xff] }
 0x33c   :  { %v8266_v50 = vpop.permute.xlu0 %1511  ;;  %vm998_vm3 = vcmp.eq.s32.totalorder %v9223_v44, %v7871_v6  ;;  %vm1068_vm4 = vcmp.eq.s32.totalorder %v9225_v46, %v7871_v6  ;;  %v2263_v5 = vadd.f32 %v2262_v53, %v2052_v60  ;;  %v1957_v28 = vsel %vm949_vm15, %v9226_v47, 0.0  ;;  %v9228_v44 = vld [vmem:[#allocation188_spill] sm:$0xff]  ;;  %v9229_v53 = vld [vmem:[#allocation185_spill] sm:$0xff]  ;;  %v9233_v47 = vld [vmem:[#allocation206_spill] sm:$0xff] }
 0x33d   :  { %v2006_v36 = vsel %vm998_vm3, %v7701_v16, 0.0  ;;  %v2206_v32 = vadd.f32 %v2205_v49, %v2005_v40  ;;  %v2320_v31 = vadd.f32 %v2319_v52, %v2099_v39  ;;  %vm999_vm5 = vcmp.eq.s32.totalorder %v7743_v61, %v7871_v6  ;;  %v9230_v52 = vld [vmem:[#allocation190_spill] sm:$0xff]  ;;  %v9232_v1 = vld [vmem:[#allocation196_spill] sm:$0xff] }
 0x33e   :  { %1825 = vbcast.lane.b32.xlu0 %v7826_v59, 280  ;;  %vm1092_vm6 = vcmp.eq.s32.totalorder %v9228_v44, %v7871_v6  ;;  %vm1045_vm7 = vcmp.eq.s32.totalorder %v9229_v53, %v7871_v6  ;;  %v8309_v60 = vadd.f32 %v2177_v41, %v1982_v55  ;;  %v2007_v29 = vsel %vm999_vm5, %v7757_v23, 0.0  ;;  %v9231_v41 = vld [vmem:[#allocation194_spill] sm:$0xff]  ;;  %v9237_v44 = vld [vmem:[#allocation197_spill] sm:$0xff]  ;;  %v9238_v53 = vld [vmem:[#allocation200_spill] sm:$0xff] }
 0x33f   :  { %v8282_v38 = vpop.permute.xlu1 %405  ;;  %421 = vbcast.lane.b32.xlu1 %v7622_v12, 304  ;;  %v2029_v12 = vsel %vm1021_vm1, %v9227_v45, 0.0  ;;  %v2148_v49 = vadd.f32 %v2147_v51, %v1957_v28  ;;  %v2123_v61 = vsel %vm1115_vm2, %v9230_v52, 0.0  ;;  %v2207_v40 = vadd.f32 %v2206_v32, %v2006_v36  ;;  %v9234_v28 = vld [vmem:[#allocation202_spill] sm:$0xff]  ;;  %v9236_v45 = vld [vmem:[#allocation224_spill] sm:$0xff] }
 0x340   :  { %v8292_v43 = vpop.permute.xlu0 %1908  ;;  %vm1000_vm8 = vcmp.eq.s32.totalorder %v7831_v11, %v7871_v6  ;;  %v8327_v23 = vsel %vm1068_vm4, %v9231_v41, 0.0  ;;  %v2235_v54 = vadd.f32 %v2234_v58, %v2029_v12  ;;  %v2100_v51 = vsel %vm1092_vm6, %v7706_v2, 0.0  ;;  %v9235_v12 = vld [vmem:[#allocation208_spill] sm:$0xff] }
 0x341   :  { %v2008_v55 = vsel %vm1000_vm8, %v7815_v15, 0.0  ;;  %vm950_vm9 = vcmp.eq.s32.totalorder %v9232_v1, %v7871_v6  ;;  %vm1093_vm10 = vcmp.eq.s32.totalorder %v9233_v47, %v7871_v6  ;;  %v2208_v11 = vadd.f32 %v2207_v40, %v2007_v29  ;;  %v9242_v47 = vld [vmem:[#allocation203_spill] sm:$0xff] }
 0x342   :  { %621 = vbcast.lane.b32.xlu0 %v7725_v10, 296  ;;  %vm1001_vm11 = vcmp.eq.s32.totalorder %v7994_v30, %v7871_v6  ;;  %v2349_v46 = vadd.f32 %v2348_v57, %v2123_v61  ;;  %v2053_v2 = vsel %vm1045_vm7, %v9234_v28, 0.0  ;;  %v2101_v15 = vsel %vm1093_vm10, %v9235_v12, 0.0 }
 0x343   :  { %v8312_v16 = vpop.permute.xlu1 %805  ;;  %821 = vbcast.lane.b32.xlu1 %v7779_v25, 288  ;;  %v2009_v58 = vsel %vm1001_vm11, %v7915_v35, 0.0  ;;  %v2321_v32 = vadd.f32 %v2320_v31, %v2100_v51  ;;  %vm1094_vm12 = vcmp.eq.s32.totalorder %v9236_v45, %v7871_v6  ;;  %v2209_v30 = vadd.f32 %v2208_v11, %v2008_v55  ;;  %v9239_v35 = vld [vmem:[#allocation221_spill] sm:$0xff]  ;;  %v9240_v31 = vld [vmem:[#allocation199_spill] sm:$0xff] }
 0x344   :  { %v8321_v39 = vpop.permute.xlu0 %307  ;;  %vm1002_vm13 = vcmp.eq.s32.totalorder %v7990_v34, %v7871_v6  ;;  %vm1022_vm14 = vcmp.eq.s32.totalorder %v9237_v44, %v7871_v6  ;;  %vm1116_vm15 = vcmp.eq.s32.totalorder %v9238_v53, %v7871_v6  ;;  %v2102_v29 = vsel %vm1094_vm12, %v9239_v35, 0.0  ;;  %v9241_v51 = vld [vmem:[#allocation201_spill] sm:$0xff]  ;;  %v9246_v53 = vld [vmem:[#allocation216_spill] sm:$0xff] }
 0x345   :  { %v2010_v52 = vsel %vm1002_vm13, %v8171_v42, 0.0  ;;  %v1958_v61 = vsel %vm950_vm9, %v9240_v31, 0.0  ;;  %v2322_v40 = vadd.f32 %v2321_v32, %v2101_v15  ;;  %vm1095_vm0 = vcmp.eq.s32.totalorder %v8026_v48, %v7871_v6  ;;  %v9245_v32 = vld [vmem:[#allocation220_spill] sm:$0xff] }
 0x346   :  { %1221 = vbcast.lane.b32.xlu0 %v7716_v20, 296  ;;  %v2210_v34 = vadd.f32 %v2209_v30, %v2009_v58  ;;  %v2264_v41 = vadd.f32 %v2263_v5, %v2053_v2  ;;  %v2030_v55 = vsel %vm1022_vm14, %v9241_v51, 0.0  ;;  %v2124_v11 = vsel %vm1116_vm15, %v9242_v47, 0.0  ;;  %v9243_v5 = vld [vmem:[#allocation198_spill] sm:$0xff]  ;;  %v9247_v35 = vld [vmem:[#allocation212_spill] sm:$0xff] }
 0x347   :  { %v8344_v36 = vpop.permute.xlu1 %1311  ;;  %1327 = vbcast.lane.b32.xlu1 %v7640_v13, 304  ;;  %v2103_v28 = vsel %vm1095_vm0, %v7964_v33, 0.0  ;;  %v2323_v1 = vadd.f32 %v2322_v40, %v2102_v29  ;;  %vm1096_vm1 = vcmp.eq.s32.totalorder %v8012_v27, %v7871_v6  ;;  %vm1003_vm2 = vcmp.eq.s32.totalorder %v8282_v38, %v7871_v6  ;;  %v9244_v58 = vld [vmem:[#allocation214_spill] sm:$0xff] }
 0x348   :  { %v8351_v57 = vpop.permute.xlu0 %707  ;;  %v2211_v12 = vadd.f32 %v2210_v34, %v2010_v52  ;;  %vm1046_vm3 = vcmp.eq.s32.totalorder %v9243_v5, %v7871_v6  ;;  %v2149_v2 = vadd.f32 %v2148_v49, %v1958_v61  ;;  %v2104_v15 = vsel %vm1096_vm1, %v8197_v21, 0.0  ;;  %v9248_v21 = vld [vmem:[#allocation213_spill] sm:$0xff]  ;;  %v9251_v34 = vld [vmem:[#allocation223_spill] sm:$0xff]  ;;  %v9252_v47 = vld [vmem:[#allocation210_spill] sm:$0xff] }
 0x349   :  { %vm951_vm4 = vcmp.eq.s32.totalorder %v9244_v58, %v7871_v6  ;;  %v2054_v45 = vsel %vm1046_vm3, %v9245_v32, 0.0  ;;  %v2324_v30 = vadd.f32 %v2323_v1, %v2103_v28  ;;  %v2236_v27 = vadd.f32 %v2235_v54, %v2030_v55  ;;  %v9249_v54 = vld [vmem:[#allocation193_spill] sm:$0xff]  ;;  %v9258_v58 = vld [vmem:[#allocation230_spill] sm:$0xff] }
 0x34a   :  { %1527 = vbcast.lane.b32.xlu0 %v7732_v22, 296  ;;  %v2350_v38 = vadd.f32 %v2349_v46, %v2124_v11  ;;  %vm1023_vm5 = vcmp.eq.s32.totalorder %v9246_v53, %v7871_v6  ;;  %v1959_v49 = vsel %vm951_vm4, %v9247_v35, 0.0  ;;  %vm952_vm6 = vcmp.eq.s32.totalorder %v7867_v0, %v7871_v6  ;;  %v9250_v46 = vld [vmem:[#allocation219_spill] sm:$0xff]  ;;  %v9259_v32 = vld [vmem:[#allocation234_spill] sm:$0xff] }
 0x34b   :  { %v8369_v42 = vpop.permute.xlu1 %1711  ;;  %1727 = vbcast.lane.b32.xlu1 %v7793_v26, 288  ;;  %v2031_v52 = vsel %vm1023_vm5, %v9248_v21, 0.0  ;;  %v2325_v31 = vadd.f32 %v2324_v30, %v2104_v15  ;;  %vm1097_vm7 = vcmp.eq.s32.totalorder %v8312_v16, %v7871_v6  ;;  %vm975_vm8 = vcmp.eq.s32.totalorder %v9249_v54, %v7871_v6  ;;  %v9255_v15 = vld [vmem:[#allocation38_spill] sm:$0xff] }
 0x34c   :  { %v1414_v48 = vpop.permute.xlu0 %1413  ;;  %vm1117_vm9 = vcmp.eq.s32.totalorder %v9250_v46, %v7871_v6  ;;  %v2265_v40 = vadd.f32 %v2264_v41, %v2054_v45  ;;  %v1960_v51 = vsel %vm952_vm6, %v9251_v34, 0.0  ;;  %vm1047_vm10 = vcmp.eq.s32.totalorder %v9252_v47, %v7871_v6  ;;  %v9260_v53 = vld [vmem:[#allocation226_spill] sm:$0xff]  ;;  %v9263_v47 = vld [vmem:[#allocation209_spill] sm:$0xff] }
 0x34d   :  { %v2011_v33 = vsel %vm1003_vm2, %v1414_v48, 0.0  ;;  %v2150_v11 = vadd.f32 %v2149_v2, %v1959_v49  ;;  %vm953_vm11 = vcmp.eq.s32.totalorder %v7855_v14, %v7871_v6  ;;  %v2237_v16 = vadd.f32 %v2236_v27, %v2031_v52  ;;  %v9254_v2 = vld [vmem:[#allocation225_spill] sm:$0xff]  ;;  %v9261_v49 = vld [vmem:[#allocation28_spill] sm:$0xff]  ;;  %v9269_v54 = vld [vmem:[#allocation34_spill] sm:$0xff] }
 0x34e   :  { %v8382_v44 = vadd.f32 %v2211_v12, %v2011_v33  ;;  %1927 = vbcast.lane.b32.xlu0 %v7852_v9, 280  ;;  %vm1024_vm12 = vcmp.eq.s32.totalorder %v7881_v56, %v7871_v6  ;;  %v2055_v41 = vsel %vm1047_vm10, %v7955_v4, 0.0  ;;  %v1961_v28 = vsel %vm953_vm11, %v8032_v24, 0.0  ;;  %v9253_v12 = vld [vmem:[#allocation215_spill] sm:$0xff]  ;;  %v9256_v33 = vld [vmem:[#allocation233_spill] sm:$0xff]  ;;  %v9257_v56 = vld [vmem:[#allocation222_spill] sm:$0xff] }
 0x34f   :  { %v202_v29 = vpop.permute.xlu1 %201  ;;  %217 = vbcast.lane.b32.xlu1 %v7659_v3, 304  ;;  %v2125_v48 = vsel %vm1117_vm9, %v9253_v12, 0.0  ;;  %v2151_v5 = vadd.f32 %v2150_v11, %v1960_v51  ;;  %v2032_v14 = vsel %vm1024_vm12, %v9254_v2, 0.0  ;;  %vm954_vm13 = vcmp.eq.s32.totalorder %v9255_v15, %v7871_v6  ;;  %v9262_v52 = vld [vmem:[#allocation37_spill] sm:$0xff] }
 0x350   :  { %v1814_v61 = vpop.permute.xlu0 %1813  ;;  %vm1118_vm14 = vcmp.eq.s32.totalorder %v9256_v33, %v7871_v6  ;;  %vm1048_vm15 = vcmp.eq.s32.totalorder %v9257_v56, %v7871_v6  ;;  %v1962_v4 = vsel %vm954_vm13, %v8240_v62, 0.0  ;;  %v2266_v24 = vadd.f32 %v2265_v40, %v2055_v41  ;;  %v9270_v33 = vld [vmem:[#allocation204_spill] sm:$0xff] }
 0x351   :  { %v2105_v55 = vsel %vm1097_vm7, %v1814_v61, 0.0  ;;  %vm1025_vm1 = vcmp.eq.s32.totalorder %v9258_v58, %v7871_v6  ;;  %v2056_v45 = vsel %vm1048_vm15, %v9259_v32, 0.0  ;;  %v2152_v30 = vadd.f32 %v2151_v5, %v1961_v28  ;;  %v9266_v28 = vld [vmem:[#allocation30_spill] sm:$0xff]  ;;  %v9268_v5 = vld [vmem:[#allocation207_spill] sm:$0xff] }
 0x352   :  { %v8403_v0 = vadd.f32 %v2325_v31, %v2105_v55  ;;  %323 = vbcast.lane.b32.xlu0 %v7600_v8, 312  ;;  %v2238_v27 = vadd.f32 %v2237_v16, %v2032_v14  ;;  %v2126_v35 = vsel %vm1118_vm14, %v9260_v53, 0.0  ;;  %v2033_v21 = vsel %vm1025_vm1, %v9261_v49, 0.0  ;;  %v9264_v16 = vld [vmem:[#allocation232_spill] sm:$0xff]  ;;  %v9271_v58 = vld [vmem:[#allocation195_spill] sm:$0xff]  ;;  %v9274_v49 = vld [vmem:[#allocation217_spill] sm:$0xff] }
 0x353   :  { %v508_v1 = vpop.permute.xlu1 %507  ;;  %523 = vbcast.lane.b32.xlu1 %v7673_v17, 304  ;;  %vm1049_vm2 = vcmp.eq.s32.totalorder %v9262_v52, %v7871_v6  ;;  %vm1026_vm3 = vcmp.eq.s32.totalorder %v8211_v63, %v7871_v6  ;;  %v2153_v31 = vadd.f32 %v2152_v30, %v1962_v4  ;;  %vm955_vm4 = vcmp.eq.s32.totalorder %v202_v29, %v7871_v6  ;;  %v9272_v32 = vld [vmem:[#allocation227_spill] sm:$0xff]  ;;  %v9275_v52 = vld [vmem:[#allocation173_spill] sm:$0xff] }
 0x354   :  { %v8415_v8 = vpop.permute.xlu0 %609  ;;  %v2057_v61 = vsel %vm1049_vm2, %v8260_v37, 0.0  ;;  %v2351_v40 = vadd.f32 %v2350_v38, %v2125_v48  ;;  %v2267_v34 = vadd.f32 %v2266_v24, %v2056_v45  ;;  %v2034_v51 = vsel %vm1026_vm3, %v8266_v50, 0.0  ;;  %v9265_v37 = vld [vmem:[#allocation192_spill] sm:$0xff]  ;;  %v9267_v50 = vld [vmem:[#allocation39_spill] sm:$0xff] }
 0x355   :  { %vm1051_vm0 = vcmp.eq.s32.totalorder %v8415_v8, %v7871_v6  ;;  %v1983_v11 = vsel %vm975_vm8, %v9263_v47, 0.0  ;;  %vm1119_vm5 = vcmp.eq.s32.totalorder %v9264_v16, %v7871_v6  ;;  %v2239_v63 = vadd.f32 %v2238_v27, %v2033_v21  ;;  %v9280_v47 = vld [vmem:[#allocation26_spill] sm:$0xff] }
 0x356   :  { %723 = vbcast.lane.b32.xlu0 %v7752_v19, 296  ;;  %v2352_v29 = vadd.f32 %v2351_v40, %v2126_v35  ;;  %v2127_v38 = vsel %vm1119_vm5, %v9266_v28, 0.0  ;;  %v2268_v12 = vadd.f32 %v2267_v34, %v2057_v61  ;;  %vm1050_vm6 = vcmp.eq.s32.totalorder %v9267_v50, %v7871_v6  ;;  %v9273_v35 = vld [vmem:[#allocation211_spill] sm:$0xff]  ;;  %v9282_v28 = vld [vmem:[#allocation36_spill] sm:$0xff] }
 0x357   :  { %v908_v62 = vpop.permute.xlu1 %907  ;;  %923 = vbcast.lane.b32.xlu1 %v7813_v18, 288  ;;  %vm1120_vm7 = vcmp.eq.s32.totalorder %v9269_v54, %v7871_v6  ;;  %v2240_v2 = vadd.f32 %v2239_v63, %v2034_v51  ;;  %vm1027_vm8 = vcmp.eq.s32.totalorder %v508_v1, %v7871_v6  ;;  %vm976_vm9 = vcmp.eq.s32.totalorder %v9270_v33, %v7871_v6  ;;  %v9279_v51 = vld [vmem:[#allocation228_spill] sm:$0xff]  ;;  %v9285_v33 = vld [vmem:[#allocation33_spill] sm:$0xff] }
 0x358   :  { %v1210_v46 = vpop.permute.xlu0 %1209  ;;  %v2128_v56 = vsel %vm1120_vm7, %v8292_v43, 0.0  ;;  %vm1069_vm10 = vcmp.eq.s32.totalorder %v9271_v58, %v7871_v6  ;;  %v1984_v45 = vsel %vm976_vm9, %v9272_v32, 0.0  ;;  %v2353_v30 = vadd.f32 %v2352_v29, %v2127_v38  ;;  %v9286_v58 = vld [vmem:[#allocation32_spill] sm:$0xff] }
 0x359   :  { %v1963_v55 = vsel %vm955_vm4, %v1210_v46, 0.0  ;;  %v2292_v1 = vadd.f32 %v8272_v7, %v8327_v23  ;;  %v2179_v53 = vadd.f32 %v8309_v60, %v1983_v11  ;;  %v2077_v43 = vsel %vm1069_vm10, %v9273_v35, 0.0  ;;  %v9277_v7 = vld [vmem:[#allocation205_spill] sm:$0xff] }
 0x35a   :  { %v8444_v41 = vadd.f32 %v2153_v31, %v1963_v55  ;;  %1429 = vbcast.lane.b32.xlu0 %v9265_v37, 304  ;;  %vm977_vm11 = vcmp.eq.s32.totalorder %v9274_v49, %v7871_v6  ;;  %v9276_v31 = vld [vmem:[#allocation27_spill] sm:$0xff]  ;;  %v2354_v46 = vadd.f32 %v2353_v30, %v2128_v56  ;;  %vm1121_vm13 = vcmp.eq.s32.totalorder %v908_v62, %v7871_v6  ;;  %v9278_v23 = vld [vmem:[#allocation229_spill] sm:$0xff]  ;;  %v9281_v62 = vld [vmem:[#allocation218_spill] sm:$0xff] }
 0x35b   :  { %v1614_v48 = vpop.permute.xlu1 %1613  ;;  %1629 = vbcast.lane.b32.xlu1 %v9268_v5, 296  ;;  %v1985_v61 = vsel %vm977_vm11, %v9276_v31, 0.0  ;;  %vm1070_vm14 = vcmp.eq.s32.totalorder %v9277_v7, %v7871_v6  ;;  %v2180_v60 = vadd.f32 %v2179_v53, %v1984_v45  ;;  %vm978_vm15 = vcmp.eq.s32.totalorder %v9278_v23, %v7871_v6 }
 0x35c   :  { %v2058_v14 = vsel %vm1050_vm6, %v1614_v48, 0.0  ;;  %v1516_v15 = vpop.permute.xlu0 %1515  ;;  %v2078_v55 = vsel %vm1070_vm14, %v9279_v51, 0.0  ;;  %v1986_v11 = vsel %vm978_vm15, %v9280_v47, 0.0  ;;  %v2293_v63 = vadd.f32 %v2292_v1, %v2077_v43 }
 0x35d   :  { %v8457_v4 = vadd.f32 %v2268_v12, %v2058_v14  ;;  %v2035_v24 = vsel %vm1027_vm8, %v1516_v15, 0.0  ;;  %vm1071_vm1 = vcmp.eq.s32.totalorder %v9281_v62, %v7871_v6  ;;  %v2181_v29 = vadd.f32 %v2180_v60, %v1985_v61  ;;  %v9283_v12 = vld [vmem:[#allocation29_spill] sm:$0xff]  ;;  %v9284_v14 = vld [vmem:[#allocation231_spill] sm:$0xff] }
 0x35e   :  { %v8462_v27 = vadd.f32 %v2240_v2, %v2035_v24  ;;  %1829 = vbcast.lane.b32.xlu0 %v7826_v59, 288  ;;  %vm979_vm2 = vcmp.eq.s32.totalorder %v9282_v28, %v7871_v6  ;;  %v2079_v48 = vsel %vm1071_vm1, %v9283_v12, 0.0  ;;  %v2294_v2 = vadd.f32 %v2293_v63, %v2078_v55 }
 0x35f   :  { %v410_v21 = vpop.permute.xlu1 %409  ;;  %425 = vbcast.lane.b32.xlu1 %v9275_v52, 312  ;;  %v1987_v50 = vsel %vm979_vm2, %v8344_v36, 0.0  ;;  %vm1072_vm4 = vcmp.eq.s32.totalorder %v9284_v14, %v7871_v6  ;;  %v2182_v15 = vadd.f32 %v2181_v29, %v1986_v11  ;;  %vm1073_vm6 = vcmp.eq.s32.totalorder %v9286_v58, %v7871_v6 }
 0x360   :  { %vm1004_vm12 = vcmp.eq.s32.totalorder %v410_v21, %v7871_v6  ;;  %v1916_v40 = vpop.permute.xlu0 %1915  ;;  %v2080_v56 = vsel %vm1072_vm4, %v9285_v33, 0.0  ;;  %v2295_v24 = vadd.f32 %v2294_v2, %v2079_v48  ;;  %vm980_vm7 = vcmp.eq.s32.totalorder %v8321_v39, %v7871_v6 }
 0x361   :  { %v2129_v34 = vsel %vm1121_vm13, %v1916_v40, 0.0  ;;  %v2183_v36 = vadd.f32 %v2182_v15, %v1987_v50  ;;  %v2081_v45 = vsel %vm1073_vm6, %v8369_v42, 0.0  ;;  %vm1074_vm9 = vcmp.eq.s32.totalorder %v8351_v57, %v7871_v6  ;;  %v6031_v15 = vld [vmem:[#allocation7] ss:$24 sps:$4 sm:$0xff]  }
 0x362   :  { %v8481_v16 = vadd.f32 %v2354_v46, %v2129_v34  ;;  %625 = vbcast.lane.b32.xlu0 %v7725_v10, 304  ;;  %v2296_v53 = vadd.f32 %v2295_v24, %v2080_v56  ;;  %v6034_v24 = vld [vmem:[#allocation7 + $0x30] ss:$24 sps:$4 sm:$0xff]  }
 0x363   :  { %v810_v38 = vpop.permute.xlu1 %809  ;;  %825 = vbcast.lane.b32.xlu1 %v7779_v25, 296 }
 0x364   :  { %vm1098_vm3 = vcmp.eq.s32.totalorder %v810_v38, %v7871_v6  ;;  %v8492_v54 = vpop.permute.xlu0 %311  ;;  %v2297_v43 = vadd.f32 %v2296_v53, %v2081_v45 }
 0x365   :  { %vm981_vm5 = vcmp.eq.s32.totalorder %v8492_v54, %v7871_v6 }
 0x366   :  { %1225 = vbcast.lane.b32.xlu0 %v7716_v20, 304 }
 0x367   :  { %v1316_v32 = vpop.permute.xlu1 %1315  ;;  %1331 = vbcast.lane.b32.xlu1 %v7640_v13, 312 }
 0x368   :  { %v1988_v30 = vsel %vm980_vm7, %v1316_v32, 0.0  ;;  %v8506_v1 = vpop.permute.xlu0 %711 }
 0x369   :  { %v2184_v35 = vadd.f32 %v2183_v36, %v1988_v30  ;;  %vm1075_vm8 = vcmp.eq.s32.totalorder %v8506_v1, %v7871_v6  ;;  %v6035_v1 = vld [vmem:[#allocation7 + $0x64] ss:$24 sps:$4 sm:$0xff]  }
 0x36a   :  { %1531 = vbcast.lane.b32.xlu0 %v7732_v22, 304 }
 0x36b   :  { %v1716_v49 = vpop.permute.xlu1 %1715  ;;  %1731 = vbcast.lane.b32.xlu1 %v7793_v26, 296 }
 0x36c   :  { %v2082_v13 = vsel %vm1074_vm9, %v1716_v49, 0.0  ;;  %v1418_v39 = vpop.permute.xlu0 %1417  ;;  %v6038_v49 = vld [vmem:[#allocation7 + $0x94] ss:$24 sps:$4 sm:$0xff]  }
 0x36d   :  { %v2298_v42 = vadd.f32 %v2297_v43, %v2082_v13  ;;  %v2012_v52 = vsel %vm1004_vm12, %v1418_v39, 0.0  ;;  %v6040_v39 = vld [vmem:[#allocation7 + $0x90] ss:$24 sps:$4 sm:$0xff]  }
 0x36e   :  { %v2213_v31 = vadd.f32 %v8382_v44, %v2012_v52  ;;  %1931 = vbcast.lane.b32.xlu0 %v7852_v9, 288 }
 0x36f   :  { %v206_v61 = vpop.permute.xlu1 %205  ;;  %221 = vbcast.lane.b32.xlu1 %v7659_v3, 312 }
 0x370   :  { %vm956_vm10 = vcmp.eq.s32.totalorder %v206_v61, %v7871_v6  ;;  %v1818_v46 = vpop.permute.xlu0 %1817  ;;  %v6043_v61 = vld [vmem:[#allocation7 + $0xc0] ss:$24 sps:$4 sm:$0xff]  }
 0x371   :  { %v2106_v57 = vsel %vm1098_vm3, %v1818_v46, 0.0 }
 0x372   :  { %v2327_v40 = vadd.f32 %v8403_v0, %v2106_v57  ;;  %527 = vbcast.lane.b32.xlu0 %v7673_v17, 312 }
 0x373   :  { %v512_v7 = vpop.permute.xlu1 %511  ;;  %727 = vbcast.lane.b32.xlu1 %v7752_v19, 304 }
 0x374   :  { %vm1028_vm11 = vcmp.eq.s32.totalorder %v512_v7, %v7871_v6  ;;  %v8526_v44 = vpop.permute.xlu0 %613 }
 0x375   :  { %vm1052_vm12 = vcmp.eq.s32.totalorder %v8526_v44, %v7871_v6  ;;  %v6044_v44 = vld [vmem:[#allocation7 + $0xf4] ss:$24 sps:$4 sm:$0xff]  }
 0x376   :  { %927 = vbcast.lane.b32.xlu0 %v7813_v18, 296 }
 0x377   :  { %v912_v3 = vpop.permute.xlu1 %911  ;;  %1433 = vbcast.lane.b32.xlu1 %v9265_v37, 312 }
 0x378   :  { %vm1122_vm13 = vcmp.eq.s32.totalorder %v912_v3, %v7871_v6  ;;  %v1214_v0 = vpop.permute.xlu0 %1213  ;;  %v6046_v3 = vld [vmem:[#allocation7 + $0xf0] ss:$24 sps:$4 sm:$0xff]  }
 0x379   :  { %v1964_v21 = vsel %vm956_vm10, %v1214_v0, 0.0 }
 0x37a   :  { %v2155_v17 = vadd.f32 %v8444_v41, %v1964_v21  ;;  %1633 = vbcast.lane.b32.xlu0 %v9268_v5, 304  ;;  %v6047_v21 = vld [vmem:[#allocation7 + $0x124] ss:$24 sps:$4 sm:$0xff]  }
 0x37b   :  { %v1618_v60 = vpop.permute.xlu1 %1617  ;;  %1833 = vbcast.lane.b32.xlu1 %v7826_v59, 296 }
 0x37c   :  { %v2059_v23 = vsel %vm1051_vm0, %v1618_v60, 0.0  ;;  %v1520_v34 = vpop.permute.xlu0 %1519 }
 0x37d   :  { %v8540_v51 = vadd.f32 %v8457_v4, %v2059_v23  ;;  %v2036_v37 = vsel %vm1028_vm11, %v1520_v34, 0.0  ;;  %v6049_v23 = vld [vmem:[#allocation7 + $0x120] ss:$24 sps:$4 sm:$0xff]  }
 0x37e   :  { %v8545_v55 = vadd.f32 %v8462_v27, %v2036_v37  ;;  %629 = vbcast.lane.b32.xlu0 %v7725_v10, 312  ;;  %v6050_v37 = vld [vmem:[#allocation7 + $0x154] ss:$24 sps:$4 sm:$0xff]  }
 0x37f   :  { %v414_v41 = vpop.permute.xlu1 %413  ;;  %829 = vbcast.lane.b32.xlu1 %v7779_v25, 304 }
 0x380   :  { %vm1005_vm14 = vcmp.eq.s32.totalorder %v414_v41, %v7871_v6  ;;  %v1920_v47 = vpop.permute.xlu0 %1919 }
 0x381   :  { %v2130_v8 = vsel %vm1122_vm13, %v1920_v47, 0.0 }
 0x382   :  { %v8553_v4 = vadd.f32 %v8481_v16, %v2130_v8  ;;  %1229 = vbcast.lane.b32.xlu0 %v7716_v20, 312 }
 0x383   :  { %v814_v11 = vpop.permute.xlu1 %813  ;;  %1535 = vbcast.lane.b32.xlu1 %v7732_v22, 312 }
 0x384   :  { %vm1099_vm0 = vcmp.eq.s32.totalorder %v814_v11, %v7871_v6  ;;  %v8558_v10 = vpop.permute.xlu0 %315 }
 0x385   :  { %vm982_vm15 = vcmp.eq.s32.totalorder %v8558_v10, %v7871_v6  ;;  %v6055_v10 = vld [vmem:[#allocation7 + $0xc] ss:$24 sps:$4 sm:$0xff]  }
 0x386   :  { %1735 = vbcast.lane.b32.xlu0 %v7793_v26, 304 }
 0x387   :  { %v1320_v27 = vpop.permute.xlu1 %1319  ;;  %1935 = vbcast.lane.b32.xlu1 %v7852_v9, 296 }
 0x388   :  { %v1989_v16 = vsel %vm981_vm5, %v1320_v27, 0.0  ;;  %v8567_v20 = vpop.permute.xlu0 %715 }
 0x389   :  { %v8569_v63 = vadd.f32 %v2184_v35, %v1989_v16  ;;  %vm1076_vm1 = vcmp.eq.s32.totalorder %v8567_v20, %v7871_v6 }
 0x38a   :  { %731 = vbcast.lane.b32.xlu0 %v7752_v19, 312 }
 0x38b   :  { %v1720_v22 = vpop.permute.xlu1 %1719  ;;  %931 = vbcast.lane.b32.xlu1 %v7813_v18, 304 }
 0x38c   :  { %v2083_v62 = vsel %vm1075_vm8, %v1720_v22, 0.0  ;;  %v1422_v29 = vpop.permute.xlu0 %1421 }
 0x38d   :  { %v8578_v28 = vadd.f32 %v2298_v42, %v2083_v62  ;;  %v2013_v38 = vsel %vm1005_vm14, %v1422_v29, 0.0 }
 0x38e   :  { %v8582_v12 = vadd.f32 %v2213_v31, %v2013_v38  ;;  %1637 = vbcast.lane.b32.xlu0 %v9268_v5, 312  ;;  %v6029_v5 = vld [vmem:[#allocation7 + $0x4] ss:$24 sps:$4 sm:$0xff]  }
 0x38f   :  { %v210_v48 = vpop.permute.xlu1 %209  ;;  %1837 = vbcast.lane.b32.xlu1 %v7826_v59, 304  ;;  %2735 = vmatprep.subr.bf16.mxu0 %v6029_v5  ;;  %v6041_v31 = vld [vmem:[#allocation7 + $0xc4] ss:$24 sps:$4 sm:$0xff]  }
 0x390   :  { %vm957_vm2 = vcmp.eq.s32.totalorder %v210_v48, %v7871_v6  ;;  %v1822_v19 = vpop.permute.xlu0 %1821  ;;  %2736 = vmatpush1.bf16.msra.mxu0 %v6031_v15 }
 0x391   :  { %v2107_v50 = vsel %vm1099_vm0, %v1822_v19, 0.0 }
 0x392   :  { %v8589_v54 = vadd.f32 %v2327_v40, %v2107_v50  ;;  %833 = vbcast.lane.b32.xlu0 %v7779_v25, 312 }
 0x393   :  { %v516_v2 = vpop.permute.xlu1 %515  ;;  %1739 = vbcast.lane.b32.xlu1 %v7793_v26, 312  ;;  %v6032_v26 = vld [vmem:[#allocation7 + $0x34] ss:$24 sps:$4 sm:$0xff]  }
 0x394   :  { %vm1029_vm3 = vcmp.eq.s32.totalorder %v516_v2, %v7871_v6  ;;  %v8594_v14 = vpop.permute.xlu0 %617  ;;  %2737 = vmatprep.subr.bf16.mxu0 %v6032_v26 }
 0x395   :  { %vm1053_vm4 = vcmp.eq.s32.totalorder %v8594_v14, %v7871_v6  ;;  %2738 = vmatpush1.bf16.msra.mxu0 %v6034_v24 }
 0x396   :  { %1939 = vbcast.lane.b32.xlu0 %v7852_v9, 304  ;;  %2739 = vmatprep.subr.bf16.mxu0 %v6035_v1 }
 0x397   :  { %v916_v33 = vpop.permute.xlu1 %915  ;;  %935 = vbcast.lane.b32.xlu1 %v7813_v18, 312 }
 0x398   :  { %vm1123_vm5 = vcmp.eq.s32.totalorder %v916_v33, %v7871_v6  ;;  %v1218_v25 = vpop.permute.xlu0 %1217 }
 0x399   :  { %v1965_v56 = vsel %vm957_vm2, %v1218_v25, 0.0 }
 0x39a   :  { %v8603_v58 = vadd.f32 %v2155_v17, %v1965_v56  ;;  %1841 = vbcast.lane.b32.xlu0 %v7826_v59, 312  ;;  %v6037_v59 = vld [vmem:[#allocation7 + $0x60] ss:$24 sps:$4 sm:$0xff]  }
 0x39b   :  { %v1622_v36 = vpop.permute.xlu1 %1621  ;;  %1943 = vbcast.lane.b32.xlu1 %v7852_v9, 312  ;;  %2740 = vmatpush1.bf16.msra.mxu0 %v6037_v59 }
 0x39c   :  { %v2060_v18 = vsel %vm1052_vm12, %v1622_v36, 0.0  ;;  %v1524_v32 = vpop.permute.xlu0 %1523  ;;  %2741 = vmatprep.subr.bf16.mxu0 %v6038_v49 }
 0x39d   :  { %v8611_v45 = vadd.f32 %v8540_v51, %v2060_v18  ;;  %v2037_v30 = vsel %vm1029_vm3, %v1524_v32, 0.0 }
 0x39e   :  { %v8616_v53 = vadd.f32 %v8545_v55, %v2037_v30  ;;  %v6793_v55 = vmov 0  }
 0x39f   :  { %v418_v35 = vpop.permute.xlu1 %417  ;;  %2742 = vmatpush1.bf16.msra.mxu0 %v6040_v39  ;;  %2767 = vmatprep.mubr.bf16.mxu0 %v6793_v55 }
 0x3a0   :  { %vm1006_vm6 = vcmp.eq.s32.totalorder %v418_v35, %v7871_v6  ;;  %v1924_v9 = vpop.permute.xlu0 %1923  ;;  %2743 = vmatprep.subr.bf16.mxu0 %v6041_v31 }
 0x3a1   :  { %v2131_v43 = vsel %vm1123_vm5, %v1924_v9, 0.0 }
 0x3a2   :  { %v8622_v13 = vadd.f32 %v8553_v4, %v2131_v43  ;;  %v6052_v4 = vld [vmem:[#allocation7 + $0x150] ss:$24 sps:$4 sm:$0xff]  }
 0x3a3   :  { %v818_v42 = vpop.permute.xlu1 %817  ;;  %2744 = vmatpush1.bf16.msra.mxu0 %v6043_v61 }
 0x3a4   :  { %vm1100_vm7 = vcmp.eq.s32.totalorder %v818_v42, %v7871_v6  ;;  %v8625_v52 = vpop.permute.xlu0 %319  ;;  %2745 = vmatprep.subr.bf16.mxu0 %v6044_v44 }
 0x3a5   :  { %vm983_vm8 = vcmp.eq.s32.totalorder %v8625_v52, %v7871_v6 }
 0x3a7   :  { %v1324_v46 = vpop.permute.xlu1 %1323  ;;  %2746 = vmatpush1.bf16.msra.mxu0 %v6046_v3 }
 0x3a8   :  { %v1990_v57 = vsel %vm982_vm15, %v1324_v46, 0.0  ;;  %v720_v40 = vpop.permute.xlu0 %719  ;;  %2747 = vmatprep.subr.bf16.mxu0 %v6047_v21 }
 0x3a9   :  { %v2186_v7 = vadd.f32 %v8569_v63, %v1990_v57  ;;  %vm1077_vm9 = vcmp.eq.s32.totalorder %v720_v40, %v7871_v6 }
 0x3ab   :  { %v1724_v0 = vpop.permute.xlu1 %1723  ;;  %2748 = vmatpush1.bf16.msra.mxu0 %v6049_v23 }
 0x3ac   :  { %v2084_v17 = vsel %vm1076_vm1, %v1724_v0, 0.0  ;;  %v1426_v60 = vpop.permute.xlu0 %1425  ;;  %2749 = vmatprep.subr.bf16.mxu0 %v6050_v37 }
 0x3ad   :  { %v2300_v34 = vadd.f32 %v8578_v28, %v2084_v17  ;;  %v2014_v51 = vsel %vm1006_vm6, %v1426_v60, 0.0 }
 0x3ae   :  { %v2215_v41 = vadd.f32 %v8582_v12, %v2014_v51  ;;  %v9287_v51 = vld [vmem:[#allocation31_spill] sm:$0xff] }
 0x3af   :  { %v214_v47 = vpop.permute.xlu1 %213  ;;  %2750 = vmatpush1.bf16.msra.mxu0 %v6052_v4  ;;  %v2374_v37 = vmax.f32 %v9287_v51, 1.0 }
 0x3b0   :  { %vm958_vm10 = vcmp.eq.s32.totalorder %v214_v47, %v7871_v6  ;;  %v1826_v8 = vpop.permute.xlu0 %1825  ;;  %2776 = vmatprep.subr.bf16.mxu0 %v6055_v10 }
 0x3b1   :  { %v2108_v11 = vsel %vm1100_vm7, %v1826_v8, 0.0  ;;  %6581 = vrcp.f32 %v2374_v37  ;;  %v6125_v37 = vld [vmem:[#allocation8 + $0xc4] ss:$24 sps:$4 sm:$0xff]  }
 0x3b2   :  { %v2329_v27 = vadd.f32 %v8589_v54, %v2108_v11 }
 0x3b3   :  { %v520_v16 = vpop.permute.xlu1 %519 }
 0x3b4   :  { %vm1030_vm11 = vcmp.eq.s32.totalorder %v520_v16, %v7871_v6  ;;  %v622_v20 = vpop.permute.xlu0 %621 }
 0x3b5   :  { %vm1054_vm12 = vcmp.eq.s32.totalorder %v622_v20, %v7871_v6 }
 0x3b7   :  { %v920_v63 = vpop.permute.xlu1 %919 }
 0x3b8   :  { %vm1124_vm13 = vcmp.eq.s32.totalorder %v920_v63, %v7871_v6  ;;  %v1222_v22 = vpop.permute.xlu0 %1221 }
 0x3b9   :  { %v1966_v62 = vsel %vm958_vm10, %v1222_v22, 0.0 }
 0x3ba   :  { %v2157_v29 = vadd.f32 %v8603_v58, %v1966_v62 }
 0x3bb   :  { %v1626_v28 = vpop.permute.xlu1 %1625 }
 0x3bc   :  { %v2061_v38 = vsel %vm1053_vm4, %v1626_v28, 0.0  ;;  %v1528_v12 = vpop.permute.xlu0 %1527 }
 0x3bd   :  { %v2272_v48 = vadd.f32 %v8611_v45, %v2061_v38  ;;  %v2038_v19 = vsel %vm1030_vm11, %v1528_v12, 0.0 }
 0x3be   :  { %v2244_v50 = vadd.f32 %v8616_v53, %v2038_v19 }
 0x3bf   :  { %v422_v54 = vpop.permute.xlu1 %421 }
 0x3c0   :  { %vm1007_vm14 = vcmp.eq.s32.totalorder %v422_v54, %v7871_v6  ;;  %v1928_v2 = vpop.permute.xlu0 %1927  ;;  %v8693_v54 = vpop.eup %6581 }
 0x3c1   :  { %v2132_v5 = vsel %vm1124_vm13, %v1928_v2, 0.0  ;;  %vm2473_vm13 = vcmask 1041409  }
 0x3c2   :  { %v2358_v15 = vadd.f32 %v8622_v13, %v2132_v5  ;;  %v6106_v5 = vld [vmem:[#allocation8] ss:$24 sps:$4 sm:$0xff]  }
 0x3c3   :  { %v822_v33 = vpop.permute.xlu1 %821 }
 0x3c4   :  { %vm1101_vm0 = vcmp.eq.s32.totalorder %v822_v33, %v7871_v6  ;;  %v324_v25 = vpop.permute.xlu0 %323 }
 0x3c5   :  { %vm984_vm15 = vcmp.eq.s32.totalorder %v324_v25, %v7871_v6 }
 0x3c7   :  { %v1328_v14 = vpop.permute.xlu1 %1327 }
 0x3c8   :  { %v1991_v26 = vsel %vm983_vm8, %v1328_v14, 0.0  ;;  %v724_v56 = vpop.permute.xlu0 %723 }
 0x3c9   :  { %v2187_v24 = vadd.f32 %v2186_v7, %v1991_v26  ;;  %vm1078_vm4 = vcmp.eq.s32.totalorder %v724_v56, %v7871_v6 }
 0x3cb   :  { %v1728_v58 = vpop.permute.xlu1 %1727 }
 0x3cc   :  { %v2085_v36 = vsel %vm1077_vm9, %v1728_v58, 0.0  ;;  %v1430_v18 = vpop.permute.xlu0 %1429  ;;  %v6112_v58 = vld [vmem:[#allocation8 + $0x30] ss:$24 sps:$4 sm:$0xff]  }
 0x3cd   :  { %v2301_v32 = vadd.f32 %v2300_v34, %v2085_v36  ;;  %v2015_v45 = vsel %vm1007_vm14, %v1430_v18, 0.0  ;;  %v2377_v36 = vrot.slane %v8693_v54, 1 }
 0x3ce   :  { %v8668_v30 = vadd.f32 %v2215_v41, %v2015_v45 }
 0x3cf   :  { %v218_v1 = vpop.permute.xlu1 %217 }
 0x3d0   :  { %vm959_vm1 = vcmp.eq.s32.totalorder %v218_v1, %v7871_v6  ;;  %v1830_v53 = vpop.permute.xlu0 %1829 }
 0x3d1   :  { %v2109_v59 = vsel %vm1101_vm0, %v1830_v53, 0.0  ;;  %v6113_v53 = vld [vmem:[#allocation8 + $0x64] ss:$24 sps:$4 sm:$0xff]   ;;  %vm2476_vm0 = vcmask 1042434  }
 0x3d2   :  { %v8673_v35 = vadd.f32 %v2329_v27, %v2109_v59 }
 0x3d3   :  { %v524_v9 = vpop.permute.xlu1 %523 }
 0x3d4   :  { %vm1031_vm2 = vcmp.eq.s32.totalorder %v524_v9, %v7871_v6  ;;  %v626_v43 = vpop.permute.xlu0 %625 }
 0x3d5   :  { %vm1055_vm5 = vcmp.eq.s32.totalorder %v626_v43, %v7871_v6 }
 0x3d7   :  { %v924_v49 = vpop.permute.xlu1 %923 }
 0x3d8   :  { %v1226_v13 = vpop.permute.xlu0 %1225  ;;  %vm1125_vm3 = vcmp.eq.s32.totalorder %v924_v49, %v7871_v6 }
 0x3d9   :  { %v1967_v39 = vsel %vm959_vm1, %v1226_v13, 0.0 }
 0x3da   :  { %v2158_v42 = vadd.f32 %v2157_v29, %v1967_v39  ;;  %v6118_v39 = vld [vmem:[#allocation8 + $0x60] ss:$24 sps:$4 sm:$0xff]  }
 0x3db   :  { %v1630_v52 = vpop.permute.xlu1 %1629 }
 0x3dc   :  { %v2062_v31 = vsel %vm1054_vm12, %v1630_v52, 0.0  ;;  %v1532_v61 = vpop.permute.xlu0 %1531 }
 0x3dd   :  { %v2273_v46 = vadd.f32 %v2272_v48, %v2062_v31  ;;  %v2039_v57 = vsel %vm1031_vm2, %v1532_v61, 0.0  ;;  %v6119_v61 = vld [vmem:[#allocation8 + $0x94] ss:$24 sps:$4 sm:$0xff]  }
 0x3de   :  { %v8678_v40 = vadd.f32 %v2244_v50, %v2039_v57  ;;  %v6101_v50 = vld [vmem:[#allocation8 + $0x4] ss:$24 sps:$4 sm:$0xff]  }
 0x3df   :  { %v426_v7 = vpop.permute.xlu1 %425  ;;  %4624 = vmatprep.subr.bf16.mxu1 %v6101_v50 }
 0x3e0   :  { %v1932_v44 = vpop.permute.xlu0 %1931  ;;  %vm1008_vm7 = vcmp.eq.s32.totalorder %v426_v7, %v7871_v6  ;;  %4625 = vmatpush1.bf16.msra.mxu1 %v6106_v5 }
 0x3e1   :  { %v2133_v3 = vsel %vm1125_vm3, %v1932_v44, 0.0  ;;  %vm2479_vm3 = vcmask 1043459  }
 0x3e2   :  { %v8681_v0 = vadd.f32 %v2358_v15, %v2133_v3  ;;  %v6107_v15 = vld [vmem:[#allocation8 + $0x34] ss:$24 sps:$4 sm:$0xff]  }
 0x3e3   :  { %v826_v21 = vpop.permute.xlu1 %825  ;;  %4626 = vmatprep.subr.bf16.mxu1 %v6107_v15  ;;  %v6136_v15 = vld [vmem:[#allocation8 + $0xf0] ss:$24 sps:$4 sm:$0xff]  }
 0x3e4   :  { %v8683_v17 = vpop.permute.xlu0 %527  ;;  %vm1102_vm9 = vcmp.eq.s32.totalorder %v826_v21, %v7871_v6  ;;  %4627 = vmatpush1.bf16.msra.mxu1 %v6112_v58  ;;  %v6124_v21 = vld [vmem:[#allocation8 + $0x90] ss:$24 sps:$4 sm:$0xff]  }
 0x3e5   :  { %4628 = vmatprep.subr.bf16.mxu1 %v6113_v53  ;;  %vm1032_vm11 = vcmp.eq.s32.totalorder %v8683_v17, %v7871_v6 }
 0x3e7   :  { %v1332_v60 = vpop.permute.xlu1 %1331 }
 0x3e8   :  { %v1992_v23 = vsel %vm984_vm15, %v1332_v60, 0.0  ;;  %v8687_v34 = vpop.permute.xlu0 %927  ;;  %4629 = vmatpush1.bf16.msra.mxu1 %v6118_v39  ;;  %v6143_v39 = vld [vmem:[#allocation8 + $0x154] ss:$24 sps:$4 sm:$0xff]  }
 0x3e9   :  { %v2188_v41 = vadd.f32 %v2187_v24, %v1992_v23  ;;  %4630 = vmatprep.subr.bf16.mxu1 %v6119_v61  ;;  %vm1126_vm12 = vcmp.eq.s32.totalorder %v8687_v34, %v7871_v6 }
 0x3eb   :  { %v2189_v47 = vrot.slane %v2188_v41, 4  ;;  %v1732_v8 = vpop.permute.xlu1 %1731 }
 0x3ec   :  { %v2086_v4 = vsel %vm1078_vm4, %v1732_v8, 0.0  ;;  %v1634_v11 = vpop.permute.xlu0 %1633  ;;  %4631 = vmatpush1.bf16.msra.mxu1 %v6124_v21  ;;  %vm2482_vm4 = vcmask 1044484  }
 0x3ed   :  { %v2190_v10 = vadd.f32 %v2189_v47, %v2188_v41  ;;  %v2302_v27 = vadd.f32 %v2301_v32, %v2086_v4  ;;  %v2063_v16 = vsel %vm1055_vm5, %v1634_v11, 0.0  ;;  %4632 = vmatprep.subr.bf16.mxu1 %v6125_v37 }
 0x3ee   :  { %v2274_v20 = vadd.f32 %v2273_v46, %v2063_v16 }
 0x3ef   :  { %v2191_v63 = vrot.slane %v2190_v10, 2  ;;  %v222_v22 = vpop.permute.xlu1 %221 }
 0x3f0   :  { %v630_v62 = vpop.permute.xlu0 %629  ;;  %vm960_vm6 = vcmp.eq.s32.totalorder %v222_v22, %v7871_v6 }
 0x3f1   :  { %v2192_v29 = vadd.f32 %v2191_v63, %v2190_v10  ;;  %vm1056_vm10 = vcmp.eq.s32.totalorder %v630_v62, %v7871_v6  ;;  %v2378_v10 = vrot.slane %v8693_v54, 2 }
 0x3f3   :  { %v728_v28 = vpop.permute.xlu1 %727  ;;  %v2193_v38 = vrot.slane %v2192_v29, 1 }
 0x3f4   :  { %v1230_v12 = vpop.permute.xlu0 %1229  ;;  %vm1079_vm8 = vcmp.eq.s32.totalorder %v728_v28, %v7871_v6  ;;  %v6131_v28 = vld [vmem:[#allocation8 + $0xf4] ss:$24 sps:$4 sm:$0xff]  }
 0x3f5   :  { %v1968_v48 = vsel %vm960_vm6, %v1230_v12, 0.0  ;;  %v2194_v33 = vadd.f32 %v2193_v38, %v2192_v29  ;;  %vm2485_vm6 = vcmask 1045509  }
 0x3f6   :  { %v2159_v19 = vadd.f32 %v2158_v42, %v1968_v48 }
 0x3f7   :  { %v1434_v2 = vpop.permute.xlu1 %1433  ;;  %v2393_v59 = vmul.f32 %v2377_v36, %v2194_v33 }
 0x3f8   :  { %v2160_v25 = vrot.slane %v2159_v19, 4  ;;  %v2016_v14 = vsel %vm1008_vm7, %v1434_v2, 0.0  ;;  %v1736_v26 = vpop.permute.xlu0 %1735  ;;  %vm2488_vm7 = vcmask 1046534  }
 0x3f9   :  { %v2217_v56 = vadd.f32 %v8668_v30, %v2016_v14  ;;  %v2087_v24 = vsel %vm1079_vm8, %v1736_v26, 0.0  ;;  %v2401_v46 = vpack.c.bf16 %v2393_v59, %v2393_v59  ;;  %vm2491_vm8 = vcmask 1047559  }
 0x3fa   :  { %v2161_v18 = vadd.f32 %v2160_v25, %v2159_v19  ;;  %v8699_v32 = vadd.f32 %v2302_v27, %v2087_v24 }
 0x3fb   :  { %v2218_v45 = vrot.slane %v2217_v56, 4  ;;  %v1834_v1 = vpop.permute.xlu1 %1833  ;;  %v2465_v41 = vunpack.c.l.b16 %v2401_v46  ;;  %v2379_v46 = vrot.slane %v8693_v54, 3 }
 0x3fc   :  { %v2162_v9 = vrot.slane %v2161_v18, 2  ;;  %v2110_v43 = vsel %vm1102_vm9, %v1834_v1, 0.0  ;;  %v8702_v49 = vpop.permute.xlu0 %731  ;;  %v2380_v1 = vrot.slane %v8693_v54, 4 }
 0x3fd   :  { %v2219_v30 = vadd.f32 %v2218_v45, %v2217_v56  ;;  %v8705_v13 = vadd.f32 %v8673_v35, %v2110_v43  ;;  %v2472_v38 = vrot.slane %v2465_v41, 7  ;;  %v6137_v56 = vld [vmem:[#allocation8 + $0x124] ss:$24 sps:$4 sm:$0xff]   ;;  %vm1080_vm2 = vcmp.eq.s32.totalorder %v8702_v49, %v7871_v6 }
 0x3fe   :  { %v2163_v42 = vadd.f32 %v2162_v9, %v2161_v18 }
 0x3ff   :  { %v2220_v52 = vrot.slane %v2219_v30, 2  ;;  %v8708_v31 = vpop.permute.xlu1 %829 }
 0x400   :  { %v2164_v57 = vrot.slane %v2163_v42, 1  ;;  %v1638_v7 = vpop.permute.xlu0 %1637  ;;  %vm1103_vm1 = vcmp.eq.s32.totalorder %v8708_v31, %v7871_v6 }
 0x401   :  { %v2221_v44 = vadd.f32 %v2220_v52, %v2219_v30  ;;  %v2064_v3 = vsel %vm1056_vm10, %v1638_v7, 0.0 }
 0x402   :  { %v2165_v60 = vadd.f32 %v2164_v57, %v2163_v42  ;;  %v2275_v35 = vadd.f32 %v2274_v20, %v2064_v3  ;;  %v6130_v20 = vld [vmem:[#allocation8 + $0xc0] ss:$24 sps:$4 sm:$0xff]  }
 0x403   :  { %v2222_v23 = vrot.slane %v2221_v44, 1  ;;  %v1536_v51 = vpop.permute.xlu1 %1535  ;;  %4633 = vmatpush1.bf16.msra.mxu1 %v6130_v20 }
 0x404   :  { %v2392_v47 = vmul.f32 %v8693_v54, %v2165_v60  ;;  %v2276_v8 = vrot.slane %v2275_v35, 4  ;;  %v2040_v4 = vsel %vm1032_vm11, %v1536_v51, 0.0  ;;  %v834_v11 = vpop.permute.xlu0 %833  ;;  %4634 = vmatprep.subr.bf16.mxu1 %v6131_v28  ;;  %v6161_v28 = vld [vmem:[#allocation8 + $0x1e4] ss:$24 sps:$4 sm:$0xff]  }
 0x405   :  { %v2223_v27 = vadd.f32 %v2222_v23, %v2221_v44  ;;  %v2246_v16 = vadd.f32 %v8678_v40, %v2040_v4  ;;  %vm1104_vm15 = vcmp.eq.s32.totalorder %v834_v11, %v7871_v6  ;;  %v6148_v44 = vld [vmem:[#allocation8 + $0x150] ss:$24 sps:$4 sm:$0xff]  }
 0x406   :  { %v2400_v63 = vpack.c.bf16 %v2392_v47, %v2392_v47  ;;  %v2277_v22 = vadd.f32 %v2276_v8, %v2275_v35  ;;  %v6149_v35 = vld [vmem:[#allocation8 + $0x184] ss:$24 sps:$4 sm:$0xff]   ;;  %v6154_v47 = vld [vmem:[#allocation8 + $0x180] ss:$24 sps:$4 sm:$0xff]  }
 0x407   :  { %v2394_v17 = vmul.f32 %v2378_v10, %v2223_v27  ;;  %v2247_v62 = vrot.slane %v2246_v16, 4  ;;  %v1936_v29 = vpop.permute.xlu1 %1935  ;;  %4635 = vmatpush1.bf16.msra.mxu1 %v6136_v15  ;;  %v6155_v27 = vld [vmem:[#allocation8 + $0x1b4] ss:$24 sps:$4 sm:$0xff]  }
 0x408   :  { %v2464_v12 = vunpack.c.l.b16 %v2400_v63  ;;  %v2278_v48 = vrot.slane %v2277_v22, 2  ;;  %v2134_v19 = vsel %vm1126_vm12, %v1936_v29, 0.0  ;;  %v1940_v50 = vpop.permute.xlu0 %1939  ;;  %4636 = vmatprep.subr.bf16.mxu1 %v6137_v56  ;;  %v6160_v63 = vld [vmem:[#allocation8 + $0x1b0] ss:$24 sps:$4 sm:$0xff]  }
 0x409   :  { %v2402_v2 = vpack.c.bf16 %v2394_v17, %v2394_v17  ;;  %v2248_v40 = vadd.f32 %v2247_v62, %v2246_v16  ;;  %v2360_v5 = vadd.f32 %v8681_v0, %v2134_v19  ;;  %v6142_v0 = vld [vmem:[#allocation8 + $0x120] ss:$24 sps:$4 sm:$0xff]   ;;  %v6172_v56 = vld [vmem:[#allocation8 + $0x210] ss:$24 sps:$4 sm:$0xff]  }
 0x40a   :  { %v2474_v33 = vsel %vm2473_vm13, %v2472_v38, %v2464_v12  ;;  %v2279_v25 = vadd.f32 %v2278_v48, %v2277_v22 }
 0x40b   :  { %v2466_v34 = vunpack.c.l.b16 %v2402_v2  ;;  %v2249_v14 = vrot.slane %v2248_v40, 2  ;;  %v932_v26 = vpop.permute.xlu1 %931  ;;  %4637 = vmatpush1.bf16.msra.mxu1 %v6142_v0  ;;  %v6166_v2 = vld [vmem:[#allocation8 + $0x1e0] ss:$24 sps:$4 sm:$0xff]  }
 0x40c   :  { %v2280_v24 = vrot.slane %v2279_v25, 1  ;;  %vm1127_vm14 = vcmp.eq.s32.totalorder %v932_v26, %v7871_v6  ;;  %v1842_v45 = vpop.permute.xlu0 %1841  ;;  %4638 = vmatprep.subr.bf16.mxu1 %v6143_v39  ;;  %v2383_v39 = vrot.slane %v8693_v54, 7 }
 0x40d   :  { %v2475_v58 = vrot.slane %v2466_v34, 6  ;;  %v2250_v36 = vadd.f32 %v2249_v14, %v2248_v40  ;;  %v2135_v18 = vsel %vm1127_vm14, %v1940_v50, 0.0  ;;  %v2112_v61 = vsel %vm1104_vm15, %v1842_v45, 0.0 }
 0x40e   :  { %v2281_v53 = vadd.f32 %v2280_v24, %v2279_v25  ;;  %v2361_v59 = vadd.f32 %v2360_v5, %v2135_v18  ;;  %v2382_v40 = vrot.slane %v8693_v54, 6  ;;  %v6167_v25 = vld [vmem:[#allocation8 + $0x214] ss:$24 sps:$4 sm:$0xff]   ;;  %v6173_v18 = vld [vmem:[#allocation8 + $0x244] ss:$24 sps:$4 sm:$0xff]  }
 0x40f   :  { %v2251_v9 = vrot.slane %v2250_v36, 1  ;;  %v1838_v43 = vpop.permute.xlu1 %1837  ;;  %v2477_v30 = vsel %vm2476_vm0, %v2475_v58, %v2474_v33  ;;  %4639 = vmatpush1.bf16.msra.mxu1 %v6148_v44 }
 0x410   :  { %v2396_v42 = vmul.f32 %v2380_v1, %v2281_v53  ;;  %v2111_v52 = vsel %vm1103_vm1, %v1838_v43, 0.0  ;;  %4640 = vmatprep.subr.bf16.mxu1 %v6149_v35  ;;  %v6178_v1 = vld [vmem:[#allocation8 + $0x240] ss:$24 sps:$4 sm:$0xff]   ;;  %v6179_v43 = vld [vmem:[#allocation8 + $0x274] ss:$24 sps:$4 sm:$0xff]  }
 0x411   :  { %v2252_v57 = vadd.f32 %v2251_v9, %v2250_v36  ;;  %v2332_v7 = vadd.f32 %v8705_v13, %v2111_v52  ;;  %v6184_v52 = vld [vmem:[#allocation8 + $0x270] ss:$24 sps:$4 sm:$0xff]  }
 0x412   :  { %v2404_v3 = vpack.c.bf16 %v2396_v42, %v2396_v42  ;;  %v6053_v35 = vld [vmem:[#allocation7 + $0x8] ss:$24 sps:$4 sm:$0xff]  }
 0x413   :  { %v2395_v31 = vmul.f32 %v2379_v46, %v2252_v57  ;;  %v2333_v21 = vadd.f32 %v2332_v7, %v2112_v61  ;;  %v1740_v60 = vpop.permute.xlu1 %1739  ;;  %4641 = vmatpush1.bf16.msra.mxu1 %v6154_v47  ;;  %v6185_v7 = vld [vmem:[#allocation8 + $0x2a4] ss:$24 sps:$4 sm:$0xff]   ;;  %v6059_v47 = vld [vmem:[#allocation7 + $0x68] ss:$24 sps:$4 sm:$0xff]  }
 0x414   :  { %v2088_v23 = vsel %vm1080_vm2, %v1740_v60, 0.0  ;;  %v2468_v8 = vunpack.c.l.b16 %v2404_v3  ;;  %4642 = vmatprep.subr.bf16.mxu1 %v6155_v27  ;;  %v6068_v27 = vld [vmem:[#allocation7 + $0xf8] ss:$24 sps:$4 sm:$0xff]  }
 0x415   :  { %v2403_v51 = vpack.c.bf16 %v2395_v31, %v2395_v31  ;;  %v2334_v37 = vrot.slane %v2333_v21, 4  ;;  %v2304_v41 = vadd.f32 %v8699_v32, %v2088_v23  ;;  %v6190_v31 = vld [vmem:[#allocation8 + $0x2a0] ss:$24 sps:$4 sm:$0xff]  }
 0x416   :  { %v2481_v22 = vrot.slane %v2468_v8, 4  ;;  %v6064_v8 = vld [vmem:[#allocation7 + $0x9c] ss:$24 sps:$4 sm:$0xff]  }
 0x417   :  { %v2467_v13 = vunpack.c.l.b16 %v2403_v51  ;;  %v2335_v4 = vadd.f32 %v2334_v37, %v2333_v21  ;;  %v2305_v11 = vrot.slane %v2304_v41, 4  ;;  %v936_v10 = vpop.permute.xlu1 %935  ;;  %4643 = vmatpush1.bf16.msra.mxu1 %v6160_v63  ;;  %v6058_v51 = vld [vmem:[#allocation7 + $0x3c] ss:$24 sps:$4 sm:$0xff]   ;;  %v6056_v37 = vld [vmem:[#allocation7 + $0x38] ss:$24 sps:$4 sm:$0xff]  }
 0x418   :  { %vm1128_vm5 = vcmp.eq.s32.totalorder %v936_v10, %v7871_v6  ;;  %4644 = vmatprep.subr.bf16.mxu1 %v6161_v28  ;;  %v2381_v6 = vrot.slane %v8693_v54, 5  ;;  %v6070_v10 = vld [vmem:[#allocation7 + $0xfc] ss:$24 sps:$4 sm:$0xff]   ;;  %v6074_v63 = vld [vmem:[#allocation7 + $0x158] ss:$24 sps:$4 sm:$0xff]  }
 0x419   :  { %v2478_v49 = vrot.slane %v2467_v13, 5  ;;  %v2336_v16 = vrot.slane %v2335_v4, 2  ;;  %v2306_v20 = vadd.f32 %v2305_v11, %v2304_v41  ;;  %v6061_v41 = vld [vmem:[#allocation7 + $0x6c] ss:$24 sps:$4 sm:$0xff]   ;;  %v6062_v13 = vld [vmem:[#allocation7 + $0x98] ss:$24 sps:$4 sm:$0xff]  }
 0x41a   :  { %v6065_v11 = vld [vmem:[#allocation7 + $0xc8] ss:$24 sps:$4 sm:$0xff]  }
 0x41b   :  { %v2337_v17 = vadd.f32 %v2336_v16, %v2335_v4  ;;  %v2307_v32 = vrot.slane %v2306_v20, 2  ;;  %v1944_v62 = vpop.permute.xlu1 %1943  ;;  %v2480_v29 = vsel %vm2479_vm3, %v2478_v49, %v2477_v30  ;;  %4645 = vmatpush1.bf16.msra.mxu1 %v6166_v2  ;;  %v6067_v4 = vld [vmem:[#allocation7 + $0xcc] ss:$24 sps:$4 sm:$0xff]   ;;  %v6071_v16 = vld [vmem:[#allocation7 + $0x128] ss:$24 sps:$4 sm:$0xff]  }
 0x41c   :  { %v2136_v38 = vsel %vm1128_vm5, %v1944_v62, 0.0  ;;  %v2483_v12 = vsel %vm2482_vm4, %v2481_v22, %v2480_v29  ;;  %4646 = vmatprep.subr.bf16.mxu1 %v6167_v25  ;;  %v6073_v49 = vld [vmem:[#allocation7 + $0x12c] ss:$24 sps:$4 sm:$0xff]   ;;  %v6080_v62 = vld [vmem:[#allocation7 + $0x40] ss:$24 sps:$4 sm:$0xff]  }
 0x41d   :  { %v2338_v48 = vrot.slane %v2337_v17, 1  ;;  %v2308_v19 = vadd.f32 %v2307_v32, %v2306_v20  ;;  %v2362_v50 = vadd.f32 %v2361_v59, %v2136_v38  ;;  %v6076_v20 = vld [vmem:[#allocation7 + $0x15c] ss:$24 sps:$4 sm:$0xff]   ;;  %v6083_v28 = vld [vmem:[#allocation7 + $0x70] ss:$24 sps:$4 sm:$0xff]  }
 0x41e   :  { %v6079_v22 = vld [vmem:[#allocation7 + $0x14] ss:$24 sps:$4 sm:$0xff]   ;;  %v6082_v32 = vld [vmem:[#allocation7 + $0x44] ss:$24 sps:$4 sm:$0xff]   ;;  %v6092_v2 = vld [vmem:[#allocation7 + $0x100] ss:$24 sps:$4 sm:$0xff]  }
 0x41f   :  { %v2339_v5 = vadd.f32 %v2338_v48, %v2337_v17  ;;  %v2309_v15 = vrot.slane %v2308_v19, 1  ;;  %v2363_v33 = vrot.slane %v2362_v50, 4  ;;  %4647 = vmatpush1.bf16.msra.mxu1 %v6172_v56  ;;  %v6077_v17 = vld [vmem:[#allocation7 + $0x10] ss:$24 sps:$4 sm:$0xff]   ;;  %v6085_v29 = vld [vmem:[#allocation7 + $0x74] ss:$24 sps:$4 sm:$0xff]  }
 0x420   :  { %4648 = vmatprep.subr.bf16.mxu1 %v6173_v18  ;;  %v6088_v38 = vld [vmem:[#allocation7 + $0xa4] ss:$24 sps:$4 sm:$0xff]   ;;  %v6091_v48 = vld [vmem:[#allocation7 + $0xd4] ss:$24 sps:$4 sm:$0xff]   ;;  %v6103_v25 = vld [vmem:[#allocation8 + $0x8] ss:$24 sps:$4 sm:$0xff]  }
 0x421   :  { %v2398_v34 = vmul.f32 %v2382_v40, %v2339_v5  ;;  %v2310_v14 = vadd.f32 %v2309_v15, %v2308_v19  ;;  %v2364_v26 = vadd.f32 %v2363_v33, %v2362_v50  ;;  %v6089_v19 = vld [vmem:[#allocation7 + $0xd0] ss:$24 sps:$4 sm:$0xff]   ;;  %v6094_v50 = vld [vmem:[#allocation7 + $0x104] ss:$24 sps:$4 sm:$0xff]   ;;  %v6097_v40 = vld [vmem:[#allocation7 + $0x134] ss:$24 sps:$4 sm:$0xff]  }
 0x422   :  { %v6100_v5 = vld [vmem:[#allocation7 + $0x164] ss:$24 sps:$4 sm:$0xff]   ;;  %v6098_v15 = vld [vmem:[#allocation7 + $0x160] ss:$24 sps:$4 sm:$0xff]  }
 0x423   :  { %v2406_v24 = vpack.c.bf16 %v2398_v34, %v2398_v34  ;;  %v2397_v58 = vmul.f32 %v2381_v6, %v2310_v14  ;;  %v2365_v36 = vrot.slane %v2364_v26, 2  ;;  %4649 = vmatpush1.bf16.msra.mxu1 %v6178_v1  ;;  %v6105_v33 = vld [vmem:[#allocation8 + $0xc] ss:$24 sps:$4 sm:$0xff]   ;;  %v6111_v34 = vld [vmem:[#allocation8 + $0x3c] ss:$24 sps:$4 sm:$0xff]  }
 0x424   :  { %4650 = vmatprep.subr.bf16.mxu1 %v6179_v43  ;;  %v6109_v6 = vld [vmem:[#allocation8 + $0x38] ss:$24 sps:$4 sm:$0xff]   ;;  %v6117_v14 = vld [vmem:[#allocation8 + $0x6c] ss:$24 sps:$4 sm:$0xff]   ;;  %v6123_v56 = vld [vmem:[#allocation8 + $0x9c] ss:$24 sps:$4 sm:$0xff]  }
 0x425   :  { %v2405_v45 = vpack.c.bf16 %v2397_v58, %v2397_v58  ;;  %v2366_v0 = vadd.f32 %v2365_v36, %v2364_v26  ;;  %v2470_v53 = vunpack.c.l.b16 %v2406_v24  ;;  %v6115_v26 = vld [vmem:[#allocation8 + $0x68] ss:$24 sps:$4 sm:$0xff]   ;;  %v6121_v24 = vld [vmem:[#allocation8 + $0x98] ss:$24 sps:$4 sm:$0xff]   ;;  %v6129_v58 = vld [vmem:[#allocation8 + $0xcc] ss:$24 sps:$4 sm:$0xff]  }
 0x426   :  { %v6127_v36 = vld [vmem:[#allocation8 + $0xc8] ss:$24 sps:$4 sm:$0xff]   ;;  %v6135_v18 = vld [vmem:[#allocation8 + $0xfc] ss:$24 sps:$4 sm:$0xff]  }
 0x427   :  { %v2469_v59 = vunpack.c.l.b16 %v2405_v45  ;;  %v2367_v9 = vrot.slane %v2366_v0, 1  ;;  %v2487_v61 = vrot.slane %v2470_v53, 2  ;;  %4651 = vmatpush1.bf16.msra.mxu1 %v6184_v52  ;;  %v6133_v45 = vld [vmem:[#allocation8 + $0xf8] ss:$24 sps:$4 sm:$0xff]   ;;  %v6191_v1 = vld [vmem:[#allocation8 + $0x2d4] ss:$24 sps:$4 sm:$0xff]  }
 0x428   :  { %4652 = vmatprep.subr.bf16.mxu1 %v6185_v7  ;;  %v6196_v53 = vld [vmem:[#allocation8 + $0x2d0] ss:$24 sps:$4 sm:$0xff]   ;;  %v6199_v43 = vld [vmem:[#allocation8 + $0x304] ss:$24 sps:$4 sm:$0xff]  }
 0x429   :  { %v2484_v30 = vrot.slane %v2469_v59, 3  ;;  %v2368_v42 = vadd.f32 %v2367_v9, %v2366_v0  ;;  %v6141_v0 = vld [vmem:[#allocation8 + $0x12c] ss:$24 sps:$4 sm:$0xff]   ;;  %v6139_v59 = vld [vmem:[#allocation8 + $0x128] ss:$24 sps:$4 sm:$0xff]  }
 0x42a   :  { %v6147_v9 = vld [vmem:[#allocation8 + $0x15c] ss:$24 sps:$4 sm:$0xff]  }
 0x42b   :  { %v2399_v46 = vmul.f32 %v2383_v39, %v2368_v42  ;;  %v2486_v57 = vsel %vm2485_vm6, %v2484_v30, %v2483_v12  ;;  %4653 = vmatpush1.bf16.msra.mxu1 %v6190_v31  ;;  %v6086_v12 = vld [vmem:[#allocation7 + $0xa0] ss:$24 sps:$4 sm:$0xff]   ;;  %v6153_v39 = vld [vmem:[#allocation8 + $0x18c] ss:$24 sps:$4 sm:$0xff]   ;;  %v6159_v52 = vld [vmem:[#allocation8 + $0x1bc] ss:$24 sps:$4 sm:$0xff]  }
 0x42c   :  { %v2489_v44 = vsel %vm2488_vm7, %v2487_v61, %v2486_v57  ;;  %4654 = vmatprep.subr.bf16.mxu1 %v6191_v1  ;;  %v6145_v30 = vld [vmem:[#allocation8 + $0x158] ss:$24 sps:$4 sm:$0xff]   ;;  %v6151_v42 = vld [vmem:[#allocation8 + $0x188] ss:$24 sps:$4 sm:$0xff]   ;;  %v6171_v7 = vld [vmem:[#allocation8 + $0x21c] ss:$24 sps:$4 sm:$0xff]  }
 0x42d   :  { %v2407_v3 = vpack.c.bf16 %v2399_v46, %v2399_v46  ;;  %v6157_v61 = vld [vmem:[#allocation8 + $0x1b8] ss:$24 sps:$4 sm:$0xff]   ;;  %v6165_v46 = vld [vmem:[#allocation8 + $0x1ec] ss:$24 sps:$4 sm:$0xff]   ;;  %v6163_v57 = vld [vmem:[#allocation8 + $0x1e8] ss:$24 sps:$4 sm:$0xff]  }
 0x42e   :  { %v6175_v31 = vld [vmem:[#allocation8 + $0x248] ss:$24 sps:$4 sm:$0xff]  }
 0x42f   :  { %v2471_v21 = vunpack.c.l.b16 %v2407_v3  ;;  %4655 = vmatpush1.bf16.msra.mxu1 %v6196_v53  ;;  %v6177_v3 = vld [vmem:[#allocation8 + $0x24c] ss:$24 sps:$4 sm:$0xff]   ;;  %v6245_v53 = vld [vmem:[#allocation8 + $0x480] ss:$24 sps:$4 sm:$0xff]  }
 0x430   :  { %4665 = vmatprep.subr.bf16.mxu1 %v6199_v43  ;;  %v6253_v43 = vld [vmem:[#allocation8 + $0x4b4] ss:$24 sps:$4 sm:$0xff]  }
 0x431   :  { %v2490_v60 = vrot.slane %v2471_v21, 1  ;;  %v6183_v21 = vld [vmem:[#allocation8 + $0x27c] ss:$24 sps:$4 sm:$0xff]  }
 0x433   :  { %v2492_v54 = vsel %vm2491_vm8, %v2490_v60, %v2489_v44  ;;  %v6169_v44 = vld [vmem:[#allocation8 + $0x218] ss:$24 sps:$4 sm:$0xff]  }
 0x434   :  { %v8734_v23 = vpack.c.b16 %v2492_v54, %v2492_v54  ;;  %v6181_v60 = vld [vmem:[#allocation8 + $0x278] ss:$24 sps:$4 sm:$0xff]   ;;  %v6187_v54 = vld [vmem:[#allocation8 + $0x2a8] ss:$24 sps:$4 sm:$0xff]  }
 0x436   :  { %2768 = vmatmul.mubr.bf16.vlgmr.msra.gmra.mrb[0].mxu0 %v8734_v23 }
 0x437   :  { %2777 = vmatpush1.bf16.msra.mxu0 %v6053_v35  ;;  %2808 = vmatprep.mubr.bf16.mxu0 %v6793_v55  ;;  %v6189_v35 = vld [vmem:[#allocation8 + $0x2ac] ss:$24 sps:$4 sm:$0xff]  }
 0x438   :  { %2778 = vmatprep.subr.bf16.mxu0 %v6058_v51  ;;  %v6193_v51 = vld [vmem:[#allocation8 + $0x2d8] ss:$24 sps:$4 sm:$0xff]  }
 0x43b   :  { %2779 = vmatpush1.bf16.msra.mxu0 %v6056_v37  ;;  %v6202_v37 = vld [vmem:[#allocation8 + $0x30c] ss:$24 sps:$4 sm:$0xff]  }
 0x43c   :  { %2780 = vmatprep.subr.bf16.mxu0 %v6061_v41 }
 0x43f   :  { %2781 = vmatpush1.bf16.msra.mxu0 %v6059_v47 }
 0x440   :  { %2782 = vmatprep.subr.bf16.mxu0 %v6064_v8 }
 0x443   :  { %2783 = vmatpush1.bf16.msra.mxu0 %v6062_v13 }
 0x444   :  { %2784 = vmatprep.subr.bf16.mxu0 %v6067_v4  ;;  %v6197_v4 = vld [vmem:[#allocation8 + $0x300] ss:$24 sps:$4 sm:$0xff]  }
 0x447   :  { %2785 = vmatpush1.bf16.msra.mxu0 %v6065_v11  ;;  %v6200_v11 = vld [vmem:[#allocation8 + $0x308] ss:$24 sps:$4 sm:$0xff]  }
 0x448   :  { %2786 = vmatprep.subr.bf16.mxu0 %v6070_v10 }
 0x44b   :  { %2787 = vmatpush1.bf16.msra.mxu0 %v6068_v27 }
 0x44c   :  { %2788 = vmatprep.subr.bf16.mxu0 %v6073_v49  ;;  %v6205_v49 = vld [vmem:[#allocation8 + $0x334] ss:$24 sps:$4 sm:$0xff]  }
 0x44f   :  { %2789 = vmatpush1.bf16.msra.mxu0 %v6071_v16  ;;  %v6208_v16 = vld [vmem:[#allocation8 + $0x33c] ss:$24 sps:$4 sm:$0xff]  }
 0x450   :  { %2790 = vmatprep.subr.bf16.mxu0 %v6076_v20  ;;  %v6203_v20 = vld [vmem:[#allocation8 + $0x330] ss:$24 sps:$4 sm:$0xff]  }
 0x453   :  { %2791 = vmatpush1.bf16.msra.mxu0 %v6074_v63  ;;  %v6206_v63 = vld [vmem:[#allocation8 + $0x338] ss:$24 sps:$4 sm:$0xff]  }
 0x454   :  { %2817 = vmatprep.subr.bf16.mxu0 %v6079_v22  ;;  %v6211_v22 = vld [vmem:[#allocation8 + $0x364] ss:$24 sps:$4 sm:$0xff]  }
 0x456   :  { %2809 = vmatmul.mubr.bf16.vlgmr.msra.gmra.mrb[4].mxu0 %v8734_v23 }
 0x457   :  { %2818 = vmatpush1.bf16.msra.mxu0 %v6077_v17  ;;  %2849 = vmatprep.mubr.bf16.mxu0 %v6793_v55  ;;  %v6095_v55 = vld [vmem:[#allocation7 + $0x130] ss:$24 sps:$4 sm:$0xff]   ;;  %v6214_v17 = vld [vmem:[#allocation8 + $0x36c] ss:$24 sps:$4 sm:$0xff]  }
 0x458   :  { %2819 = vmatprep.subr.bf16.mxu0 %v6082_v32  ;;  %v6209_v32 = vld [vmem:[#allocation8 + $0x360] ss:$24 sps:$4 sm:$0xff]  }
 0x45b   :  { %2820 = vmatpush1.bf16.msra.mxu0 %v6080_v62  ;;  %v6212_v62 = vld [vmem:[#allocation8 + $0x368] ss:$24 sps:$4 sm:$0xff]  }
 0x45c   :  { %2821 = vmatprep.subr.bf16.mxu0 %v6085_v29  ;;  %v6217_v29 = vld [vmem:[#allocation8 + $0x394] ss:$24 sps:$4 sm:$0xff]  }
 0x45f   :  { %2822 = vmatpush1.bf16.msra.mxu0 %v6083_v28  ;;  %v6220_v28 = vld [vmem:[#allocation8 + $0x39c] ss:$24 sps:$4 sm:$0xff]  }
 0x460   :  { %2823 = vmatprep.subr.bf16.mxu0 %v6088_v38  ;;  %v6215_v38 = vld [vmem:[#allocation8 + $0x390] ss:$24 sps:$4 sm:$0xff]  }
 0x463   :  { %2824 = vmatpush1.bf16.msra.mxu0 %v6086_v12  ;;  %v6218_v12 = vld [vmem:[#allocation8 + $0x398] ss:$24 sps:$4 sm:$0xff]  }
 0x464   :  { %2825 = vmatprep.subr.bf16.mxu0 %v6091_v48  ;;  %v6223_v48 = vld [vmem:[#allocation8 + $0x3c4] ss:$24 sps:$4 sm:$0xff]  }
 0x467   :  { %2826 = vmatpush1.bf16.msra.mxu0 %v6089_v19  ;;  %v6226_v19 = vld [vmem:[#allocation8 + $0x3cc] ss:$24 sps:$4 sm:$0xff]  }
 0x468   :  { %2827 = vmatprep.subr.bf16.mxu0 %v6094_v50  ;;  %v6221_v50 = vld [vmem:[#allocation8 + $0x3c0] ss:$24 sps:$4 sm:$0xff]  }
 0x46b   :  { %2828 = vmatpush1.bf16.msra.mxu0 %v6092_v2  ;;  %v6224_v2 = vld [vmem:[#allocation8 + $0x3c8] ss:$24 sps:$4 sm:$0xff]  }
 0x46c   :  { %2829 = vmatprep.subr.bf16.mxu0 %v6097_v40  ;;  %v6229_v40 = vld [vmem:[#allocation8 + $0x3f4] ss:$24 sps:$4 sm:$0xff]  }
 0x46f   :  { %2830 = vmatpush1.bf16.msra.mxu0 %v6095_v55  ;;  %v6232_v55 = vld [vmem:[#allocation8 + $0x3fc] ss:$24 sps:$4 sm:$0xff]  }
 0x470   :  { %2831 = vmatprep.subr.bf16.mxu0 %v6100_v5  ;;  %v6227_v5 = vld [vmem:[#allocation8 + $0x3f0] ss:$24 sps:$4 sm:$0xff]  }
 0x473   :  { %2832 = vmatpush1.bf16.msra.mxu0 %v6098_v15  ;;  %v6230_v15 = vld [vmem:[#allocation8 + $0x3f8] ss:$24 sps:$4 sm:$0xff]  }
 0x474   :  { %4747 = vmatprep.subr.bf16.mxu0 %v6105_v33  ;;  %v6235_v33 = vld [vmem:[#allocation8 + $0x424] ss:$24 sps:$4 sm:$0xff]  }
 0x476   :  { %2850 = vmatmul.mubr.bf16.vlgmr.msra.gmra.mrb[8].mxu0 %v8734_v23  ;;  %v6195_v23 = vld [vmem:[#allocation8 + $0x2dc] ss:$24 sps:$4 sm:$0xff]  }
 0x477   :  { %4748 = vmatpush1.bf16.msra.mxu0 %v6103_v25  ;;  %v6238_v25 = vld [vmem:[#allocation8 + $0x42c] ss:$24 sps:$4 sm:$0xff]  }
 0x478   :  { %4749 = vmatprep.subr.bf16.mxu0 %v6111_v34  ;;  %v6233_v34 = vld [vmem:[#allocation8 + $0x420] ss:$24 sps:$4 sm:$0xff]  }
 0x47b   :  { %4750 = vmatpush1.bf16.msra.mxu0 %v6109_v6  ;;  %v6236_v6 = vld [vmem:[#allocation8 + $0x428] ss:$24 sps:$4 sm:$0xff]  }
 0x47c   :  { %4751 = vmatprep.subr.bf16.mxu0 %v6117_v14  ;;  %v6241_v14 = vld [vmem:[#allocation8 + $0x454] ss:$24 sps:$4 sm:$0xff]  }
 0x47f   :  { %4752 = vmatpush1.bf16.msra.mxu0 %v6115_v26  ;;  %v6244_v26 = vld [vmem:[#allocation8 + $0x45c] ss:$24 sps:$4 sm:$0xff]  }
 0x480   :  { %4753 = vmatprep.subr.bf16.mxu0 %v6123_v56  ;;  %v6239_v56 = vld [vmem:[#allocation8 + $0x450] ss:$24 sps:$4 sm:$0xff]  }
 0x483   :  { %4754 = vmatpush1.bf16.msra.mxu0 %v6121_v24  ;;  %v6242_v24 = vld [vmem:[#allocation8 + $0x458] ss:$24 sps:$4 sm:$0xff]  }
 0x484   :  { %4755 = vmatprep.subr.bf16.mxu0 %v6129_v58  ;;  %v6247_v58 = vld [vmem:[#allocation8 + $0x484] ss:$24 sps:$4 sm:$0xff]  }
 0x487   :  { %4756 = vmatpush1.bf16.msra.mxu0 %v6127_v36  ;;  %v6250_v36 = vld [vmem:[#allocation8 + $0x48c] ss:$24 sps:$4 sm:$0xff]  }
 0x488   :  { %4757 = vmatprep.subr.bf16.mxu0 %v6135_v18 }
 0x48b   :  { %4758 = vmatpush1.bf16.msra.mxu0 %v6133_v45 }
 0x48c   :  { %4759 = vmatprep.subr.bf16.mxu0 %v6141_v0 }
 0x48f   :  { %4760 = vmatpush1.bf16.msra.mxu0 %v6139_v59  ;;  %v6248_v59 = vld [vmem:[#allocation8 + $0x488] ss:$24 sps:$4 sm:$0xff]  }
 0x490   :  { %4761 = vmatprep.subr.bf16.mxu0 %v6147_v9 }
 0x493   :  { %4762 = vmatpush1.bf16.msra.mxu0 %v6145_v30  ;;  %v6256_v30 = vld [vmem:[#allocation8 + $0x4bc] ss:$24 sps:$4 sm:$0xff]  }
 0x494   :  { %4763 = vmatprep.subr.bf16.mxu0 %v6153_v39  ;;  %v6251_v39 = vld [vmem:[#allocation8 + $0x4b0] ss:$24 sps:$4 sm:$0xff]  }
 0x497   :  { %4764 = vmatpush1.bf16.msra.mxu0 %v6151_v42  ;;  %v6254_v42 = vld [vmem:[#allocation8 + $0x4b8] ss:$24 sps:$4 sm:$0xff]  }
 0x498   :  { %4765 = vmatprep.subr.bf16.mxu0 %v6159_v52  ;;  %v6259_v52 = vld [vmem:[#allocation8 + $0x4e4] ss:$24 sps:$4 sm:$0xff]  }
 0x49b   :  { %4766 = vmatpush1.bf16.msra.mxu0 %v6157_v61  ;;  %v6262_v61 = vld [vmem:[#allocation8 + $0x4ec] ss:$24 sps:$4 sm:$0xff]  }
 0x49c   :  { %4767 = vmatprep.subr.bf16.mxu0 %v6165_v46  ;;  %v6257_v46 = vld [vmem:[#allocation8 + $0x4e0] ss:$24 sps:$4 sm:$0xff]  }
 0x49f   :  { %4768 = vmatpush1.bf16.msra.mxu0 %v6163_v57  ;;  %v6260_v57 = vld [vmem:[#allocation8 + $0x4e8] ss:$24 sps:$4 sm:$0xff]  }
 0x4a0   :  { %4769 = vmatprep.subr.bf16.mxu0 %v6171_v7  ;;  %v6265_v7 = vld [vmem:[#allocation8 + $0x514] ss:$24 sps:$4 sm:$0xff]  }
 0x4a3   :  { %4770 = vmatpush1.bf16.msra.mxu0 %v6169_v44  ;;  %v6268_v44 = vld [vmem:[#allocation8 + $0x51c] ss:$24 sps:$4 sm:$0xff]  }
 0x4a4   :  { %4771 = vmatprep.subr.bf16.mxu0 %v6177_v3  ;;  %v6263_v3 = vld [vmem:[#allocation8 + $0x510] ss:$24 sps:$4 sm:$0xff]  }
 0x4a7   :  { %4772 = vmatpush1.bf16.msra.mxu0 %v6175_v31  ;;  %v6266_v31 = vld [vmem:[#allocation8 + $0x518] ss:$24 sps:$4 sm:$0xff]  }
 0x4a8   :  { %4773 = vmatprep.subr.bf16.mxu0 %v6183_v21  ;;  %v6271_v21 = vld [vmem:[#allocation8 + $0x544] ss:$24 sps:$4 sm:$0xff]  }
 0x4ab   :  { %4774 = vmatpush1.bf16.msra.mxu0 %v6181_v60  ;;  %v6274_v60 = vld [vmem:[#allocation8 + $0x54c] ss:$24 sps:$4 sm:$0xff]  }
 0x4ac   :  { %4775 = vmatprep.subr.bf16.mxu0 %v6189_v35  ;;  %v6269_v35 = vld [vmem:[#allocation8 + $0x540] ss:$24 sps:$4 sm:$0xff]  }
 0x4af   :  { %4776 = vmatpush1.bf16.msra.mxu0 %v6187_v54  ;;  %v6272_v54 = vld [vmem:[#allocation8 + $0x548] ss:$24 sps:$4 sm:$0xff]  }
 0x4b0   :  { %4777 = vmatprep.subr.bf16.mxu0 %v6195_v23  ;;  %v6277_v23 = vld [vmem:[#allocation8 + $0x574] ss:$24 sps:$4 sm:$0xff]  }
 0x4b3   :  { %4778 = vmatpush1.bf16.msra.mxu0 %v6193_v51  ;;  %v6280_v51 = vld [vmem:[#allocation8 + $0x57c] ss:$24 sps:$4 sm:$0xff]  }
 0x4b4   :  { %4788 = vmatprep.subr.bf16.mxu0 %v6202_v37  ;;  %v6275_v37 = vld [vmem:[#allocation8 + $0x570] ss:$24 sps:$4 sm:$0xff]  }
 0x509   :  { %v2769_v41 = vpop.f32.mrb[0].mxu0 }
 0x50a   :  { %v2771_v47 = vpop.f32.mrb[1].mxu0  ;;  %v8743_v10 = vpack.c.bf16 %v2769_v41, %v2769_v41  ;;  %v6278_v41 = vld [vmem:[#allocation8 + $0x578] ss:$24 sps:$4 sm:$0xff]  }
 0x50b   :  { %v8741_v8 = vpack.c.bf16 %v2771_v47, %v2771_v47  ;;  %v2773_v13 = vpop.f32.mrb[2].mxu0  ;;  %v6283_v47 = vld [vmem:[#allocation8 + $0x5a4] ss:$24 sps:$4 sm:$0xff]  }
 0x50c   :  { %v2774_v27 = vpop.f32.mrb[3].mxu0  ;;  %v6286_v13 = vld [vmem:[#allocation8 + $0x5ac] ss:$24 sps:$4 sm:$0xff]  }
 0x50d   :  { %4656 = vmatprep.mubr.bf16.mxu1 %v8741_v8  ;;  %4779 = vmatprep.mubr.bf16.mxu0 %v8741_v8  ;;  %v6289_v27 = vld [vmem:[#allocation8 + $0x5d4] ss:$24 sps:$4 sm:$0xff]  }
 0x50e   :  { %4657 = vmatmul.mubr.bf16.vlgmr.msra.gmra.mrb[0].mxu1 %v8743_v10  ;;  %4780 = vmatmul.mubr.bf16.vlgmr.msra.gmra.mrb[12].mxu0 %v8743_v10 }
 0x50f   :  { %4666 = vmatpush1.bf16.msra.mxu1 %v6197_v4  ;;  %4789 = vmatpush1.bf16.msra.mxu0 %v6200_v11  ;;  %v6281_v4 = vld [vmem:[#allocation8 + $0x5a0] ss:$24 sps:$4 sm:$0xff]  }
 0x510   :  { %4667 = vmatprep.subr.bf16.mxu1 %v6205_v49  ;;  %4790 = vmatprep.subr.bf16.mxu0 %v6208_v16  ;;  %v6284_v11 = vld [vmem:[#allocation8 + $0x5a8] ss:$24 sps:$4 sm:$0xff]   ;;  %v6292_v49 = vld [vmem:[#allocation8 + $0x5dc] ss:$24 sps:$4 sm:$0xff]  }
 0x511   :  { %v6287_v16 = vld [vmem:[#allocation8 + $0x5d0] ss:$24 sps:$4 sm:$0xff]  }
 0x513   :  { %4668 = vmatpush1.bf16.msra.mxu1 %v6203_v20  ;;  %4791 = vmatpush1.bf16.msra.mxu0 %v6206_v63  ;;  %v6290_v20 = vld [vmem:[#allocation8 + $0x5d8] ss:$24 sps:$4 sm:$0xff]   ;;  %v6295_v63 = vld [vmem:[#allocation8 + $0x604] ss:$24 sps:$4 sm:$0xff]  }
 0x514   :  { %4669 = vmatprep.subr.bf16.mxu1 %v6211_v22  ;;  %4792 = vmatprep.subr.bf16.mxu0 %v6214_v17  ;;  %v6298_v22 = vld [vmem:[#allocation8 + $0x60c] ss:$24 sps:$4 sm:$0xff]  }
 0x517   :  { %4670 = vmatpush1.bf16.msra.mxu1 %v6209_v32  ;;  %4793 = vmatpush1.bf16.msra.mxu0 %v6212_v62 }
 0x518   :  { %4671 = vmatprep.subr.bf16.mxu1 %v6217_v29  ;;  %4794 = vmatprep.subr.bf16.mxu0 %v6220_v28  ;;  %v6293_v29 = vld [vmem:[#allocation8 + $0x600] ss:$24 sps:$4 sm:$0xff]  }
 0x51b   :  { %4672 = vmatpush1.bf16.msra.mxu1 %v6215_v38  ;;  %4795 = vmatpush1.bf16.msra.mxu0 %v6218_v12  ;;  %v6296_v12 = vld [vmem:[#allocation8 + $0x608] ss:$24 sps:$4 sm:$0xff]  }
 0x51c   :  { %4673 = vmatprep.subr.bf16.mxu1 %v6223_v48  ;;  %4796 = vmatprep.subr.bf16.mxu0 %v6226_v19  ;;  %v6301_v19 = vld [vmem:[#allocation8 + $0x634] ss:$24 sps:$4 sm:$0xff]  }
 0x51f   :  { %4674 = vmatpush1.bf16.msra.mxu1 %v6221_v50  ;;  %4797 = vmatpush1.bf16.msra.mxu0 %v6224_v2  ;;  %v6304_v50 = vld [vmem:[#allocation8 + $0x63c] ss:$24 sps:$4 sm:$0xff]   ;;  %v6299_v2 = vld [vmem:[#allocation8 + $0x630] ss:$24 sps:$4 sm:$0xff]  }
 0x520   :  { %4675 = vmatprep.subr.bf16.mxu1 %v6229_v40  ;;  %4798 = vmatprep.subr.bf16.mxu0 %v6232_v55  ;;  %v6302_v40 = vld [vmem:[#allocation8 + $0x638] ss:$24 sps:$4 sm:$0xff]   ;;  %v6307_v55 = vld [vmem:[#allocation8 + $0x664] ss:$24 sps:$4 sm:$0xff]  }
 0x523   :  { %4676 = vmatpush1.bf16.msra.mxu1 %v6227_v5  ;;  %4799 = vmatpush1.bf16.msra.mxu0 %v6230_v15  ;;  %v6310_v5 = vld [vmem:[#allocation8 + $0x66c] ss:$24 sps:$4 sm:$0xff]   ;;  %v6305_v15 = vld [vmem:[#allocation8 + $0x660] ss:$24 sps:$4 sm:$0xff]  }
 0x524   :  { %4677 = vmatprep.subr.bf16.mxu1 %v6235_v33  ;;  %4800 = vmatprep.subr.bf16.mxu0 %v6238_v25  ;;  %v6308_v33 = vld [vmem:[#allocation8 + $0x668] ss:$24 sps:$4 sm:$0xff]   ;;  %v6313_v25 = vld [vmem:[#allocation8 + $0x694] ss:$24 sps:$4 sm:$0xff]  }
 0x527   :  { %4678 = vmatpush1.bf16.msra.mxu1 %v6233_v34  ;;  %4801 = vmatpush1.bf16.msra.mxu0 %v6236_v6  ;;  %v6316_v34 = vld [vmem:[#allocation8 + $0x69c] ss:$24 sps:$4 sm:$0xff]   ;;  %v6311_v6 = vld [vmem:[#allocation8 + $0x690] ss:$24 sps:$4 sm:$0xff]  }
 0x528   :  { %4679 = vmatprep.subr.bf16.mxu1 %v6241_v14  ;;  %4802 = vmatprep.subr.bf16.mxu0 %v6244_v26  ;;  %v6314_v14 = vld [vmem:[#allocation8 + $0x698] ss:$24 sps:$4 sm:$0xff]   ;;  %v6319_v26 = vld [vmem:[#allocation8 + $0x6c4] ss:$24 sps:$4 sm:$0xff]  }
 0x529   :  { %v8749_v18 = vpop.f32.mrb[4].mxu0 }
 0x52a   :  { %v2812_v45 = vpop.f32.mrb[5].mxu0  ;;  %v8759_v28 = vpack.c.bf16 %v8749_v18, %v8749_v18  ;;  %v6328_v18 = vld [vmem:[#allocation8 + $0x6fc] ss:$24 sps:$4 sm:$0xff]  }
 0x52b   :  { %v8751_v0 = vpack.c.bf16 %v2812_v45, %v2812_v45  ;;  %v2814_v1 = vpop.f32.mrb[6].mxu0  ;;  %4680 = vmatpush1.bf16.msra.mxu1 %v6239_v56  ;;  %4803 = vmatpush1.bf16.msra.mxu0 %v6242_v24  ;;  %v6322_v56 = vld [vmem:[#allocation8 + $0x6cc] ss:$24 sps:$4 sm:$0xff]   ;;  %v6317_v24 = vld [vmem:[#allocation8 + $0x6c0] ss:$24 sps:$4 sm:$0xff]  }
 0x52c   :  { %v2815_v9 = vpop.f32.mrb[7].mxu0  ;;  %4681 = vmatprep.subr.bf16.mxu1 %v6247_v58  ;;  %4804 = vmatprep.subr.bf16.mxu0 %v6250_v36  ;;  %v6320_v58 = vld [vmem:[#allocation8 + $0x6c8] ss:$24 sps:$4 sm:$0xff]   ;;  %v6325_v36 = vld [vmem:[#allocation8 + $0x6f4] ss:$24 sps:$4 sm:$0xff]  }
 0x52d   :  { %4697 = vmatprep.mubr.bf16.mxu1 %v8751_v0  ;;  %4820 = vmatprep.mubr.bf16.mxu0 %v8751_v0  ;;  %v6323_v45 = vld [vmem:[#allocation8 + $0x6f0] ss:$24 sps:$4 sm:$0xff]   ;;  %v6329_v9 = vld [vmem:[#allocation8 + $0x720] ss:$24 sps:$4 sm:$0xff]  }
 0x52e   :  { %v6326_v1 = vld [vmem:[#allocation8 + $0x6f8] ss:$24 sps:$4 sm:$0xff]  }
 0x52f   :  { %4682 = vmatpush1.bf16.msra.mxu1 %v6245_v53  ;;  %4805 = vmatpush1.bf16.msra.mxu0 %v6248_v59  ;;  %v6331_v53 = vld [vmem:[#allocation8 + $0x724] ss:$24 sps:$4 sm:$0xff]  }
 0x530   :  { %4683 = vmatprep.subr.bf16.mxu1 %v6253_v43  ;;  %4806 = vmatprep.subr.bf16.mxu0 %v6256_v30  ;;  %v6334_v59 = vld [vmem:[#allocation8 + $0x72c] ss:$24 sps:$4 sm:$0xff]   ;;  %v6332_v43 = vld [vmem:[#allocation8 + $0x728] ss:$24 sps:$4 sm:$0xff]  }
 0x531   :  { %v6337_v30 = vld [vmem:[#allocation8 + $0x754] ss:$24 sps:$4 sm:$0xff]  }
 0x533   :  { %4684 = vmatpush1.bf16.msra.mxu1 %v6251_v39  ;;  %4807 = vmatpush1.bf16.msra.mxu0 %v6254_v42  ;;  %v6340_v39 = vld [vmem:[#allocation8 + $0x75c] ss:$24 sps:$4 sm:$0xff]   ;;  %v6335_v42 = vld [vmem:[#allocation8 + $0x750] ss:$24 sps:$4 sm:$0xff]  }
 0x534   :  { %4685 = vmatprep.subr.bf16.mxu1 %v6259_v52  ;;  %4808 = vmatprep.subr.bf16.mxu0 %v6262_v61  ;;  %v6338_v52 = vld [vmem:[#allocation8 + $0x758] ss:$24 sps:$4 sm:$0xff]   ;;  %v6343_v61 = vld [vmem:[#allocation8 + $0x784] ss:$24 sps:$4 sm:$0xff]  }
 0x537   :  { %4686 = vmatpush1.bf16.msra.mxu1 %v6257_v46  ;;  %4809 = vmatpush1.bf16.msra.mxu0 %v6260_v57  ;;  %v6346_v46 = vld [vmem:[#allocation8 + $0x78c] ss:$24 sps:$4 sm:$0xff]   ;;  %v6341_v57 = vld [vmem:[#allocation8 + $0x780] ss:$24 sps:$4 sm:$0xff]  }
 0x538   :  { %4687 = vmatprep.subr.bf16.mxu1 %v6265_v7  ;;  %4810 = vmatprep.subr.bf16.mxu0 %v6268_v44  ;;  %v6344_v7 = vld [vmem:[#allocation8 + $0x788] ss:$24 sps:$4 sm:$0xff]   ;;  %v6349_v44 = vld [vmem:[#allocation8 + $0x7b4] ss:$24 sps:$4 sm:$0xff]  }
 0x53b   :  { %4688 = vmatpush1.bf16.msra.mxu1 %v6263_v3  ;;  %4811 = vmatpush1.bf16.msra.mxu0 %v6266_v31  ;;  %v6352_v3 = vld [vmem:[#allocation8 + $0x7bc] ss:$24 sps:$4 sm:$0xff]   ;;  %v6347_v31 = vld [vmem:[#allocation8 + $0x7b0] ss:$24 sps:$4 sm:$0xff]  }
 0x53c   :  { %4689 = vmatprep.subr.bf16.mxu1 %v6271_v21  ;;  %4812 = vmatprep.subr.bf16.mxu0 %v6274_v60  ;;  %v6350_v21 = vld [vmem:[#allocation8 + $0x7b8] ss:$24 sps:$4 sm:$0xff]   ;;  %v6355_v60 = vld [vmem:[#allocation8 + $0x7e4] ss:$24 sps:$4 sm:$0xff]  }
 0x53f   :  { %4690 = vmatpush1.bf16.msra.mxu1 %v6269_v35  ;;  %4813 = vmatpush1.bf16.msra.mxu0 %v6272_v54  ;;  %v6358_v35 = vld [vmem:[#allocation8 + $0x7ec] ss:$24 sps:$4 sm:$0xff]   ;;  %v6353_v54 = vld [vmem:[#allocation8 + $0x7e0] ss:$24 sps:$4 sm:$0xff]  }
 0x540   :  { %4691 = vmatprep.subr.bf16.mxu1 %v6277_v23  ;;  %4814 = vmatprep.subr.bf16.mxu0 %v6280_v51  ;;  %v6356_v23 = vld [vmem:[#allocation8 + $0x7e8] ss:$24 sps:$4 sm:$0xff]   ;;  %v6361_v51 = vld [vmem:[#allocation8 + $0x814] ss:$24 sps:$4 sm:$0xff]  }
 0x543   :  { %4692 = vmatpush1.bf16.msra.mxu1 %v6275_v37  ;;  %4815 = vmatpush1.bf16.msra.mxu0 %v6278_v41  ;;  %v6364_v37 = vld [vmem:[#allocation8 + $0x81c] ss:$24 sps:$4 sm:$0xff]   ;;  %v6359_v41 = vld [vmem:[#allocation8 + $0x810] ss:$24 sps:$4 sm:$0xff]  }
 0x544   :  { %4693 = vmatprep.subr.bf16.mxu1 %v6283_v47  ;;  %4816 = vmatprep.subr.bf16.mxu0 %v6286_v13  ;;  %v6362_v47 = vld [vmem:[#allocation8 + $0x818] ss:$24 sps:$4 sm:$0xff]   ;;  %v6367_v13 = vld [vmem:[#allocation8 + $0x844] ss:$24 sps:$4 sm:$0xff]  }
 0x547   :  { %4694 = vmatpush1.bf16.msra.mxu1 %v6281_v4  ;;  %4817 = vmatpush1.bf16.msra.mxu0 %v6284_v11  ;;  %v6370_v4 = vld [vmem:[#allocation8 + $0x84c] ss:$24 sps:$4 sm:$0xff]   ;;  %v6365_v11 = vld [vmem:[#allocation8 + $0x840] ss:$24 sps:$4 sm:$0xff]  }
 0x548   :  { %4695 = vmatprep.subr.bf16.mxu1 %v6289_v27  ;;  %4818 = vmatprep.subr.bf16.mxu0 %v6292_v49  ;;  %v6368_v27 = vld [vmem:[#allocation8 + $0x848] ss:$24 sps:$4 sm:$0xff]   ;;  %v6373_v49 = vld [vmem:[#allocation8 + $0x874] ss:$24 sps:$4 sm:$0xff]  }
 0x549   :  { %v8755_v17 = vpop.f32.mrb[8].mxu0 }
 0x54a   :  { %v2853_v32 = vpop.f32.mrb[9].mxu0 }
 0x54b   :  { %v2855_v62 = vpop.f32.mrb[10].mxu0  ;;  %4696 = vmatpush1.bf16.msra.mxu1 %v6287_v16  ;;  %4819 = vmatpush1.bf16.msra.mxu0 %v6290_v20  ;;  %v8761_v48 = vpack.c.bf16 %v2853_v32, %v2853_v32  ;;  %v6376_v16 = vld [vmem:[#allocation8 + $0x87c] ss:$24 sps:$4 sm:$0xff]   ;;  %v6371_v20 = vld [vmem:[#allocation8 + $0x870] ss:$24 sps:$4 sm:$0xff]  }
 0x54c   :  { %v2856_v38 = vpop.f32.mrb[11].mxu0  ;;  %4706 = vmatprep.subr.bf16.mxu1 %v6295_v63  ;;  %4829 = vmatprep.subr.bf16.mxu0 %v6298_v22  ;;  %v6374_v63 = vld [vmem:[#allocation8 + $0x878] ss:$24 sps:$4 sm:$0xff]   ;;  %v6379_v22 = vld [vmem:[#allocation8 + $0x8a4] ss:$24 sps:$4 sm:$0xff]  }
 0x54d   :  { %v6382_v32 = vld [vmem:[#allocation8 + $0x8ac] ss:$24 sps:$4 sm:$0xff]   ;;  %v6377_v62 = vld [vmem:[#allocation8 + $0x8a0] ss:$24 sps:$4 sm:$0xff]  }
 0x54e   :  { %4698 = vmatmul.mubr.bf16.vlgmr.msra.gmra.mrb[0].mxu1 %v8759_v28  ;;  %4821 = vmatmul.mubr.bf16.vlgmr.msra.gmra.mrb[12].mxu0 %v8759_v28  ;;  %v6385_v38 = vld [vmem:[#allocation8 + $0x8d4] ss:$24 sps:$4 sm:$0xff]  }
 0x54f   :  { %4707 = vmatpush1.bf16.msra.mxu1 %v6293_v29  ;;  %4738 = vmatprep.mubr.bf16.mxu1 %v8761_v48  ;;  %v6380_v29 = vld [vmem:[#allocation8 + $0x8a8] ss:$24 sps:$4 sm:$0xff]  }
 0x550   :  { %4830 = vmatpush1.bf16.msra.mxu0 %v6296_v12  ;;  %4861 = vmatprep.mubr.bf16.mxu0 %v8761_v48  ;;  %v6388_v12 = vld [vmem:[#allocation8 + $0x8dc] ss:$24 sps:$4 sm:$0xff]  }
 0x551   :  { %4708 = vmatprep.subr.bf16.mxu1 %v6301_v19  ;;  %4831 = vmatprep.subr.bf16.mxu0 %v6304_v50  ;;  %v6383_v19 = vld [vmem:[#allocation8 + $0x8d0] ss:$24 sps:$4 sm:$0xff]  }
 0x552   :  { %v6386_v50 = vld [vmem:[#allocation8 + $0x8d8] ss:$24 sps:$4 sm:$0xff]  }
 0x553   :  { %4709 = vmatpush1.bf16.msra.mxu1 %v6299_v2  ;;  %v6391_v2 = vld [vmem:[#allocation8 + $0x14] ss:$24 sps:$4 sm:$0xff]  }
 0x554   :  { %4832 = vmatpush1.bf16.msra.mxu0 %v6302_v40  ;;  %4710 = vmatprep.subr.bf16.mxu1 %v6307_v55  ;;  %v6389_v40 = vld [vmem:[#allocation8 + $0x10] ss:$24 sps:$4 sm:$0xff]   ;;  %v8769_v55 = vpack.c.bf16 %v8755_v17, %v8755_v17  ;;  %v6398_v17 = vld [vmem:[#allocation8 + $0xa0] ss:$24 sps:$4 sm:$0xff]  }
 0x555   :  { %4833 = vmatprep.subr.bf16.mxu0 %v6310_v5  ;;  %v6394_v5 = vld [vmem:[#allocation8 + $0x44] ss:$24 sps:$4 sm:$0xff]  }
 0x557   :  { %4711 = vmatpush1.bf16.msra.mxu1 %v6305_v15  ;;  %v6392_v15 = vld [vmem:[#allocation8 + $0x40] ss:$24 sps:$4 sm:$0xff]  }
 0x558   :  { %4834 = vmatpush1.bf16.msra.mxu0 %v6308_v33  ;;  %4712 = vmatprep.subr.bf16.mxu1 %v6313_v25  ;;  %v6397_v33 = vld [vmem:[#allocation8 + $0x74] ss:$24 sps:$4 sm:$0xff]   ;;  %v6395_v25 = vld [vmem:[#allocation8 + $0x70] ss:$24 sps:$4 sm:$0xff]  }
 0x559   :  { %4835 = vmatprep.subr.bf16.mxu0 %v6316_v34  ;;  %v6400_v34 = vld [vmem:[#allocation8 + $0xa4] ss:$24 sps:$4 sm:$0xff]  }
 0x55b   :  { %4713 = vmatpush1.bf16.msra.mxu1 %v6311_v6  ;;  %v6403_v6 = vld [vmem:[#allocation8 + $0xd4] ss:$24 sps:$4 sm:$0xff]  }
 0x55c   :  { %4836 = vmatpush1.bf16.msra.mxu0 %v6314_v14  ;;  %4714 = vmatprep.subr.bf16.mxu1 %v6319_v26  ;;  %v6401_v14 = vld [vmem:[#allocation8 + $0xd0] ss:$24 sps:$4 sm:$0xff]   ;;  %v6406_v26 = vld [vmem:[#allocation8 + $0x104] ss:$24 sps:$4 sm:$0xff]  }
 0x55d   :  { %4837 = vmatprep.subr.bf16.mxu0 %v6322_v56  ;;  %v6404_v56 = vld [vmem:[#allocation8 + $0x100] ss:$24 sps:$4 sm:$0xff]  }
 0x55f   :  { %4715 = vmatpush1.bf16.msra.mxu1 %v6317_v24  ;;  %v6409_v24 = vld [vmem:[#allocation8 + $0x134] ss:$24 sps:$4 sm:$0xff]  }
 0x560   :  { %4838 = vmatpush1.bf16.msra.mxu0 %v6320_v58  ;;  %4716 = vmatprep.subr.bf16.mxu1 %v6325_v36  ;;  %v6412_v58 = vld [vmem:[#allocation8 + $0x164] ss:$24 sps:$4 sm:$0xff]   ;;  %v6410_v36 = vld [vmem:[#allocation8 + $0x160] ss:$24 sps:$4 sm:$0xff]  }
 0x561   :  { %4839 = vmatprep.subr.bf16.mxu0 %v6328_v18  ;;  %v6415_v18 = vld [vmem:[#allocation8 + $0x194] ss:$24 sps:$4 sm:$0xff]  }
 0x563   :  { %4717 = vmatpush1.bf16.msra.mxu1 %v6323_v45  ;;  %v6413_v45 = vld [vmem:[#allocation8 + $0x190] ss:$24 sps:$4 sm:$0xff]  }
 0x564   :  { %4840 = vmatpush1.bf16.msra.mxu0 %v6326_v1  ;;  %4718 = vmatprep.subr.bf16.mxu1 %v6331_v53  ;;  %v6418_v1 = vld [vmem:[#allocation8 + $0x1c4] ss:$24 sps:$4 sm:$0xff]   ;;  %v6416_v53 = vld [vmem:[#allocation8 + $0x1c0] ss:$24 sps:$4 sm:$0xff]  }
 0x565   :  { %4841 = vmatprep.subr.bf16.mxu0 %v6334_v59  ;;  %v6421_v59 = vld [vmem:[#allocation8 + $0x1f4] ss:$24 sps:$4 sm:$0xff]  }
 0x567   :  { %4719 = vmatpush1.bf16.msra.mxu1 %v6329_v9  ;;  %v6419_v9 = vld [vmem:[#allocation8 + $0x1f0] ss:$24 sps:$4 sm:$0xff]  }
 0x568   :  { %4842 = vmatpush1.bf16.msra.mxu0 %v6332_v43  ;;  %4720 = vmatprep.subr.bf16.mxu1 %v6337_v30  ;;  %v6424_v43 = vld [vmem:[#allocation8 + $0x224] ss:$24 sps:$4 sm:$0xff]   ;;  %v6422_v30 = vld [vmem:[#allocation8 + $0x220] ss:$24 sps:$4 sm:$0xff]  }
 0x569   :  { %4843 = vmatprep.subr.bf16.mxu0 %v6340_v39  ;;  %v6427_v39 = vld [vmem:[#allocation8 + $0x254] ss:$24 sps:$4 sm:$0xff]  }
 0x56b   :  { %4721 = vmatpush1.bf16.msra.mxu1 %v6335_v42  ;;  %v6425_v42 = vld [vmem:[#allocation8 + $0x250] ss:$24 sps:$4 sm:$0xff]  }
 0x56c   :  { %4844 = vmatpush1.bf16.msra.mxu0 %v6338_v52  ;;  %4722 = vmatprep.subr.bf16.mxu1 %v6343_v61  ;;  %v6430_v52 = vld [vmem:[#allocation8 + $0x284] ss:$24 sps:$4 sm:$0xff]   ;;  %v6428_v61 = vld [vmem:[#allocation8 + $0x280] ss:$24 sps:$4 sm:$0xff]  }
 0x56d   :  { %4845 = vmatprep.subr.bf16.mxu0 %v6346_v46  ;;  %v6433_v46 = vld [vmem:[#allocation8 + $0x2b4] ss:$24 sps:$4 sm:$0xff]  }
 0x56f   :  { %4723 = vmatpush1.bf16.msra.mxu1 %v6341_v57  ;;  %v6431_v57 = vld [vmem:[#allocation8 + $0x2b0] ss:$24 sps:$4 sm:$0xff]  }
 0x570   :  { %4846 = vmatpush1.bf16.msra.mxu0 %v6344_v7  ;;  %4724 = vmatprep.subr.bf16.mxu1 %v6349_v44  ;;  %v6436_v7 = vld [vmem:[#allocation8 + $0x2e4] ss:$24 sps:$4 sm:$0xff]   ;;  %v6434_v44 = vld [vmem:[#allocation8 + $0x2e0] ss:$24 sps:$4 sm:$0xff]  }
 0x571   :  { %4847 = vmatprep.subr.bf16.mxu0 %v6352_v3  ;;  %v6439_v3 = vld [vmem:[#allocation8 + $0x314] ss:$24 sps:$4 sm:$0xff]  }
 0x573   :  { %4725 = vmatpush1.bf16.msra.mxu1 %v6347_v31  ;;  %v6437_v31 = vld [vmem:[#allocation8 + $0x310] ss:$24 sps:$4 sm:$0xff]  }
 0x574   :  { %4848 = vmatpush1.bf16.msra.mxu0 %v6350_v21  ;;  %4726 = vmatprep.subr.bf16.mxu1 %v6355_v60  ;;  %v6442_v21 = vld [vmem:[#allocation8 + $0x344] ss:$24 sps:$4 sm:$0xff]  }
 0x575   :  { %4849 = vmatprep.subr.bf16.mxu0 %v6358_v35  ;;  %v6533_v60 = vld [vmem:[#allocation11 + $0x40] sm:$0xff]  }
 0x576   :  { %v6534_v35 = vld [vmem:[#allocation11] sm:$0xff]  }
 0x577   :  { %4727 = vmatpush1.bf16.msra.mxu1 %v6353_v54  ;;  %v6535_v54 = vld [vmem:[#allocation11 + $0x48] sm:$0xff]  }
 0x578   :  { %4850 = vmatpush1.bf16.msra.mxu0 %v6356_v23  ;;  %4728 = vmatprep.subr.bf16.mxu1 %v6361_v51  ;;  %v6440_v23 = vld [vmem:[#allocation8 + $0x340] ss:$24 sps:$4 sm:$0xff]   ;;  %v6445_v51 = vld [vmem:[#allocation8 + $0x374] ss:$24 sps:$4 sm:$0xff]  }
 0x579   :  { %4851 = vmatprep.subr.bf16.mxu0 %v6364_v37  ;;  %v6536_v37 = vld [vmem:[#allocation11 + $0x8] sm:$0xff]  }
 0x57b   :  { %4729 = vmatpush1.bf16.msra.mxu1 %v6359_v41  ;;  %v6537_v41 = vld [vmem:[#allocation11 + $0x50] sm:$0xff]  }
 0x57c   :  { %4852 = vmatpush1.bf16.msra.mxu0 %v6362_v47  ;;  %4730 = vmatprep.subr.bf16.mxu1 %v6367_v13  ;;  %v6443_v47 = vld [vmem:[#allocation8 + $0x370] ss:$24 sps:$4 sm:$0xff]   ;;  %v6448_v13 = vld [vmem:[#allocation8 + $0x3a4] ss:$24 sps:$4 sm:$0xff]  }
 0x57d   :  { %4853 = vmatprep.subr.bf16.mxu0 %v6370_v4  ;;  %v6539_v4 = vld [vmem:[#allocation11 + $0x58] sm:$0xff]  }
 0x57f   :  { %4731 = vmatpush1.bf16.msra.mxu1 %v6365_v11  ;;  %v6446_v11 = vld [vmem:[#allocation8 + $0x3a0] ss:$24 sps:$4 sm:$0xff]  }
 0x580   :  { %4854 = vmatpush1.bf16.msra.mxu0 %v6368_v27  ;;  %4732 = vmatprep.subr.bf16.mxu1 %v6373_v49  ;;  %v6540_v27 = vld [vmem:[#allocation11 + $0x18] sm:$0xff]   ;;  %v6449_v49 = vld [vmem:[#allocation8 + $0x3d0] ss:$24 sps:$4 sm:$0xff]  }
 0x581   :  { %4855 = vmatprep.subr.bf16.mxu0 %v6376_v16  ;;  %v6454_v16 = vld [vmem:[#allocation8 + $0x404] ss:$24 sps:$4 sm:$0xff]  }
 0x583   :  { %4733 = vmatpush1.bf16.msra.mxu1 %v6371_v20  ;;  %v6452_v20 = vld [vmem:[#allocation8 + $0x400] ss:$24 sps:$4 sm:$0xff]  }
 0x584   :  { %4856 = vmatpush1.bf16.msra.mxu0 %v6374_v63  ;;  %4734 = vmatprep.subr.bf16.mxu1 %v6379_v22  ;;  %v6457_v63 = vld [vmem:[#allocation8 + $0x434] ss:$24 sps:$4 sm:$0xff]  }
 0x585   :  { %4857 = vmatprep.subr.bf16.mxu0 %v6382_v32  ;;  %v6541_v22 = vld [vmem:[#allocation11 + $0x60] sm:$0xff]  }
 0x586   :  { %v6455_v32 = vld [vmem:[#allocation8 + $0x430] ss:$24 sps:$4 sm:$0xff]  }
 0x587   :  { %4735 = vmatpush1.bf16.msra.mxu1 %v6377_v62  ;;  %v6542_v62 = vld [vmem:[#allocation11 + $0x20] sm:$0xff]  }
 0x588   :  { %4858 = vmatpush1.bf16.msra.mxu0 %v6380_v29  ;;  %4736 = vmatprep.subr.bf16.mxu1 %v6385_v38  ;;  %v6460_v29 = vld [vmem:[#allocation8 + $0x464] ss:$24 sps:$4 sm:$0xff]   ;;  %v6543_v38 = vld [vmem:[#allocation11 + $0x68] sm:$0xff]  }
 0x589   :  { %4859 = vmatprep.subr.bf16.mxu0 %v6388_v12  ;;  %v6458_v12 = vld [vmem:[#allocation8 + $0x460] ss:$24 sps:$4 sm:$0xff]  }
 0x58b   :  { %4737 = vmatpush1.bf16.msra.mxu1 %v6383_v19  ;;  %v6544_v19 = vld [vmem:[#allocation11 + $0x28] sm:$0xff]  }
 0x58c   :  { %4860 = vmatpush1.bf16.msra.mxu0 %v6386_v50  ;;  %4870 = vmatprep.subr.bf16.mxu1 %v6391_v2  ;;  %v6463_v50 = vld [vmem:[#allocation8 + $0x494] ss:$24 sps:$4 sm:$0xff]  }
 0x58d   :  { %5920 = vmatprep.subr.bf16.mxu0 %v6533_v60  ;;  %v6545_v2 = vld [vmem:[#allocation11 + $0x70] sm:$0xff]   ;;  %v6509_v60 = vld [vmem:[#allocation8 + $0x790] ss:$24 sps:$4 sm:$0xff]  }
 0x58e   :  { %4739 = vmatmul.mubr.bf16.vlgmr.msra.gmra.mrb[0].mxu1 %v8769_v55 }
 0x58f   :  { %4862 = vmatmul.mubr.bf16.vlgmr.msra.gmra.mrb[12].mxu0 %v8769_v55  ;;  %4871 = vmatpush1.bf16.msra.mxu1 %v6389_v40  ;;  %v6461_v40 = vld [vmem:[#allocation8 + $0x490] ss:$24 sps:$4 sm:$0xff]  }
 0x590   :  { %4902 = vmatprep.mubr.bf16.mxu1 %v8741_v8  ;;  %4872 = vmatprep.subr.bf16.mxu1 %v6394_v5  ;;  %v6407_v8 = vld [vmem:[#allocation8 + $0x130] ss:$24 sps:$4 sm:$0xff]   ;;  %v6546_v5 = vld [vmem:[#allocation11 + $0x30] sm:$0xff]  }
 0x591   :  { %5921 = vmatpush3.bf16.msra.mxu0 %v6534_v35  ;;  %v6514_v35 = vld [vmem:[#allocation8 + $0x7c4] ss:$24 sps:$4 sm:$0xff]  }
 0x592   :  { %5922 = vmatprep.subr.bf16.mxu0 %v6535_v54  ;;  %v6512_v54 = vld [vmem:[#allocation8 + $0x7c0] ss:$24 sps:$4 sm:$0xff]  }
 0x593   :  { %4873 = vmatpush1.bf16.msra.mxu1 %v6392_v15  ;;  %v6466_v15 = vld [vmem:[#allocation8 + $0x4c4] ss:$24 sps:$4 sm:$0xff]  }
 0x594   :  { %4874 = vmatprep.subr.bf16.mxu1 %v6397_v33  ;;  %v6547_v33 = vld [vmem:[#allocation11 + $0x78] sm:$0xff]  }
 0x595   :  { %5923 = vmatpush3.bf16.msra.mxu0 %v6536_v37  ;;  %v6520_v37 = vld [vmem:[#allocation8 + $0x824] ss:$24 sps:$4 sm:$0xff]  }
 0x596   :  { %5924 = vmatprep.subr.bf16.mxu0 %v6537_v41  ;;  %v6518_v41 = vld [vmem:[#allocation8 + $0x820] ss:$24 sps:$4 sm:$0xff]  }
 0x597   :  { %4875 = vmatpush1.bf16.msra.mxu1 %v6395_v25  ;;  %v6464_v25 = vld [vmem:[#allocation8 + $0x4c0] ss:$24 sps:$4 sm:$0xff]  }
 0x598   :  { %4876 = vmatprep.subr.bf16.mxu1 %v6400_v34  ;;  %v6548_v34 = vld [vmem:[#allocation11 + $0x38] sm:$0xff]  }
 0x59b   :  { %4877 = vmatpush1.bf16.msra.mxu1 %v6398_v17  ;;  %v6469_v17 = vld [vmem:[#allocation8 + $0x4f4] ss:$24 sps:$4 sm:$0xff]  }
 0x59c   :  { %4878 = vmatprep.subr.bf16.mxu1 %v6403_v6  ;;  %v6549_v6 = vld [vmem:[#allocation11 + $0xc0] sm:$0xff]  }
 0x59f   :  { %4879 = vmatpush1.bf16.msra.mxu1 %v6401_v14  ;;  %v6467_v14 = vld [vmem:[#allocation8 + $0x4f0] ss:$24 sps:$4 sm:$0xff]  }
 0x5a0   :  { %4880 = vmatprep.subr.bf16.mxu1 %v6406_v26  ;;  %v6472_v26 = vld [vmem:[#allocation8 + $0x524] ss:$24 sps:$4 sm:$0xff]  }
 0x5a3   :  { %4881 = vmatpush1.bf16.msra.mxu1 %v6404_v56  ;;  %v6470_v56 = vld [vmem:[#allocation8 + $0x520] ss:$24 sps:$4 sm:$0xff]  }
 0x5a4   :  { %4882 = vmatprep.subr.bf16.mxu1 %v6409_v24  ;;  %v6475_v24 = vld [vmem:[#allocation8 + $0x554] ss:$24 sps:$4 sm:$0xff]  }
 0x5a7   :  { %4883 = vmatpush1.bf16.msra.mxu1 %v6407_v8  ;;  %v6473_v8 = vld [vmem:[#allocation8 + $0x550] ss:$24 sps:$4 sm:$0xff]  }
 0x5a8   :  { %4884 = vmatprep.subr.bf16.mxu1 %v6412_v58  ;;  %v6478_v58 = vld [vmem:[#allocation8 + $0x584] ss:$24 sps:$4 sm:$0xff]  }
 0x5ab   :  { %4885 = vmatpush1.bf16.msra.mxu1 %v6410_v36  ;;  %v6476_v36 = vld [vmem:[#allocation8 + $0x580] ss:$24 sps:$4 sm:$0xff]  }
 0x5ac   :  { %4886 = vmatprep.subr.bf16.mxu1 %v6415_v18  ;;  %v6481_v18 = vld [vmem:[#allocation8 + $0x5b4] ss:$24 sps:$4 sm:$0xff]  }
 0x5af   :  { %4887 = vmatpush1.bf16.msra.mxu1 %v6413_v45  ;;  %v6479_v45 = vld [vmem:[#allocation8 + $0x5b0] ss:$24 sps:$4 sm:$0xff]  }
 0x5b0   :  { %4888 = vmatprep.subr.bf16.mxu1 %v6418_v1  ;;  %v6484_v1 = vld [vmem:[#allocation8 + $0x5e4] ss:$24 sps:$4 sm:$0xff]  }
 0x5b3   :  { %4889 = vmatpush1.bf16.msra.mxu1 %v6416_v53  ;;  %v6482_v53 = vld [vmem:[#allocation8 + $0x5e0] ss:$24 sps:$4 sm:$0xff]  }
 0x5b4   :  { %4890 = vmatprep.subr.bf16.mxu1 %v6421_v59  ;;  %v6487_v59 = vld [vmem:[#allocation8 + $0x614] ss:$24 sps:$4 sm:$0xff]  }
 0x5b7   :  { %4891 = vmatpush1.bf16.msra.mxu1 %v6419_v9  ;;  %v6485_v9 = vld [vmem:[#allocation8 + $0x610] ss:$24 sps:$4 sm:$0xff]  }
 0x5b8   :  { %4892 = vmatprep.subr.bf16.mxu1 %v6424_v43  ;;  %v6490_v43 = vld [vmem:[#allocation8 + $0x644] ss:$24 sps:$4 sm:$0xff]  }
 0x5bb   :  { %4893 = vmatpush1.bf16.msra.mxu1 %v6422_v30  ;;  %v6488_v30 = vld [vmem:[#allocation8 + $0x640] ss:$24 sps:$4 sm:$0xff]  }
 0x5bc   :  { %4894 = vmatprep.subr.bf16.mxu1 %v6427_v39  ;;  %v6493_v39 = vld [vmem:[#allocation8 + $0x674] ss:$24 sps:$4 sm:$0xff]  }
 0x5bf   :  { %4895 = vmatpush1.bf16.msra.mxu1 %v6425_v42  ;;  %v6491_v42 = vld [vmem:[#allocation8 + $0x670] ss:$24 sps:$4 sm:$0xff]  }
 0x5c0   :  { %4896 = vmatprep.subr.bf16.mxu1 %v6430_v52  ;;  %v6496_v52 = vld [vmem:[#allocation8 + $0x6a4] ss:$24 sps:$4 sm:$0xff]  }
 0x5c3   :  { %4897 = vmatpush1.bf16.msra.mxu1 %v6428_v61  ;;  %v6494_v61 = vld [vmem:[#allocation8 + $0x6a0] ss:$24 sps:$4 sm:$0xff]  }
 0x5c4   :  { %4898 = vmatprep.subr.bf16.mxu1 %v6433_v46  ;;  %v6499_v46 = vld [vmem:[#allocation8 + $0x6d4] ss:$24 sps:$4 sm:$0xff]  }
 0x5c7   :  { %4899 = vmatpush1.bf16.msra.mxu1 %v6431_v57  ;;  %v6497_v57 = vld [vmem:[#allocation8 + $0x6d0] ss:$24 sps:$4 sm:$0xff]  }
 0x5c8   :  { %4900 = vmatprep.subr.bf16.mxu1 %v6436_v7  ;;  %v6502_v7 = vld [vmem:[#allocation8 + $0x704] ss:$24 sps:$4 sm:$0xff]  }
 0x5cb   :  { %4901 = vmatpush1.bf16.msra.mxu1 %v6434_v44  ;;  %v6505_v44 = vld [vmem:[#allocation8 + $0x734] ss:$24 sps:$4 sm:$0xff]  }
 0x5cc   :  { %4911 = vmatprep.subr.bf16.mxu1 %v6439_v3  ;;  %v6508_v3 = vld [vmem:[#allocation8 + $0x764] ss:$24 sps:$4 sm:$0xff]  }
 0x5ce   :  { %4903 = vmatmul.mubr.bf16.vlgmr.msra.gmra.mrb[4].mxu1 %v8743_v10  ;;  %v6538_v10 = vld [vmem:[#allocation11 + $0x10] sm:$0xff]  }
 0x5cf   :  { %4912 = vmatpush1.bf16.msra.mxu1 %v6437_v31  ;;  %4943 = vmatprep.mubr.bf16.mxu1 %v8751_v0  ;;  %v6451_v0 = vld [vmem:[#allocation8 + $0x3d4] ss:$24 sps:$4 sm:$0xff]   ;;  %v6506_v31 = vld [vmem:[#allocation8 + $0x760] ss:$24 sps:$4 sm:$0xff]  }
 0x5d0   :  { %4913 = vmatprep.subr.bf16.mxu1 %v6442_v21  ;;  %5925 = vmatpush3.bf16.msra.mxu0 %v6538_v10  ;;  %v6511_v21 = vld [vmem:[#allocation8 + $0x794] ss:$24 sps:$4 sm:$0xff]   ;;  %v6526_v10 = vld [vmem:[#allocation8 + $0x884] ss:$24 sps:$4 sm:$0xff]  }
 0x5d1   :  { %5926 = vmatprep.subr.bf16.mxu0 %v6539_v4  ;;  %v6524_v4 = vld [vmem:[#allocation8 + $0x880] ss:$24 sps:$4 sm:$0xff]  }
 0x5d3   :  { %4914 = vmatpush1.bf16.msra.mxu1 %v6440_v23  ;;  %v6517_v23 = vld [vmem:[#allocation8 + $0x7f4] ss:$24 sps:$4 sm:$0xff]  }
 0x5d4   :  { %4915 = vmatprep.subr.bf16.mxu1 %v6445_v51  ;;  %5927 = vmatpush3.bf16.msra.mxu0 %v6540_v27  ;;  %v6515_v51 = vld [vmem:[#allocation8 + $0x7f0] ss:$24 sps:$4 sm:$0xff]   ;;  %v6532_v27 = vld [vmem:[#allocation8 + $0x8e4] ss:$24 sps:$4 sm:$0xff]  }
 0x5d5   :  { %5928 = vmatprep.subr.bf16.mxu0 %v6541_v22  ;;  %v9289_v22 = vld [vmem:[#allocation21_spill] sm:$0xff] }
 0x5d7   :  { %4916 = vmatpush1.bf16.msra.mxu1 %v6443_v47  ;;  %v6523_v47 = vld [vmem:[#allocation8 + $0x854] ss:$24 sps:$4 sm:$0xff]  }
 0x5d8   :  { %4917 = vmatprep.subr.bf16.mxu1 %v6448_v13  ;;  %5929 = vmatpush3.bf16.msra.mxu0 %v6542_v62  ;;  %v6521_v13 = vld [vmem:[#allocation8 + $0x850] ss:$24 sps:$4 sm:$0xff]  }
 0x5d9   :  { %5930 = vmatprep.subr.bf16.mxu0 %v6543_v38  ;;  %v9290_v62 = vld [vmem:[#allocation23_spill] sm:$0xff] }
 0x5db   :  { %4918 = vmatpush1.bf16.msra.mxu1 %v6446_v11  ;;  %v6529_v11 = vld [vmem:[#allocation8 + $0x8b4] ss:$24 sps:$4 sm:$0xff]  }
 0x5dc   :  { %4919 = vmatprep.subr.bf16.mxu1 %v6451_v0  ;;  %5931 = vmatpush3.bf16.msra.mxu0 %v6544_v19  ;;  %v6527_v0 = vld [vmem:[#allocation8 + $0x8b0] ss:$24 sps:$4 sm:$0xff]  }
 0x5dd   :  { %5932 = vmatprep.subr.bf16.mxu0 %v6545_v2 }
 0x5df   :  { %4920 = vmatpush1.bf16.msra.mxu1 %v6449_v49  ;;  %v6530_v49 = vld [vmem:[#allocation8 + $0x8e0] ss:$24 sps:$4 sm:$0xff]  }
 0x5e0   :  { %4921 = vmatprep.subr.bf16.mxu1 %v6454_v16  ;;  %5933 = vmatpush3.bf16.msra.mxu0 %v6546_v5  ;;  %v8779_v16 = vld [vmem:[#allocation10] sm:$0x3f] }
 0x5e1   :  { %5934 = vmatprep.subr.bf16.mxu0 %v6547_v33 }
 0x5e3   :  { %4922 = vmatpush1.bf16.msra.mxu1 %v6452_v20  ;;  %v9288_v20 = vld [vmem:[#allocation22_spill] sm:$0xff] }
 0x5e4   :  { %4923 = vmatprep.subr.bf16.mxu1 %v6457_v63  ;;  %5935 = vmatpush3.bf16.msra.mxu0 %v6548_v34  ;;  %v3157_v63 = vrot.slane %v8779_v16, %v9288_v20 }
 0x5e5   :  { %5942 = vmatprep.subr.bf16.mxu0 %v6549_v6 }
 0x5e7   :  { %4924 = vmatpush1.bf16.msra.mxu1 %v6455_v32  ;;  %v3161_v32 = vrot.slane %v8779_v16, %v9289_v22 }
 0x5e8   :  { %4925 = vmatprep.subr.bf16.mxu1 %v6460_v29  ;;  %v3169_v29 = vrot.slane %v8779_v16, %v9290_v62 }
 0x5eb   :  { %4926 = vmatpush1.bf16.msra.mxu1 %v6458_v12 }
 0x5ec   :  { %4927 = vmatprep.subr.bf16.mxu1 %v6463_v50 }
 0x5ef   :  { %4928 = vmatpush1.bf16.msra.mxu1 %v6461_v40 }
 0x5f0   :  { %4929 = vmatprep.subr.bf16.mxu1 %v6466_v15 }
 0x5f3   :  { %4930 = vmatpush1.bf16.msra.mxu1 %v6464_v25 }
 0x5f4   :  { %4931 = vmatprep.subr.bf16.mxu1 %v6469_v17 }
 0x5f7   :  { %4932 = vmatpush1.bf16.msra.mxu1 %v6467_v14 }
 0x5f8   :  { %4933 = vmatprep.subr.bf16.mxu1 %v6472_v26  ;;  %v6550_v26 = vld [vmem:[#allocation11 + $0x80] sm:$0xff]  }
 0x5fb   :  { %4934 = vmatpush1.bf16.msra.mxu1 %v6470_v56 }
 0x5fc   :  { %4935 = vmatprep.subr.bf16.mxu1 %v6475_v24  ;;  %v6551_v24 = vld [vmem:[#allocation11 + $0xc8] sm:$0xff]  }
 0x5ff   :  { %4936 = vmatpush1.bf16.msra.mxu1 %v6473_v8 }
 0x600   :  { %4937 = vmatprep.subr.bf16.mxu1 %v6478_v58  ;;  %v6552_v58 = vld [vmem:[#allocation11 + $0x88] sm:$0xff]  }
 0x603   :  { %4938 = vmatpush1.bf16.msra.mxu1 %v6476_v36  ;;  %v6553_v36 = vld [vmem:[#allocation11 + $0xd0] sm:$0xff]  }
 0x604   :  { %4939 = vmatprep.subr.bf16.mxu1 %v6481_v18  ;;  %v6554_v18 = vld [vmem:[#allocation11 + $0x90] sm:$0xff]  }
 0x607   :  { %4940 = vmatpush1.bf16.msra.mxu1 %v6479_v45  ;;  %v6555_v45 = vld [vmem:[#allocation11 + $0xd8] sm:$0xff]  }
 0x608   :  { %4941 = vmatprep.subr.bf16.mxu1 %v6484_v1  ;;  %v9291_v1 = vld [vmem:[#allocation20_spill] sm:$0xff] }
 0x60b   :  { %4942 = vmatpush1.bf16.msra.mxu1 %v6482_v53  ;;  %v3165_v53 = vrot.slane %v8779_v16, %v9291_v1 }
 0x60c   :  { %4952 = vmatprep.subr.bf16.mxu1 %v6487_v59  ;;  %v6556_v59 = vld [vmem:[#allocation11 + $0x98] sm:$0xff]  }
 0x60e   :  { %4944 = vmatmul.mubr.bf16.vlgmr.msra.gmra.mrb[4].mxu1 %v8759_v28  ;;  %v6500_v28 = vld [vmem:[#allocation8 + $0x700] ss:$24 sps:$4 sm:$0xff]  }
 0x60f   :  { %4953 = vmatpush1.bf16.msra.mxu1 %v6485_v9  ;;  %4984 = vmatprep.mubr.bf16.mxu1 %v8761_v48  ;;  %v6503_v48 = vld [vmem:[#allocation8 + $0x730] ss:$24 sps:$4 sm:$0xff]  }
 0x610   :  { %4954 = vmatprep.subr.bf16.mxu1 %v6490_v43  ;;  %v6557_v9 = vld [vmem:[#allocation11 + $0xe0] sm:$0xff]  }
 0x613   :  { %4955 = vmatpush1.bf16.msra.mxu1 %v6488_v30  ;;  %v6558_v30 = vld [vmem:[#allocation11 + $0xa0] sm:$0xff]  }
 0x614   :  { %4956 = vmatprep.subr.bf16.mxu1 %v6493_v39  ;;  %v6559_v39 = vld [vmem:[#allocation11 + $0xe8] sm:$0xff]  }
 0x617   :  { %4957 = vmatpush1.bf16.msra.mxu1 %v6491_v42  ;;  %v6560_v42 = vld [vmem:[#allocation11 + $0xa8] sm:$0xff]  }
 0x618   :  { %4958 = vmatprep.subr.bf16.mxu1 %v6496_v52  ;;  %v6561_v52 = vld [vmem:[#allocation11 + $0xf0] sm:$0xff]  }
 0x61b   :  { %4959 = vmatpush1.bf16.msra.mxu1 %v6494_v61  ;;  %v6562_v61 = vld [vmem:[#allocation11 + $0xb0] sm:$0xff]  }
 0x61c   :  { %4960 = vmatprep.subr.bf16.mxu1 %v6499_v46  ;;  %v6563_v46 = vld [vmem:[#allocation11 + $0xf8] sm:$0xff]  }
 0x61f   :  { %4961 = vmatpush1.bf16.msra.mxu1 %v6497_v57  ;;  %v6564_v57 = vld [vmem:[#allocation11 + $0xb8] sm:$0xff]  }
 0x620   :  { %4962 = vmatprep.subr.bf16.mxu1 %v6502_v7  ;;  %v6565_v7 = vld [vmem:[#allocation11 + $0x140] sm:$0xff]  }
 0x623   :  { %4963 = vmatpush1.bf16.msra.mxu1 %v6500_v28 }
 0x624   :  { %4964 = vmatprep.subr.bf16.mxu1 %v6505_v44  ;;  %v6566_v44 = vld [vmem:[#allocation11 + $0x100] sm:$0xff]  }
 0x627   :  { %4965 = vmatpush1.bf16.msra.mxu1 %v6503_v48 }
 0x628   :  { %4966 = vmatprep.subr.bf16.mxu1 %v6508_v3  ;;  %v6567_v3 = vld [vmem:[#allocation11 + $0x148] sm:$0xff]  }
 0x62b   :  { %4967 = vmatpush1.bf16.msra.mxu1 %v6506_v31  ;;  %v6568_v31 = vld [vmem:[#allocation11 + $0x108] sm:$0xff]  }
 0x62c   :  { %4968 = vmatprep.subr.bf16.mxu1 %v6511_v21  ;;  %v6569_v21 = vld [vmem:[#allocation11 + $0x150] sm:$0xff]  }
 0x62f   :  { %4969 = vmatpush1.bf16.msra.mxu1 %v6509_v60  ;;  %v6570_v60 = vld [vmem:[#allocation11 + $0x110] sm:$0xff]  }
 0x630   :  { %4970 = vmatprep.subr.bf16.mxu1 %v6514_v35  ;;  %v6571_v35 = vld [vmem:[#allocation11 + $0x158] sm:$0xff]  }
 0x633   :  { %4971 = vmatpush1.bf16.msra.mxu1 %v6512_v54  ;;  %v6572_v54 = vld [vmem:[#allocation11 + $0x118] sm:$0xff]  }
 0x634   :  { %4972 = vmatprep.subr.bf16.mxu1 %v6517_v23  ;;  %v6573_v23 = vld [vmem:[#allocation11 + $0x160] sm:$0xff]  }
 0x637   :  { %4973 = vmatpush1.bf16.msra.mxu1 %v6515_v51  ;;  %v6574_v51 = vld [vmem:[#allocation11 + $0x120] sm:$0xff]  }
 0x638   :  { %4974 = vmatprep.subr.bf16.mxu1 %v6520_v37  ;;  %v6575_v37 = vld [vmem:[#allocation11 + $0x168] sm:$0xff]  }
 0x63b   :  { %4975 = vmatpush1.bf16.msra.mxu1 %v6518_v41  ;;  %v6576_v41 = vld [vmem:[#allocation11 + $0x128] sm:$0xff]  }
 0x63c   :  { %4976 = vmatprep.subr.bf16.mxu1 %v6523_v47  ;;  %v6577_v47 = vld [vmem:[#allocation11 + $0x170] sm:$0xff]  }
 0x63f   :  { %4977 = vmatpush1.bf16.msra.mxu1 %v6521_v13  ;;  %v6578_v13 = vld [vmem:[#allocation11 + $0x130] sm:$0xff]  }
 0x640   :  { %4978 = vmatprep.subr.bf16.mxu1 %v6526_v10  ;;  %v6579_v10 = vld [vmem:[#allocation11 + $0x178] sm:$0xff]  }
 0x643   :  { %4979 = vmatpush1.bf16.msra.mxu1 %v6524_v4  ;;  %v6580_v4 = vld [vmem:[#allocation11 + $0x138] sm:$0xff]  }
 0x644   :  { %4980 = vmatprep.subr.bf16.mxu1 %v6529_v11  ;;  %v9292_v11 = vld [vmem:[#allocation24_spill] sm:$0xff] }
 0x647   :  { %4981 = vmatpush1.bf16.msra.mxu1 %v6527_v0  ;;  %v3173_v0 = vrot.slane %v8779_v16, %v9292_v11 }
 0x648   :  { %4982 = vmatprep.subr.bf16.mxu1 %v6532_v27  ;;  %v9293_v27 = vld [vmem:[#allocation25_spill] sm:$0xff] }
 0x64b   :  { %4983 = vmatpush1.bf16.msra.mxu1 %v6530_v49  ;;  %v3177_v49 = vrot.slane %v8779_v16, %v9293_v27  ;;  %v5871_v16 = vld [vmem:[#allocation13] ss:$0 sm:$0xff] }
 0x64e   :  { %4985 = vmatmul.mubr.bf16.vlgmr.msra.gmra.mrb[4].mxu1 %v8769_v55 }
 0x661   :  { %v4740_v38 = vpop.f32.mrb[0].mxu1 }
 0x662   :  { %v5986_v12 = vadd.f32 %v4740_v38, %v3157_v63  ;;  %v4863_v19 = vpop.f32.mrb[12].mxu0  ;;  %v4742_v50 = vpop.f32.mrb[1].mxu1 }
 0x663   :  { %v5987_v2 = vadd.f32 %v4742_v50, %v3161_v32  ;;  %v4865_v40 = vpop.f32.mrb[13].mxu0  ;;  %v4744_v5 = vpop.f32.mrb[2].mxu1  ;;  %v5988_v43 = vadd.f32 %v4863_v19, %v3165_v53 }
 0x664   :  { %v5989_v15 = vadd.f32 %v4865_v40, %v3169_v29  ;;  %v4867_v55 = vpop.f32.mrb[14].mxu0  ;;  %v4745_v33 = vpop.f32.mrb[3].mxu1  ;;  %6583 = vtanh.f32 %v5986_v12 }
 0x665   :  { %v4868_v25 = vpop.f32.mrb[15].mxu0  ;;  %6585 = vtanh.f32 %v5987_v2 }
 0x666   :  { %6587 = vtanh.f32 %v5989_v15 }
 0x667   :  { %6589 = vtanh.f32 %v5988_v43 }
 0x66e   :  { %v6584_v34 = vpop.eup %6583 }
 0x66f   :  { %v6586_v17 = vpop.eup %6585  ;;  %v4999_v56 = vpack.c.bf16 %v6584_v34, %v6584_v34 }
 0x670   :  { %v6588_v6 = vpop.eup %6587  ;;  %v5000_v14 = vpack.c.bf16 %v6586_v17, %v6586_v17 }
 0x671   :  { %v5002_v8 = vpack.c.bf16 %v6588_v6, %v6588_v6  ;;  %v6590_v28 = vpop.eup %6589 }
 0x672   :  { %5428 = vmatprep.mubr.bf16.mxu0 %v5000_v14  ;;  %v5001_v48 = vpack.c.bf16 %v6590_v28, %v6590_v28 }
 0x673   :  { %5429 = vmatmul.mubr.bf16.vlgmr.msra.gmra.mrb[16].mxu0 %v4999_v56 }
 0x674   :  { %5943 = vmatpush3.bf16.msra.mxu0 %v6550_v26  ;;  %5468 = vmatprep.mubr.bf16.mxu0 %v5002_v8 }
 0x675   :  { %5944 = vmatprep.subr.bf16.mxu0 %v6551_v24 }
 0x678   :  { %5945 = vmatpush3.bf16.msra.mxu0 %v6552_v58 }
 0x679   :  { %5946 = vmatprep.subr.bf16.mxu0 %v6553_v36 }
 0x67c   :  { %5947 = vmatpush3.bf16.msra.mxu0 %v6554_v18 }
 0x67d   :  { %5948 = vmatprep.subr.bf16.mxu0 %v6555_v45 }
 0x680   :  { %5949 = vmatpush3.bf16.msra.mxu0 %v6556_v59 }
 0x681   :  { %5950 = vmatprep.subr.bf16.mxu0 %v6557_v9 }
 0x684   :  { %5951 = vmatpush3.bf16.msra.mxu0 %v6558_v30 }
 0x685   :  { %5952 = vmatprep.subr.bf16.mxu0 %v6559_v39 }
 0x688   :  { %5953 = vmatpush3.bf16.msra.mxu0 %v6560_v42 }
 0x689   :  { %5954 = vmatprep.subr.bf16.mxu0 %v6561_v52 }
 0x68c   :  { %5955 = vmatpush3.bf16.msra.mxu0 %v6562_v61 }
 0x68d   :  { %5956 = vmatprep.subr.bf16.mxu0 %v6563_v46 }
 0x690   :  { %5957 = vmatpush3.bf16.msra.mxu0 %v6564_v57 }
 0x691   :  { %5964 = vmatprep.subr.bf16.mxu0 %v6565_v7 }
 0x693   :  { %5469 = vmatmul.mubr.bf16.vlgmr.msra.gmra.mrb[20].mxu0 %v5001_v48 }
 0x694   :  { %5965 = vmatpush3.bf16.msra.mxu0 %v6566_v44 }
 0x695   :  { %5966 = vmatprep.subr.bf16.mxu0 %v6567_v3 }
 0x698   :  { %5967 = vmatpush3.bf16.msra.mxu0 %v6568_v31 }
 0x699   :  { %5968 = vmatprep.subr.bf16.mxu0 %v6569_v21 }
 0x69c   :  { %5969 = vmatpush3.bf16.msra.mxu0 %v6570_v60 }
 0x69d   :  { %5970 = vmatprep.subr.bf16.mxu0 %v6571_v35 }
 0x6a0   :  { %5971 = vmatpush3.bf16.msra.mxu0 %v6572_v54 }
 0x6a1   :  { %5972 = vmatprep.subr.bf16.mxu0 %v6573_v23 }
 0x6a4   :  { %5973 = vmatpush3.bf16.msra.mxu0 %v6574_v51 }
 0x6a5   :  { %5974 = vmatprep.subr.bf16.mxu0 %v6575_v37 }
 0x6a8   :  { %5975 = vmatpush3.bf16.msra.mxu0 %v6576_v41 }
 0x6a9   :  { %5976 = vmatprep.subr.bf16.mxu0 %v6577_v47 }
 0x6ac   :  { %5977 = vmatpush3.bf16.msra.mxu0 %v6578_v13 }
 0x6ad   :  { %5978 = vmatprep.subr.bf16.mxu0 %v6579_v10 }
 0x6b0   :  { %5979 = vmatpush3.bf16.msra.mxu0 %v6580_v4 }
 0x721   :  { %v4986_v20 = vpop.f32.mrb[4].mxu1 }
 0x722   :  { %v5990_v63 = vadd.f32 %v4986_v20, %v3173_v0  ;;  %v4988_v22 = vpop.f32.mrb[5].mxu1 }
 0x723   :  { %v5991_v32 = vadd.f32 %v4988_v22, %v3177_v49  ;;  %v4990_v62 = vpop.f32.mrb[6].mxu1 }
 0x724   :  { %6591 = vtanh.f32 %v5990_v63  ;;  %v4991_v29 = vpop.f32.mrb[7].mxu1 }
 0x725   :  { %6593 = vtanh.f32 %v5991_v32 }
 0x72e   :  { %v6592_v38 = vpop.eup %6591 }
 0x72f   :  { %v6594_v12 = vpop.eup %6593  ;;  %v5003_v50 = vpack.c.bf16 %v6592_v38, %v6592_v38 }
 0x730   :  { %v5004_v19 = vpack.c.bf16 %v6594_v12, %v6594_v12 }
 0x732   :  { %5508 = vmatprep.mubr.bf16.mxu0 %v5004_v19 }
 0x733   :  { %5509 = vmatmul.mubr.bf16.vlgmr.msra.gmra.mrb[24].mxu0 %v5003_v50 }
 0x746   :  { %v5936_v2 = vpop.f32.mrb[16].mxu0 }
 0x747   :  { %v5937_v40 = vpop.f32.mrb[17].mxu0 }
 0x748   :  { %v5938_v5 = vadd.f32 %v5937_v40, %v5936_v2  ;;  %v5939_v15 = vpop.f32.mrb[18].mxu0 }
 0x749   :  { %v5940_v55 = vpop.f32.mrb[19].mxu0 }
 0x74a   :  { %v5431_v34 = vadd.f32 %v5938_v5, %v5871_v16 }
 0x766   :  { %v5958_v33 = vpop.f32.mrb[20].mxu0 }
 0x767   :  { %v5959_v25 = vpop.f32.mrb[21].mxu0 }
 0x768   :  { %v5960_v17 = vadd.f32 %v5959_v25, %v5958_v33  ;;  %v5961_v6 = vpop.f32.mrb[22].mxu0 }
 0x769   :  { %v5962_v14 = vpop.f32.mrb[23].mxu0 }
 0x76a   :  { %v5471_v26 = vadd.f32 %v5960_v17, %v5431_v34 }
 0x806   :  { %v5980_v56 = vpop.f32.mrb[24].mxu0 }
 0x807   :  { %v5981_v24 = vpop.f32.mrb[25].mxu0 }
 0x808   :  { %v5982_v8 = vadd.f32 %v5981_v24, %v5980_v56  ;;  %v5983_v58 = vpop.f32.mrb[26].mxu0 }
 0x809   :  { %v5984_v36 = vpop.f32.mrb[27].mxu0 }
 0x80a   :  { %v5511_v18 = vadd.f32 %v5982_v8, %v5471_v26 }
 0x80c   :  { %5516 = vst [vmem:[#allocation14] sm:$0xff] %v5511_v18 }
 0x80d   :  { %6761 = shalt.err (!%p6758_p4)
}
 0x80e   :  { %s6762_s15 = scalar_lea.hbm %s8812_s7, 128 }
 0x80f   :  { %p6763_p5 = scmp.ne.s32.totalorder %s8812_s7, %s6762_s15  ;;  %p6766_p6 = scmp.lt.u32.totalorder %s6762_s15, %s8812_s7 }
 0x811   :  { %p6768_p7 = pnand %p6766_p6, %p6763_p5 }
 0x813   :  { %6771 = shalt.err (!%p6768_p7)
}
 0x814   :  { %5526 = dma.vmem_to_hbm [thread:$0]  %s5524_s3, 128, %s8812_s7, [#allocation4]  }
 0x815   :  { %6780 = dma.done.wait [#allocation4], 128  }
 0x816   :  { %6781 = vsyncadd [#allocation4], 4294967168 }
 0x817   :  { %5530 = vsyncpa [#allocation3], 1 }
 0x818   :  { %5531 = vsyncpa [#allocation6], 1 }
 0x819   :  { %5532 = vsyncpa [#allocation9], 1 }
 0x81a   :  { %5533 = vsyncpa [#allocation12], 1 }
 0x81b   :  { %5534 = vsyncpa [#allocation4], 1 }

</bundles_post_ra>
